<compile_context>
chip_gen: v7x
topology: tpu7x:2x2x1
jax: 0.10.0
libtpu: 0.0.40
codegen_flags: <defaults>
</compile_context>

<pallas_src>
import functools

import jax
import jax.numpy as jnp
from jax.experimental import pallas as pl
from jax.experimental.pallas import tpu as pltpu

LN_EPS = 1e-5
VEC_ROWS = 8      # packed per-layer vector rows in the constants blob
MASK_ROWS = 8     # padded block holding the two direction-mask rows


def _layer_norm_grouped(y, sel, gamma, beta):
    """Grouped LayerNorm of y (N, C) with ONE selector matmul.

    `sel` is (C, C) with sel[c, c'] = 1/group_size when c and c' belong to the same
    group (direction) else 0, so a single MXU matmul produces the per-group mean and
    mean-of-squares already broadcast to every column of the group (no second
    broadcast matmul, no cross-lane VPU/XLU work).
    """
    n = y.shape[0]
    yy = jnp.concatenate([y, y * y], axis=0)
    stats = jnp.dot(yy, sel, preferred_element_type=jnp.float32)   # (2N, C)
    mu, msq = stats[:n], stats[n:]
    rstd = jax.lax.rsqrt(msq - mu * mu + LN_EPS)
    return (y - mu) * rstd * gamma + beta


def encoder_kernel(x_ref, wih_ref, whh_ref, consts_ref, out_ref, gi_scr, h_scr,
                   *, T, B, H, ndir, num_layers, d_ins, din_pad):
    """Whole RNNEncoder forward (all layers, both directions), fully VMEM resident."""
    GW = ndir * 4 * H          # fused gate width  (128 for H=16, bidirectional)
    SW = ndir * H              # fused state width (32)
    selg_off = num_layers * VEC_ROWS
    sels_off = selg_off + GW
    mask_off = sels_off + SW

    # Hoisted constants (loaded once per call).
    sel_g = consts_ref[pl.ds(selg_off, GW), :]              # (GW, GW) gate-space LN selector
    sel_s = consts_ref[pl.ds(sels_off, SW), :][:, :SW]      # (SW, SW) state-space LN selector
    if ndir == 2:
        mrows = consts_ref[pl.ds(mask_off, MASK_ROWS), :]
        mask_f = mrows[0:1, :]                              # forward-direction gate columns
        mask_b = mrows[1:2, :]                              # backward-direction gate columns

    # Time-major input: row index = t*B + b (wrapper already transposed, mirroring the
    # reference's torch.transpose(x, 1, 0)).
    layer_in = x_ref[...].reshape(T * B, d_ins[0])

    for layer in range(num_layers):
        d_in = d_ins[layer]
        wih = wih_ref[pl.ds(layer * din_pad, d_in), :]      # (d_in, GW)
        whh = whh_ref[pl.ds(layer * SW, SW), :]             # (SW, GW), block-diag over dirs
        vecs = consts_ref[pl.ds(layer * VEC_ROWS, VEC_ROWS), :]
        b_ih, g_ih, be_ih = vecs[0:1, :], vecs[1:2, :], vecs[2:3, :]
        b_hh, g_hh, be_hh = vecs[3:4, :], vecs[4:5, :], vecs[5:6, :]
        g_ho, be_ho = vecs[6:7, :SW], vecs[7:8, :SW]

        # --- Hoisted input projection: one matmul + one LN covers ALL timesteps and
        #     BOTH directions; only h @ W_hh remains on the serial per-step path. ---
        gi = jnp.dot(layer_in, wih, preferred_element_type=jnp.float32) + b_ih
        gi = _layer_norm_grouped(gi, sel_g, g_ih, be_ih).reshape(T, B, GW)

        # --- Hoisted direction combine: step s consumes forward gates of time s and
        #     backward gates of time T-1-s; precompute once per layer (static flip). ---
        if ndir == 2:
            gi_rev = jnp.concatenate([gi[T - 1 - t:T - t] for t in range(T)], axis=0)
            gi = gi * mask_f + gi_rev * mask_b
        gi_scr[...] = gi        # time-major staging; per-step read is a leading-dim slab

        h = jnp.zeros((B, SW), jnp.float32)
        c = jnp.zeros((B, SW), jnp.float32)
        # Static fully-unrolled recurrence (T small & static).  For large / dynamic T
        # switch to lax.fori_loop(..., unroll=k) with the same scratch layout.
        for s in range(T):
            # Both directions in one lane-dense (B, 2H) x (2H, 8H) recurrent matmul.
            gh = jnp.dot(h, whh, preferred_element_type=jnp.float32) + b_hh
            gh = _layer_norm_grouped(gh, sel_g, g_hh, be_hh)
            gates = gi_scr[s] + gh                          # (B, GW)
            sig = jax.nn.sigmoid(gates)     # single EUP pass over the full gate vreg
            i_g = sig[:, 0 * SW:1 * SW]                     # [i_fwd | i_bwd]
            f_g = sig[:, 1 * SW:2 * SW]
            o_g = sig[:, 3 * SW:4 * SW]
            g_g = jnp.tanh(gates[:, 2 * SW:3 * SW])
            c = f_g * c + i_g * g_g
            h = o_g * jnp.tanh(_layer_norm_grouped(c, sel_s, g_ho, be_ho))
            # Memory bank written time-major: the forward output of step s belongs to
            # time s, the backward output of step s belongs to time T-1-s.
            if ndir == 2:
                h_scr[s, :, 0:H] = h[:, 0:H]
                h_scr[T - 1 - s, :, H:SW] = h[:, H:SW]
            else:
                h_scr[s] = h

        if layer == num_layers - 1:
            # memory_bank[-1]: only the (B, ndir*H) final state goes back to HBM.
            out_ref[...] = h_scr[T - 1]
        else:
            # Next layer's hoisted projection consumes the full time-major memory bank.
            layer_in = h_scr[...].reshape(T * B, SW)
    # TODO(synk): inter-layer dropout omitted (module default dropout=0.0).


def rnn_encoder_forward(x, mask, packed, *, num_layers, ndir, hidden_per_dir,
                        input_size):
    """x: (B, T, input_size); mask: (B, T) -- unused, matching the PyTorch forward.

    One fused pallas_call for the whole encoder (all layers & directions).  The kernel
    is latency-bound on the serial recurrence, so raising B per call is nearly free
    throughput; for very large batches on v7x, split B over a leading "parallel" grid
    axis (block a multiple of 8) to engage the second TensorCore.  If B/T/D grow so
    the VMEM-resident gi block approaches ~8-16 MiB, raise vmem_limit_bytes via
    pltpu.CompilerParams or tile the hoisted projection with a grid.
    """
    del mask  # unused in the reference forward
    B, T, _ = x.shape
    H = hidden_per_dir
    GW, SW = ndir * 4 * H, ndir * H
    wih_all, whh_all, consts = packed
    din_pad = wih_all.shape[0] // num_layers
    d_ins = (input_size,) + (SW,) * (num_layers - 1)

    # Mirrors the reference's `x = torch.transpose(x, 1, 0)`: hand the kernel a
    # time-major input so every per-step access is a contiguous leading-dim slab.
    x_tm = jnp.transpose(x, (1, 0, 2))

    vmem = pl.BlockSpec(memory_space=pltpu.MemorySpace.VMEM)
    kernel = functools.partial(encoder_kernel, T=T, B=B, H=H, ndir=ndir,
                               num_layers=num_layers, d_ins=d_ins, din_pad=din_pad)
    return pl.pallas_call(
        kernel,
        out_shape=jax.ShapeDtypeStruct((B, SW), jnp.float32),
        in_specs=[vmem] * 4,
        out_specs=vmem,
        scratch_shapes=[pltpu.VMEM((T, B, GW), jnp.float32),   # gi (post dir-combine)
                        pltpu.VMEM((T, B, SW), jnp.float32)],  # time-major memory bank
    )(x_tm, wih_all, whh_all, consts)


def init_params(key, num_layers, bidirectional, input_size, hidden):
    """Per-(layer, direction) init mirroring initialize_parameters():
    xavier_normal for dim>1, normal for dim==1.  Weights stored pre-transposed."""
    dirs = 2 if bidirectional else 1
    params = []
    for layer_idx in range(num_layers):
        d_in = input_size if layer_idx == 0 else hidden * dirs
        layer = []
        for _ in range(dirs):
            key, *ks = jax.random.split(key, 11)

            def xavier(k, shape):
                std = (2.0 / (shape[0] + shape[1])) ** 0.5
                return std * jax.random.normal(k, shape, jnp.float32)

            w_ih = xavier(ks[0], (d_in, 4 * hidden))            # (D_in, 4H)
            w_hh = xavier(ks[1], (hidden, 4 * hidden))          # (H, 4H)
            b_ih = jax.random.normal(ks[2], (1, 4 * hidden), jnp.float32)
            b_hh = jax.random.normal(ks[3], (1, 4 * hidden), jnp.float32)
            g_ih = jax.random.normal(ks[4], (1, 4 * hidden), jnp.float32)
            be_ih = jax.random.normal(ks[5], (1, 4 * hidden), jnp.float32)
            g_hh = jax.random.normal(ks[6], (1, 4 * hidden), jnp.float32)
            be_hh = jax.random.normal(ks[7], (1, 4 * hidden), jnp.float32)
            g_ho = jax.random.normal(ks[8], (1, hidden), jnp.float32)
            be_ho = jax.random.normal(ks[9], (1, hidden), jnp.float32)
            layer.append((w_ih, w_hh, b_ih, b_hh,
                          g_ih, be_ih, g_hh, be_hh, g_ho, be_ho))
        params.append(layer)
    return params


def pack_params(params, input_size, hidden, ndir):
    """Fuse per-(layer, direction) parameters into 3 lane-dense arrays (4 DMAs total
    with x, vs ~21 before).

    Fused gate columns (width ndir*4H) are gate-major / direction-minor:
      [i_d0 .. i_d{n-1} | f_* | g_* | o_*], each sub-block H wide, so direction of
      column c is (c // H) % ndir and the i/f/g/o splits are contiguous ndir*H slices
      that line up with the fused [h_d0 | h_d1] state.  W_hh is block-diagonal over
      directions so one (B, ndir*H) x (ndir*H, ndir*4H) matmul serves both directions.
    """
    H = hidden
    GW = ndir * 4 * H
    SW = ndir * H
    L = len(params)
    d_ins = [input_size] + [SW] * (L - 1)
    din_pad = ((max(d_ins) + 7) // 8) * 8

    def gate_cols(layer, idx):
        blocks = []
        for k in range(4):
            for d in range(ndir):
                blocks.append(layer[d][idx][..., k * H:(k + 1) * H])
        return jnp.concatenate(blocks, axis=-1)

    wih_blocks, whh_blocks, vec_blocks = [], [], []
    for layer in params:
        w_ih = gate_cols(layer, 0)                                   # (d_in, GW)
        pad = din_pad - w_ih.shape[0]
        if pad:
            w_ih = jnp.concatenate([w_ih, jnp.zeros((pad, GW), jnp.float32)], axis=0)
        wih_blocks.append(w_ih)

        blocks = []
        for k in range(4):
            for d in range(ndir):
                col = [layer[dd][1][:, k * H:(k + 1) * H] if dd == d
                       else jnp.zeros((H, H), jnp.float32) for dd in range(ndir)]
                blocks.append(jnp.concatenate(col, axis=0))
        whh_blocks.append(jnp.concatenate(blocks, axis=-1))          # (SW, GW)

        def pad_state_row(v):                                        # (1, SW) -> (1, GW)
            return jnp.concatenate([v, jnp.zeros((1, GW - SW), jnp.float32)], axis=-1)

        g_ho = pad_state_row(jnp.concatenate([layer[d][8] for d in range(ndir)], axis=-1))
        be_ho = pad_state_row(jnp.concatenate([layer[d][9] for d in range(ndir)], axis=-1))
        vec_blocks.append(jnp.concatenate(
            [gate_cols(layer, 2),    # b_ih
             gate_cols(layer, 4),    # g_ih
             gate_cols(layer, 5),    # be_ih
             gate_cols(layer, 3),    # b_hh
             gate_cols(layer, 6),    # g_hh
             gate_cols(layer, 7),    # be_hh
             g_ho, be_ho], axis=0))                                  # (8, GW)

    wih_all = jnp.concatenate(wih_blocks, axis=0)                    # (L*din_pad, GW)
    whh_all = jnp.concatenate(whh_blocks, axis=0)                    # (L*SW, GW)

    # LayerNorm group selectors, pre-scaled by 1/group_size so one matmul yields the
    # per-group mean / mean-square already broadcast to every column of the group.
    ggrp = (jnp.arange(GW) // H) % ndir
    sel_g = (ggrp[:, None] == ggrp[None, :]).astype(jnp.float32) / float(4 * H)
    sgrp = (jnp.arange(SW) // H) % ndir
    sel_s = (sgrp[:, None] == sgrp[None, :]).astype(jnp.float32) / float(H)
    sel_s = jnp.concatenate([sel_s, jnp.zeros((SW, GW - SW), jnp.float32)], axis=-1)

    masks = jnp.zeros((MASK_ROWS, GW), jnp.float32)
    masks = masks.at[0].set((ggrp == 0).astype(jnp.float32))
    masks = masks.at[1].set((ggrp == 1).astype(jnp.float32))

    consts = jnp.concatenate(
        [jnp.concatenate(vec_blocks, axis=0), sel_g, sel_s, masks], axis=0)
    return wih_all, whh_all, consts


if __name__ == "__main__":
    # Module config: bidirectional=True, num_layers=2, input_size=16, hidden_size=32
    bidirectional = True
    num_layers = 2
    input_size = 16
    hidden_size = 32
    num_directions = 2 if bidirectional else 1
    assert hidden_size % num_directions == 0
    hidden_per_dir = hidden_size // num_directions

    B, T = 2, 8
    key = jax.random.PRNGKey(0)
    kx, kp = jax.random.split(key)
    x = jax.random.normal(kx, (B, T, input_size), jnp.float32)
    mask = jnp.ones((B, T), jnp.float32)

    params = init_params(kp, num_layers, bidirectional, input_size, hidden_per_dir)
    packed = pack_params(params, input_size, hidden_per_dir, num_directions)

    final_state = rnn_encoder_forward(
        x, mask, packed, num_layers=num_layers, ndir=num_directions,
        hidden_per_dir=hidden_per_dir, input_size=input_size)
    final_state = jax.block_until_ready(final_state)

    assert final_state.shape == (B, hidden_size), final_state.shape
    assert bool(jnp.all(jnp.isfinite(final_state)))
    print("KERNEL_OK")
</pallas_src>

<mosaic_0001>
module attributes {stable_mosaic.version = 11 : i64} {
  func.func @encoder_kernel(%arg0: memref<8x2x16xf32, #tpu.memory_space<vmem>>, %arg1: memref<64x128xf32, #tpu.memory_space<vmem>>, %arg2: memref<64x128xf32, #tpu.memory_space<vmem>>, %arg3: memref<184x128xf32, #tpu.memory_space<vmem>>, %arg4: memref<2x32xf32, #tpu.memory_space<vmem>>, %arg5: memref<8x2x128xf32, #tpu.memory_space<vmem>>, %arg6: memref<8x2x32xf32, #tpu.memory_space<vmem>>) attributes {dimension_semantics = [], scalar_prefetch = 0 : i64, scratch_operands = 2 : i64, tpu.core_type = #tpu.core_type<tc>} {
    %c16 = arith.constant 16 : index
    %c0 = arith.constant 0 : index
    %0 = vector.load %arg3[%c16, %c0] : memref<184x128xf32, #tpu.memory_space<vmem>>, vector<128x128xf32>
    %c144 = arith.constant 144 : index
    %c0_0 = arith.constant 0 : index
    %1 = vector.load %arg3[%c144, %c0_0] : memref<184x128xf32, #tpu.memory_space<vmem>>, vector<32x128xf32>
    %2 = vector.extract_strided_slice %1 {offsets = [0, 0], sizes = [32, 32], strides = [1, 1]} : vector<32x128xf32> to vector<32x32xf32>
    %c176 = arith.constant 176 : index
    %c0_1 = arith.constant 0 : index
    %3 = vector.load %arg3[%c176, %c0_1] : memref<184x128xf32, #tpu.memory_space<vmem>>, vector<8x128xf32>
    %4 = vector.extract_strided_slice %3 {offsets = [0, 0], sizes = [1, 128], strides = [1, 1]} : vector<8x128xf32> to vector<1x128xf32>
    %5 = vector.extract_strided_slice %3 {offsets = [1, 0], sizes = [1, 128], strides = [1, 1]} : vector<8x128xf32> to vector<1x128xf32>
    %c0_2 = arith.constant 0 : index
    %c0_3 = arith.constant 0 : index
    %c0_4 = arith.constant 0 : index
    %6 = vector.load %arg0[%c0_2, %c0_3, %c0_4] : memref<8x2x16xf32, #tpu.memory_space<vmem>>, vector<8x2x16xf32>
    %7 = vector.shape_cast %6 : vector<8x2x16xf32> to vector<16x16xf32>
    %c0_5 = arith.constant 0 : index
    %c0_6 = arith.constant 0 : index
    %8 = vector.load %arg1[%c0_5, %c0_6] : memref<64x128xf32, #tpu.memory_space<vmem>>, vector<16x128xf32>
    %c0_7 = arith.constant 0 : index
    %c0_8 = arith.constant 0 : index
    %9 = vector.load %arg2[%c0_7, %c0_8] : memref<64x128xf32, #tpu.memory_space<vmem>>, vector<32x128xf32>
    %c0_9 = arith.constant 0 : index
    %c0_10 = arith.constant 0 : index
    %10 = vector.load %arg3[%c0_9, %c0_10] : memref<184x128xf32, #tpu.memory_space<vmem>>, vector<8x128xf32>
    %11 = vector.extract_strided_slice %10 {offsets = [0, 0], sizes = [1, 128], strides = [1, 1]} : vector<8x128xf32> to vector<1x128xf32>
    %12 = vector.extract_strided_slice %10 {offsets = [1, 0], sizes = [1, 128], strides = [1, 1]} : vector<8x128xf32> to vector<1x128xf32>
    %13 = vector.extract_strided_slice %10 {offsets = [2, 0], sizes = [1, 128], strides = [1, 1]} : vector<8x128xf32> to vector<1x128xf32>
    %14 = vector.extract_strided_slice %10 {offsets = [3, 0], sizes = [1, 128], strides = [1, 1]} : vector<8x128xf32> to vector<1x128xf32>
    %15 = vector.extract_strided_slice %10 {offsets = [4, 0], sizes = [1, 128], strides = [1, 1]} : vector<8x128xf32> to vector<1x128xf32>
    %16 = vector.extract_strided_slice %10 {offsets = [5, 0], sizes = [1, 128], strides = [1, 1]} : vector<8x128xf32> to vector<1x128xf32>
    %17 = vector.extract_strided_slice %10 {offsets = [6, 0], sizes = [1, 32], strides = [1, 1]} : vector<8x128xf32> to vector<1x32xf32>
    %18 = vector.extract_strided_slice %10 {offsets = [7, 0], sizes = [1, 32], strides = [1, 1]} : vector<8x128xf32> to vector<1x32xf32>
    %cst = arith.constant dense<0.000000e+00> : vector<16x128xf32>
    %19 = tpu.matmul %7, %8, %cst {dimension_numbers = #tpu.dot_dimension_numbers<[1], [0], [0], [1], [0, 0, 1, 1], [], []>} : vector<16x16xf32>, vector<16x128xf32>, vector<16x128xf32> -> vector<16x128xf32>
    %20 = vector.broadcast %11 : vector<1x128xf32> to vector<16x128xf32>
    %21 = arith.addf %19, %20 : vector<16x128xf32>
    %22 = arith.mulf %21, %21 : vector<16x128xf32>
    %23 = tpu.concatenate %21, %22 in 0 : vector<16x128xf32>, vector<16x128xf32> -> vector<32x128xf32>
    %cst_11 = arith.constant dense<0.000000e+00> : vector<32x128xf32>
    %24 = tpu.matmul %23, %0, %cst_11 {dimension_numbers = #tpu.dot_dimension_numbers<[1], [0], [0], [1], [0, 0, 1, 1], [], []>} : vector<32x128xf32>, vector<128x128xf32>, vector<32x128xf32> -> vector<32x128xf32>
    %25 = vector.extract_strided_slice %24 {offsets = [0, 0], sizes = [16, 128], strides = [1, 1]} : vector<32x128xf32> to vector<16x128xf32>
    %26 = vector.extract_strided_slice %24 {offsets = [16, 0], sizes = [16, 128], strides = [1, 1]} : vector<32x128xf32> to vector<16x128xf32>
    %27 = arith.mulf %25, %25 : vector<16x128xf32>
    %28 = arith.subf %26, %27 : vector<16x128xf32>
    %cst_12 = arith.constant 9.99999974E-6 : f32
    %29 = vector.broadcast %cst_12 : f32 to vector<16x128xf32>
    %30 = arith.addf %28, %29 : vector<16x128xf32>
    %31 = math.rsqrt %30 : vector<16x128xf32>
    %32 = arith.subf %21, %25 : vector<16x128xf32>
    %33 = arith.mulf %32, %31 : vector<16x128xf32>
    %34 = vector.broadcast %12 : vector<1x128xf32> to vector<16x128xf32>
    %35 = arith.mulf %33, %34 : vector<16x128xf32>
    %36 = vector.broadcast %13 : vector<1x128xf32> to vector<16x128xf32>
    %37 = arith.addf %35, %36 : vector<16x128xf32>
    %38 = vector.shape_cast %37 : vector<16x128xf32> to vector<8x2x128xf32>
    %39 = vector.extract_strided_slice %38 {offsets = [7, 0, 0], sizes = [1, 2, 128], strides = [1, 1, 1]} : vector<8x2x128xf32> to vector<1x2x128xf32>
    %40 = vector.extract_strided_slice %38 {offsets = [6, 0, 0], sizes = [1, 2, 128], strides = [1, 1, 1]} : vector<8x2x128xf32> to vector<1x2x128xf32>
    %41 = vector.extract_strided_slice %38 {offsets = [5, 0, 0], sizes = [1, 2, 128], strides = [1, 1, 1]} : vector<8x2x128xf32> to vector<1x2x128xf32>
    %42 = vector.extract_strided_slice %38 {offsets = [4, 0, 0], sizes = [1, 2, 128], strides = [1, 1, 1]} : vector<8x2x128xf32> to vector<1x2x128xf32>
    %43 = vector.extract_strided_slice %38 {offsets = [3, 0, 0], sizes = [1, 2, 128], strides = [1, 1, 1]} : vector<8x2x128xf32> to vector<1x2x128xf32>
    %44 = vector.extract_strided_slice %38 {offsets = [2, 0, 0], sizes = [1, 2, 128], strides = [1, 1, 1]} : vector<8x2x128xf32> to vector<1x2x128xf32>
    %45 = vector.extract_strided_slice %38 {offsets = [1, 0, 0], sizes = [1, 2, 128], strides = [1, 1, 1]} : vector<8x2x128xf32> to vector<1x2x128xf32>
    %46 = vector.extract_strided_slice %38 {offsets = [0, 0, 0], sizes = [1, 2, 128], strides = [1, 1, 1]} : vector<8x2x128xf32> to vector<1x2x128xf32>
    %47 = tpu.concatenate %39, %40, %41, %42, %43, %44, %45, %46 in 0 : vector<1x2x128xf32>, vector<1x2x128xf32>, vector<1x2x128xf32>, vector<1x2x128xf32>, vector<1x2x128xf32>, vector<1x2x128xf32>, vector<1x2x128xf32>, vector<1x2x128xf32> -> vector<8x2x128xf32>
    %48 = vector.shape_cast %4 : vector<1x128xf32> to vector<1x1x128xf32>
    %49 = vector.broadcast %48 : vector<1x1x128xf32> to vector<8x2x128xf32>
    %50 = arith.mulf %38, %49 : vector<8x2x128xf32>
    %51 = vector.shape_cast %5 : vector<1x128xf32> to vector<1x1x128xf32>
    %52 = vector.broadcast %51 : vector<1x1x128xf32> to vector<8x2x128xf32>
    %53 = arith.mulf %47, %52 : vector<8x2x128xf32>
    %54 = arith.addf %50, %53 : vector<8x2x128xf32>
    %c0_13 = arith.constant 0 : index
    %c0_14 = arith.constant 0 : index
    %c0_15 = arith.constant 0 : index
    %55 = vector.load %arg5[%c0_13, %c0_14, %c0_15] : memref<8x2x128xf32, #tpu.memory_space<vmem>>, vector<8x2x128xf32>
    tpu.vector_store %arg5[%c0_13, %c0_14, %c0_15], %54 {strides = array<i32>} : memref<8x2x128xf32, #tpu.memory_space<vmem>>, vector<8x2x128xf32>,
    %cst_16 = arith.constant 0.000000e+00 : f32
    %56 = vector.broadcast %cst_16 : f32 to vector<2x32xf32>
    %cst_17 = arith.constant 0.000000e+00 : f32
    %57 = vector.broadcast %cst_17 : f32 to vector<2x32xf32>
    %cst_18 = arith.constant dense<0.000000e+00> : vector<2x128xf32>
    %58 = tpu.matmul %56, %9, %cst_18 {dimension_numbers = #tpu.dot_dimension_numbers<[1], [0], [0], [1], [0, 0, 1, 1], [], []>} : vector<2x32xf32>, vector<32x128xf32>, vector<2x128xf32> -> vector<2x128xf32>
    %59 = vector.broadcast %14 : vector<1x128xf32> to vector<2x128xf32>
    %60 = arith.addf %58, %59 : vector<2x128xf32>
    %61 = arith.mulf %60, %60 : vector<2x128xf32>
    %62 = tpu.concatenate %60, %61 in 0 : vector<2x128xf32>, vector<2x128xf32> -> vector<4x128xf32>
    %cst_19 = arith.constant dense<0.000000e+00> : vector<4x128xf32>
    %63 = tpu.matmul %62, %0, %cst_19 {dimension_numbers = #tpu.dot_dimension_numbers<[1], [0], [0], [1], [0, 0, 1, 1], [], []>} : vector<4x128xf32>, vector<128x128xf32>, vector<4x128xf32> -> vector<4x128xf32>
    %64 = vector.extract_strided_slice %63 {offsets = [0, 0], sizes = [2, 128], strides = [1, 1]} : vector<4x128xf32> to vector<2x128xf32>
    %65 = vector.extract_strided_slice %63 {offsets = [2, 0], sizes = [2, 128], strides = [1, 1]} : vector<4x128xf32> to vector<2x128xf32>
    %66 = arith.mulf %64, %64 : vector<2x128xf32>
    %67 = arith.subf %65, %66 : vector<2x128xf32>
    %cst_20 = arith.constant 9.99999974E-6 : f32
    %68 = vector.broadcast %cst_20 : f32 to vector<2x128xf32>
    %69 = arith.addf %67, %68 : vector<2x128xf32>
    %70 = math.rsqrt %69 : vector<2x128xf32>
    %71 = arith.subf %60, %64 : vector<2x128xf32>
    %72 = arith.mulf %71, %70 : vector<2x128xf32>
    %73 = vector.broadcast %15 : vector<1x128xf32> to vector<2x128xf32>
    %74 = arith.mulf %72, %73 : vector<2x128xf32>
    %75 = vector.broadcast %16 : vector<1x128xf32> to vector<2x128xf32>
    %76 = arith.addf %74, %75 : vector<2x128xf32>
    %c0_21 = arith.constant 0 : index
    %c0_22 = arith.constant 0 : index
    %c0_23 = arith.constant 0 : index
    %77 = vector.load %arg5[%c0_21, %c0_22, %c0_23] : memref<8x2x128xf32, #tpu.memory_space<vmem>>, vector<1x2x128xf32>
    %78 = vector.shape_cast %77 : vector<1x2x128xf32> to vector<2x128xf32>
    %79 = arith.addf %78, %76 : vector<2x128xf32>
    %80 = arith.negf %79 : vector<2x128xf32>
    %81 = math.exp %80 : vector<2x128xf32>
    %cst_24 = arith.constant 1.000000e+00 : f32
    %82 = vector.broadcast %cst_24 : f32 to vector<2x128xf32>
    %83 = arith.addf %82, %81 : vector<2x128xf32>
    %84 = arith.divf %82, %83 : vector<2x128xf32>
    %85 = vector.extract_strided_slice %84 {offsets = [0, 0], sizes = [2, 32], strides = [1, 1]} : vector<2x128xf32> to vector<2x32xf32>
    %86 = vector.extract_strided_slice %84 {offsets = [0, 32], sizes = [2, 32], strides = [1, 1]} : vector<2x128xf32> to vector<2x32xf32>
    %87 = vector.extract_strided_slice %84 {offsets = [0, 96], sizes = [2, 32], strides = [1, 1]} : vector<2x128xf32> to vector<2x32xf32>
    %88 = vector.extract_strided_slice %79 {offsets = [0, 64], sizes = [2, 32], strides = [1, 1]} : vector<2x128xf32> to vector<2x32xf32>
    %89 = math.tanh %88 : vector<2x32xf32>
    %90 = arith.mulf %86, %57 : vector<2x32xf32>
    %91 = arith.mulf %85, %89 : vector<2x32xf32>
    %92 = arith.addf %90, %91 : vector<2x32xf32>
    %93 = arith.mulf %92, %92 : vector<2x32xf32>
    %94 = tpu.concatenate %92, %93 in 0 : vector<2x32xf32>, vector<2x32xf32> -> vector<4x32xf32>
    %cst_25 = arith.constant dense<0.000000e+00> : vector<4x32xf32>
    %95 = tpu.matmul %94, %2, %cst_25 {dimension_numbers = #tpu.dot_dimension_numbers<[1], [0], [0], [1], [0, 0, 1, 1], [], []>} : vector<4x32xf32>, vector<32x32xf32>, vector<4x32xf32> -> vector<4x32xf32>
    %96 = vector.extract_strided_slice %95 {offsets = [0, 0], sizes = [2, 32], strides = [1, 1]} : vector<4x32xf32> to vector<2x32xf32>
    %97 = vector.extract_strided_slice %95 {offsets = [2, 0], sizes = [2, 32], strides = [1, 1]} : vector<4x32xf32> to vector<2x32xf32>
    %98 = arith.mulf %96, %96 : vector<2x32xf32>
    %99 = arith.subf %97, %98 : vector<2x32xf32>
    %cst_26 = arith.constant 9.99999974E-6 : f32
    %100 = vector.broadcast %cst_26 : f32 to vector<2x32xf32>
    %101 = arith.addf %99, %100 : vector<2x32xf32>
    %102 = math.rsqrt %101 : vector<2x32xf32>
    %103 = arith.subf %92, %96 : vector<2x32xf32>
    %104 = arith.mulf %103, %102 : vector<2x32xf32>
    %105 = vector.broadcast %17 : vector<1x32xf32> to vector<2x32xf32>
    %106 = arith.mulf %104, %105 : vector<2x32xf32>
    %107 = vector.broadcast %18 : vector<1x32xf32> to vector<2x32xf32>
    %108 = arith.addf %106, %107 : vector<2x32xf32>
    %109 = math.tanh %108 : vector<2x32xf32>
    %110 = arith.mulf %87, %109 : vector<2x32xf32>
    %111 = vector.extract_strided_slice %110 {offsets = [0, 0], sizes = [2, 16], strides = [1, 1]} : vector<2x32xf32> to vector<2x16xf32>
    %c0_27 = arith.constant 0 : index
    %c0_28 = arith.constant 0 : index
    %c0_29 = arith.constant 0 : index
    %112 = vector.load %arg6[%c0_27, %c0_28, %c0_29] : memref<8x2x32xf32, #tpu.memory_space<vmem>>, vector<1x2x16xf32>
    %113 = vector.shape_cast %112 : vector<1x2x16xf32> to vector<2x16xf32>
    %114 = vector.shape_cast %111 : vector<2x16xf32> to vector<1x2x16xf32>
    tpu.vector_store %arg6[%c0_27, %c0_28, %c0_29], %114 {strides = array<i32>} : memref<8x2x32xf32, #tpu.memory_space<vmem>>, vector<1x2x16xf32>,
    %115 = vector.extract_strided_slice %110 {offsets = [0, 16], sizes = [2, 16], strides = [1, 1]} : vector<2x32xf32> to vector<2x16xf32>
    %c7 = arith.constant 7 : index
    %c0_30 = arith.constant 0 : index
    %c16_31 = arith.constant 16 : index
    %116 = vector.load %arg6[%c7, %c0_30, %c16_31] : memref<8x2x32xf32, #tpu.memory_space<vmem>>, vector<1x2x16xf32>
    %117 = vector.shape_cast %116 : vector<1x2x16xf32> to vector<2x16xf32>
    %118 = vector.shape_cast %115 : vector<2x16xf32> to vector<1x2x16xf32>
    tpu.vector_store %arg6[%c7, %c0_30, %c16_31], %118 {strides = array<i32>} : memref<8x2x32xf32, #tpu.memory_space<vmem>>, vector<1x2x16xf32>,
    %cst_32 = arith.constant dense<0.000000e+00> : vector<2x128xf32>
    %119 = tpu.matmul %110, %9, %cst_32 {dimension_numbers = #tpu.dot_dimension_numbers<[1], [0], [0], [1], [0, 0, 1, 1], [], []>} : vector<2x32xf32>, vector<32x128xf32>, vector<2x128xf32> -> vector<2x128xf32>
    %120 = vector.broadcast %14 : vector<1x128xf32> to vector<2x128xf32>
    %121 = arith.addf %119, %120 : vector<2x128xf32>
    %122 = arith.mulf %121, %121 : vector<2x128xf32>
    %123 = tpu.concatenate %121, %122 in 0 : vector<2x128xf32>, vector<2x128xf32> -> vector<4x128xf32>
    %cst_33 = arith.constant dense<0.000000e+00> : vector<4x128xf32>
    %124 = tpu.matmul %123, %0, %cst_33 {dimension_numbers = #tpu.dot_dimension_numbers<[1], [0], [0], [1], [0, 0, 1, 1], [], []>} : vector<4x128xf32>, vector<128x128xf32>, vector<4x128xf32> -> vector<4x128xf32>
    %125 = vector.extract_strided_slice %124 {offsets = [0, 0], sizes = [2, 128], strides = [1, 1]} : vector<4x128xf32> to vector<2x128xf32>
    %126 = vector.extract_strided_slice %124 {offsets = [2, 0], sizes = [2, 128], strides = [1, 1]} : vector<4x128xf32> to vector<2x128xf32>
    %127 = arith.mulf %125, %125 : vector<2x128xf32>
    %128 = arith.subf %126, %127 : vector<2x128xf32>
    %cst_34 = arith.constant 9.99999974E-6 : f32
    %129 = vector.broadcast %cst_34 : f32 to vector<2x128xf32>
    %130 = arith.addf %128, %129 : vector<2x128xf32>
    %131 = math.rsqrt %130 : vector<2x128xf32>
    %132 = arith.subf %121, %125 : vector<2x128xf32>
    %133 = arith.mulf %132, %131 : vector<2x128xf32>
    %134 = vector.broadcast %15 : vector<1x128xf32> to vector<2x128xf32>
    %135 = arith.mulf %133, %134 : vector<2x128xf32>
    %136 = vector.broadcast %16 : vector<1x128xf32> to vector<2x128xf32>
    %137 = arith.addf %135, %136 : vector<2x128xf32>
    %c1 = arith.constant 1 : index
    %c0_35 = arith.constant 0 : index
    %c0_36 = arith.constant 0 : index
    %138 = vector.load %arg5[%c1, %c0_35, %c0_36] : memref<8x2x128xf32, #tpu.memory_space<vmem>>, vector<1x2x128xf32>
    %139 = vector.shape_cast %138 : vector<1x2x128xf32> to vector<2x128xf32>
    %140 = arith.addf %139, %137 : vector<2x128xf32>
    %141 = arith.negf %140 : vector<2x128xf32>
    %142 = math.exp %141 : vector<2x128xf32>
    %cst_37 = arith.constant 1.000000e+00 : f32
    %143 = vector.broadcast %cst_37 : f32 to vector<2x128xf32>
    %144 = arith.addf %143, %142 : vector<2x128xf32>
    %145 = arith.divf %143, %144 : vector<2x128xf32>
    %146 = vector.extract_strided_slice %145 {offsets = [0, 0], sizes = [2, 32], strides = [1, 1]} : vector<2x128xf32> to vector<2x32xf32>
    %147 = vector.extract_strided_slice %145 {offsets = [0, 32], sizes = [2, 32], strides = [1, 1]} : vector<2x128xf32> to vector<2x32xf32>
    %148 = vector.extract_strided_slice %145 {offsets = [0, 96], sizes = [2, 32], strides = [1, 1]} : vector<2x128xf32> to vector<2x32xf32>
    %149 = vector.extract_strided_slice %140 {offsets = [0, 64], sizes = [2, 32], strides = [1, 1]} : vector<2x128xf32> to vector<2x32xf32>
    %150 = math.tanh %149 : vector<2x32xf32>
    %151 = arith.mulf %147, %92 : vector<2x32xf32>
    %152 = arith.mulf %146, %150 : vector<2x32xf32>
    %153 = arith.addf %151, %152 : vector<2x32xf32>
    %154 = arith.mulf %153, %153 : vector<2x32xf32>
    %155 = tpu.concatenate %153, %154 in 0 : vector<2x32xf32>, vector<2x32xf32> -> vector<4x32xf32>
    %cst_38 = arith.constant dense<0.000000e+00> : vector<4x32xf32>
    %156 = tpu.matmul %155, %2, %cst_38 {dimension_numbers = #tpu.dot_dimension_numbers<[1], [0], [0], [1], [0, 0, 1, 1], [], []>} : vector<4x32xf32>, vector<32x32xf32>, vector<4x32xf32> -> vector<4x32xf32>
    %157 = vector.extract_strided_slice %156 {offsets = [0, 0], sizes = [2, 32], strides = [1, 1]} : vector<4x32xf32> to vector<2x32xf32>
    %158 = vector.extract_strided_slice %156 {offsets = [2, 0], sizes = [2, 32], strides = [1, 1]} : vector<4x32xf32> to vector<2x32xf32>
    %159 = arith.mulf %157, %157 : vector<2x32xf32>
    %160 = arith.subf %158, %159 : vector<2x32xf32>
    %cst_39 = arith.constant 9.99999974E-6 : f32
    %161 = vector.broadcast %cst_39 : f32 to vector<2x32xf32>
    %162 = arith.addf %160, %161 : vector<2x32xf32>
    %163 = math.rsqrt %162 : vector<2x32xf32>
    %164 = arith.subf %153, %157 : vector<2x32xf32>
    %165 = arith.mulf %164, %163 : vector<2x32xf32>
    %166 = vector.broadcast %17 : vector<1x32xf32> to vector<2x32xf32>
    %167 = arith.mulf %165, %166 : vector<2x32xf32>
    %168 = vector.broadcast %18 : vector<1x32xf32> to vector<2x32xf32>
    %169 = arith.addf %167, %168 : vector<2x32xf32>
    %170 = math.tanh %169 : vector<2x32xf32>
    %171 = arith.mulf %148, %170 : vector<2x32xf32>
    %172 = vector.extract_strided_slice %171 {offsets = [0, 0], sizes = [2, 16], strides = [1, 1]} : vector<2x32xf32> to vector<2x16xf32>
    %c1_40 = arith.constant 1 : index
    %c0_41 = arith.constant 0 : index
    %c0_42 = arith.constant 0 : index
    %173 = vector.load %arg6[%c1_40, %c0_41, %c0_42] : memref<8x2x32xf32, #tpu.memory_space<vmem>>, vector<1x2x16xf32>
    %174 = vector.shape_cast %173 : vector<1x2x16xf32> to vector<2x16xf32>
    %175 = vector.shape_cast %172 : vector<2x16xf32> to vector<1x2x16xf32>
    tpu.vector_store %arg6[%c1_40, %c0_41, %c0_42], %175 {strides = array<i32>} : memref<8x2x32xf32, #tpu.memory_space<vmem>>, vector<1x2x16xf32>,
    %176 = vector.extract_strided_slice %171 {offsets = [0, 16], sizes = [2, 16], strides = [1, 1]} : vector<2x32xf32> to vector<2x16xf32>
    %c6 = arith.constant 6 : index
    %c0_43 = arith.constant 0 : index
    %c16_44 = arith.constant 16 : index
    %177 = vector.load %arg6[%c6, %c0_43, %c16_44] : memref<8x2x32xf32, #tpu.memory_space<vmem>>, vector<1x2x16xf32>
    %178 = vector.shape_cast %177 : vector<1x2x16xf32> to vector<2x16xf32>
    %179 = vector.shape_cast %176 : vector<2x16xf32> to vector<1x2x16xf32>
    tpu.vector_store %arg6[%c6, %c0_43, %c16_44], %179 {strides = array<i32>} : memref<8x2x32xf32, #tpu.memory_space<vmem>>, vector<1x2x16xf32>,
    %cst_45 = arith.constant dense<0.000000e+00> : vector<2x128xf32>
    %180 = tpu.matmul %171, %9, %cst_45 {dimension_numbers = #tpu.dot_dimension_numbers<[1], [0], [0], [1], [0, 0, 1, 1], [], []>} : vector<2x32xf32>, vector<32x128xf32>, vector<2x128xf32> -> vector<2x128xf32>
    %181 = vector.broadcast %14 : vector<1x128xf32> to vector<2x128xf32>
    %182 = arith.addf %180, %181 : vector<2x128xf32>
    %183 = arith.mulf %182, %182 : vector<2x128xf32>
    %184 = tpu.concatenate %182, %183 in 0 : vector<2x128xf32>, vector<2x128xf32> -> vector<4x128xf32>
    %cst_46 = arith.constant dense<0.000000e+00> : vector<4x128xf32>
    %185 = tpu.matmul %184, %0, %cst_46 {dimension_numbers = #tpu.dot_dimension_numbers<[1], [0], [0], [1], [0, 0, 1, 1], [], []>} : vector<4x128xf32>, vector<128x128xf32>, vector<4x128xf32> -> vector<4x128xf32>
    %186 = vector.extract_strided_slice %185 {offsets = [0, 0], sizes = [2, 128], strides = [1, 1]} : vector<4x128xf32> to vector<2x128xf32>
    %187 = vector.extract_strided_slice %185 {offsets = [2, 0], sizes = [2, 128], strides = [1, 1]} : vector<4x128xf32> to vector<2x128xf32>
    %188 = arith.mulf %186, %186 : vector<2x128xf32>
    %189 = arith.subf %187, %188 : vector<2x128xf32>
    %cst_47 = arith.constant 9.99999974E-6 : f32
    %190 = vector.broadcast %cst_47 : f32 to vector<2x128xf32>
    %191 = arith.addf %189, %190 : vector<2x128xf32>
    %192 = math.rsqrt %191 : vector<2x128xf32>
    %193 = arith.subf %182, %186 : vector<2x128xf32>
    %194 = arith.mulf %193, %192 : vector<2x128xf32>
    %195 = vector.broadcast %15 : vector<1x128xf32> to vector<2x128xf32>
    %196 = arith.mulf %194, %195 : vector<2x128xf32>
    %197 = vector.broadcast %16 : vector<1x128xf32> to vector<2x128xf32>
    %198 = arith.addf %196, %197 : vector<2x128xf32>
    %c2 = arith.constant 2 : index
    %c0_48 = arith.constant 0 : index
    %c0_49 = arith.constant 0 : index
    %199 = vector.load %arg5[%c2, %c0_48, %c0_49] : memref<8x2x128xf32, #tpu.memory_space<vmem>>, vector<1x2x128xf32>
    %200 = vector.shape_cast %199 : vector<1x2x128xf32> to vector<2x128xf32>
    %201 = arith.addf %200, %198 : vector<2x128xf32>
    %202 = arith.negf %201 : vector<2x128xf32>
    %203 = math.exp %202 : vector<2x128xf32>
    %cst_50 = arith.constant 1.000000e+00 : f32
    %204 = vector.broadcast %cst_50 : f32 to vector<2x128xf32>
    %205 = arith.addf %204, %203 : vector<2x128xf32>
    %206 = arith.divf %204, %205 : vector<2x128xf32>
    %207 = vector.extract_strided_slice %206 {offsets = [0, 0], sizes = [2, 32], strides = [1, 1]} : vector<2x128xf32> to vector<2x32xf32>
    %208 = vector.extract_strided_slice %206 {offsets = [0, 32], sizes = [2, 32], strides = [1, 1]} : vector<2x128xf32> to vector<2x32xf32>
    %209 = vector.extract_strided_slice %206 {offsets = [0, 96], sizes = [2, 32], strides = [1, 1]} : vector<2x128xf32> to vector<2x32xf32>
    %210 = vector.extract_strided_slice %201 {offsets = [0, 64], sizes = [2, 32], strides = [1, 1]} : vector<2x128xf32> to vector<2x32xf32>
    %211 = math.tanh %210 : vector<2x32xf32>
    %212 = arith.mulf %208, %153 : vector<2x32xf32>
    %213 = arith.mulf %207, %211 : vector<2x32xf32>
    %214 = arith.addf %212, %213 : vector<2x32xf32>
    %215 = arith.mulf %214, %214 : vector<2x32xf32>
    %216 = tpu.concatenate %214, %215 in 0 : vector<2x32xf32>, vector<2x32xf32> -> vector<4x32xf32>
    %cst_51 = arith.constant dense<0.000000e+00> : vector<4x32xf32>
    %217 = tpu.matmul %216, %2, %cst_51 {dimension_numbers = #tpu.dot_dimension_numbers<[1], [0], [0], [1], [0, 0, 1, 1], [], []>} : vector<4x32xf32>, vector<32x32xf32>, vector<4x32xf32> -> vector<4x32xf32>
    %218 = vector.extract_strided_slice %217 {offsets = [0, 0], sizes = [2, 32], strides = [1, 1]} : vector<4x32xf32> to vector<2x32xf32>
    %219 = vector.extract_strided_slice %217 {offsets = [2, 0], sizes = [2, 32], strides = [1, 1]} : vector<4x32xf32> to vector<2x32xf32>
    %220 = arith.mulf %218, %218 : vector<2x32xf32>
    %221 = arith.subf %219, %220 : vector<2x32xf32>
    %cst_52 = arith.constant 9.99999974E-6 : f32
    %222 = vector.broadcast %cst_52 : f32 to vector<2x32xf32>
    %223 = arith.addf %221, %222 : vector<2x32xf32>
    %224 = math.rsqrt %223 : vector<2x32xf32>
    %225 = arith.subf %214, %218 : vector<2x32xf32>
    %226 = arith.mulf %225, %224 : vector<2x32xf32>
    %227 = vector.broadcast %17 : vector<1x32xf32> to vector<2x32xf32>
    %228 = arith.mulf %226, %227 : vector<2x32xf32>
    %229 = vector.broadcast %18 : vector<1x32xf32> to vector<2x32xf32>
    %230 = arith.addf %228, %229 : vector<2x32xf32>
    %231 = math.tanh %230 : vector<2x32xf32>
    %232 = arith.mulf %209, %231 : vector<2x32xf32>
    %233 = vector.extract_strided_slice %232 {offsets = [0, 0], sizes = [2, 16], strides = [1, 1]} : vector<2x32xf32> to vector<2x16xf32>
    %c2_53 = arith.constant 2 : index
    %c0_54 = arith.constant 0 : index
    %c0_55 = arith.constant 0 : index
    %234 = vector.load %arg6[%c2_53, %c0_54, %c0_55] : memref<8x2x32xf32, #tpu.memory_space<vmem>>, vector<1x2x16xf32>
    %235 = vector.shape_cast %234 : vector<1x2x16xf32> to vector<2x16xf32>
    %236 = vector.shape_cast %233 : vector<2x16xf32> to vector<1x2x16xf32>
    tpu.vector_store %arg6[%c2_53, %c0_54, %c0_55], %236 {strides = array<i32>} : memref<8x2x32xf32, #tpu.memory_space<vmem>>, vector<1x2x16xf32>,
    %237 = vector.extract_strided_slice %232 {offsets = [0, 16], sizes = [2, 16], strides = [1, 1]} : vector<2x32xf32> to vector<2x16xf32>
    %c5 = arith.constant 5 : index
    %c0_56 = arith.constant 0 : index
    %c16_57 = arith.constant 16 : index
    %238 = vector.load %arg6[%c5, %c0_56, %c16_57] : memref<8x2x32xf32, #tpu.memory_space<vmem>>, vector<1x2x16xf32>
    %239 = vector.shape_cast %238 : vector<1x2x16xf32> to vector<2x16xf32>
    %240 = vector.shape_cast %237 : vector<2x16xf32> to vector<1x2x16xf32>
    tpu.vector_store %arg6[%c5, %c0_56, %c16_57], %240 {strides = array<i32>} : memref<8x2x32xf32, #tpu.memory_space<vmem>>, vector<1x2x16xf32>,
    %cst_58 = arith.constant dense<0.000000e+00> : vector<2x128xf32>
    %241 = tpu.matmul %232, %9, %cst_58 {dimension_numbers = #tpu.dot_dimension_numbers<[1], [0], [0], [1], [0, 0, 1, 1], [], []>} : vector<2x32xf32>, vector<32x128xf32>, vector<2x128xf32> -> vector<2x128xf32>
    %242 = vector.broadcast %14 : vector<1x128xf32> to vector<2x128xf32>
    %243 = arith.addf %241, %242 : vector<2x128xf32>
    %244 = arith.mulf %243, %243 : vector<2x128xf32>
    %245 = tpu.concatenate %243, %244 in 0 : vector<2x128xf32>, vector<2x128xf32> -> vector<4x128xf32>
    %cst_59 = arith.constant dense<0.000000e+00> : vector<4x128xf32>
    %246 = tpu.matmul %245, %0, %cst_59 {dimension_numbers = #tpu.dot_dimension_numbers<[1], [0], [0], [1], [0, 0, 1, 1], [], []>} : vector<4x128xf32>, vector<128x128xf32>, vector<4x128xf32> -> vector<4x128xf32>
    %247 = vector.extract_strided_slice %246 {offsets = [0, 0], sizes = [2, 128], strides = [1, 1]} : vector<4x128xf32> to vector<2x128xf32>
    %248 = vector.extract_strided_slice %246 {offsets = [2, 0], sizes = [2, 128], strides = [1, 1]} : vector<4x128xf32> to vector<2x128xf32>
    %249 = arith.mulf %247, %247 : vector<2x128xf32>
    %250 = arith.subf %248, %249 : vector<2x128xf32>
    %cst_60 = arith.constant 9.99999974E-6 : f32
    %251 = vector.broadcast %cst_60 : f32 to vector<2x128xf32>
    %252 = arith.addf %250, %251 : vector<2x128xf32>
    %253 = math.rsqrt %252 : vector<2x128xf32>
    %254 = arith.subf %243, %247 : vector<2x128xf32>
    %255 = arith.mulf %254, %253 : vector<2x128xf32>
    %256 = vector.broadcast %15 : vector<1x128xf32> to vector<2x128xf32>
    %257 = arith.mulf %255, %256 : vector<2x128xf32>
    %258 = vector.broadcast %16 : vector<1x128xf32> to vector<2x128xf32>
    %259 = arith.addf %257, %258 : vector<2x128xf32>
    %c3 = arith.constant 3 : index
    %c0_61 = arith.constant 0 : index
    %c0_62 = arith.constant 0 : index
    %260 = vector.load %arg5[%c3, %c0_61, %c0_62] : memref<8x2x128xf32, #tpu.memory_space<vmem>>, vector<1x2x128xf32>
    %261 = vector.shape_cast %260 : vector<1x2x128xf32> to vector<2x128xf32>
    %262 = arith.addf %261, %259 : vector<2x128xf32>
    %263 = arith.negf %262 : vector<2x128xf32>
    %264 = math.exp %263 : vector<2x128xf32>
    %cst_63 = arith.constant 1.000000e+00 : f32
    %265 = vector.broadcast %cst_63 : f32 to vector<2x128xf32>
    %266 = arith.addf %265, %264 : vector<2x128xf32>
    %267 = arith.divf %265, %266 : vector<2x128xf32>
    %268 = vector.extract_strided_slice %267 {offsets = [0, 0], sizes = [2, 32], strides = [1, 1]} : vector<2x128xf32> to vector<2x32xf32>
    %269 = vector.extract_strided_slice %267 {offsets = [0, 32], sizes = [2, 32], strides = [1, 1]} : vector<2x128xf32> to vector<2x32xf32>
    %270 = vector.extract_strided_slice %267 {offsets = [0, 96], sizes = [2, 32], strides = [1, 1]} : vector<2x128xf32> to vector<2x32xf32>
    %271 = vector.extract_strided_slice %262 {offsets = [0, 64], sizes = [2, 32], strides = [1, 1]} : vector<2x128xf32> to vector<2x32xf32>
    %272 = math.tanh %271 : vector<2x32xf32>
    %273 = arith.mulf %269, %214 : vector<2x32xf32>
    %274 = arith.mulf %268, %272 : vector<2x32xf32>
    %275 = arith.addf %273, %274 : vector<2x32xf32>
    %276 = arith.mulf %275, %275 : vector<2x32xf32>
    %277 = tpu.concatenate %275, %276 in 0 : vector<2x32xf32>, vector<2x32xf32> -> vector<4x32xf32>
    %cst_64 = arith.constant dense<0.000000e+00> : vector<4x32xf32>
    %278 = tpu.matmul %277, %2, %cst_64 {dimension_numbers = #tpu.dot_dimension_numbers<[1], [0], [0], [1], [0, 0, 1, 1], [], []>} : vector<4x32xf32>, vector<32x32xf32>, vector<4x32xf32> -> vector<4x32xf32>
    %279 = vector.extract_strided_slice %278 {offsets = [0, 0], sizes = [2, 32], strides = [1, 1]} : vector<4x32xf32> to vector<2x32xf32>
    %280 = vector.extract_strided_slice %278 {offsets = [2, 0], sizes = [2, 32], strides = [1, 1]} : vector<4x32xf32> to vector<2x32xf32>
    %281 = arith.mulf %279, %279 : vector<2x32xf32>
    %282 = arith.subf %280, %281 : vector<2x32xf32>
    %cst_65 = arith.constant 9.99999974E-6 : f32
    %283 = vector.broadcast %cst_65 : f32 to vector<2x32xf32>
    %284 = arith.addf %282, %283 : vector<2x32xf32>
    %285 = math.rsqrt %284 : vector<2x32xf32>
    %286 = arith.subf %275, %279 : vector<2x32xf32>
    %287 = arith.mulf %286, %285 : vector<2x32xf32>
    %288 = vector.broadcast %17 : vector<1x32xf32> to vector<2x32xf32>
    %289 = arith.mulf %287, %288 : vector<2x32xf32>
    %290 = vector.broadcast %18 : vector<1x32xf32> to vector<2x32xf32>
    %291 = arith.addf %289, %290 : vector<2x32xf32>
    %292 = math.tanh %291 : vector<2x32xf32>
    %293 = arith.mulf %270, %292 : vector<2x32xf32>
    %294 = vector.extract_strided_slice %293 {offsets = [0, 0], sizes = [2, 16], strides = [1, 1]} : vector<2x32xf32> to vector<2x16xf32>
    %c3_66 = arith.constant 3 : index
    %c0_67 = arith.constant 0 : index
    %c0_68 = arith.constant 0 : index
    %295 = vector.load %arg6[%c3_66, %c0_67, %c0_68] : memref<8x2x32xf32, #tpu.memory_space<vmem>>, vector<1x2x16xf32>
    %296 = vector.shape_cast %295 : vector<1x2x16xf32> to vector<2x16xf32>
    %297 = vector.shape_cast %294 : vector<2x16xf32> to vector<1x2x16xf32>
    tpu.vector_store %arg6[%c3_66, %c0_67, %c0_68], %297 {strides = array<i32>} : memref<8x2x32xf32, #tpu.memory_space<vmem>>, vector<1x2x16xf32>,
    %298 = vector.extract_strided_slice %293 {offsets = [0, 16], sizes = [2, 16], strides = [1, 1]} : vector<2x32xf32> to vector<2x16xf32>
    %c4 = arith.constant 4 : index
    %c0_69 = arith.constant 0 : index
    %c16_70 = arith.constant 16 : index
    %299 = vector.load %arg6[%c4, %c0_69, %c16_70] : memref<8x2x32xf32, #tpu.memory_space<vmem>>, vector<1x2x16xf32>
    %300 = vector.shape_cast %299 : vector<1x2x16xf32> to vector<2x16xf32>
    %301 = vector.shape_cast %298 : vector<2x16xf32> to vector<1x2x16xf32>
    tpu.vector_store %arg6[%c4, %c0_69, %c16_70], %301 {strides = array<i32>} : memref<8x2x32xf32, #tpu.memory_space<vmem>>, vector<1x2x16xf32>,
    %cst_71 = arith.constant dense<0.000000e+00> : vector<2x128xf32>
    %302 = tpu.matmul %293, %9, %cst_71 {dimension_numbers = #tpu.dot_dimension_numbers<[1], [0], [0], [1], [0, 0, 1, 1], [], []>} : vector<2x32xf32>, vector<32x128xf32>, vector<2x128xf32> -> vector<2x128xf32>
    %303 = vector.broadcast %14 : vector<1x128xf32> to vector<2x128xf32>
    %304 = arith.addf %302, %303 : vector<2x128xf32>
    %305 = arith.mulf %304, %304 : vector<2x128xf32>
    %306 = tpu.concatenate %304, %305 in 0 : vector<2x128xf32>, vector<2x128xf32> -> vector<4x128xf32>
    %cst_72 = arith.constant dense<0.000000e+00> : vector<4x128xf32>
    %307 = tpu.matmul %306, %0, %cst_72 {dimension_numbers = #tpu.dot_dimension_numbers<[1], [0], [0], [1], [0, 0, 1, 1], [], []>} : vector<4x128xf32>, vector<128x128xf32>, vector<4x128xf32> -> vector<4x128xf32>
    %308 = vector.extract_strided_slice %307 {offsets = [0, 0], sizes = [2, 128], strides = [1, 1]} : vector<4x128xf32> to vector<2x128xf32>
    %309 = vector.extract_strided_slice %307 {offsets = [2, 0], sizes = [2, 128], strides = [1, 1]} : vector<4x128xf32> to vector<2x128xf32>
    %310 = arith.mulf %308, %308 : vector<2x128xf32>
    %311 = arith.subf %309, %310 : vector<2x128xf32>
    %cst_73 = arith.constant 9.99999974E-6 : f32
    %312 = vector.broadcast %cst_73 : f32 to vector<2x128xf32>
    %313 = arith.addf %311, %312 : vector<2x128xf32>
    %314 = math.rsqrt %313 : vector<2x128xf32>
    %315 = arith.subf %304, %308 : vector<2x128xf32>
    %316 = arith.mulf %315, %314 : vector<2x128xf32>
    %317 = vector.broadcast %15 : vector<1x128xf32> to vector<2x128xf32>
    %318 = arith.mulf %316, %317 : vector<2x128xf32>
    %319 = vector.broadcast %16 : vector<1x128xf32> to vector<2x128xf32>
    %320 = arith.addf %318, %319 : vector<2x128xf32>
    %c4_74 = arith.constant 4 : index
    %c0_75 = arith.constant 0 : index
    %c0_76 = arith.constant 0 : index
    %321 = vector.load %arg5[%c4_74, %c0_75, %c0_76] : memref<8x2x128xf32, #tpu.memory_space<vmem>>, vector<1x2x128xf32>
    %322 = vector.shape_cast %321 : vector<1x2x128xf32> to vector<2x128xf32>
    %323 = arith.addf %322, %320 : vector<2x128xf32>
    %324 = arith.negf %323 : vector<2x128xf32>
    %325 = math.exp %324 : vector<2x128xf32>
    %cst_77 = arith.constant 1.000000e+00 : f32
    %326 = vector.broadcast %cst_77 : f32 to vector<2x128xf32>
    %327 = arith.addf %326, %325 : vector<2x128xf32>
    %328 = arith.divf %326, %327 : vector<2x128xf32>
    %329 = vector.extract_strided_slice %328 {offsets = [0, 0], sizes = [2, 32], strides = [1, 1]} : vector<2x128xf32> to vector<2x32xf32>
    %330 = vector.extract_strided_slice %328 {offsets = [0, 32], sizes = [2, 32], strides = [1, 1]} : vector<2x128xf32> to vector<2x32xf32>
    %331 = vector.extract_strided_slice %328 {offsets = [0, 96], sizes = [2, 32], strides = [1, 1]} : vector<2x128xf32> to vector<2x32xf32>
    %332 = vector.extract_strided_slice %323 {offsets = [0, 64], sizes = [2, 32], strides = [1, 1]} : vector<2x128xf32> to vector<2x32xf32>
    %333 = math.tanh %332 : vector<2x32xf32>
    %334 = arith.mulf %330, %275 : vector<2x32xf32>
    %335 = arith.mulf %329, %333 : vector<2x32xf32>
    %336 = arith.addf %334, %335 : vector<2x32xf32>
    %337 = arith.mulf %336, %336 : vector<2x32xf32>
    %338 = tpu.concatenate %336, %337 in 0 : vector<2x32xf32>, vector<2x32xf32> -> vector<4x32xf32>
    %cst_78 = arith.constant dense<0.000000e+00> : vector<4x32xf32>
    %339 = tpu.matmul %338, %2, %cst_78 {dimension_numbers = #tpu.dot_dimension_numbers<[1], [0], [0], [1], [0, 0, 1, 1], [], []>} : vector<4x32xf32>, vector<32x32xf32>, vector<4x32xf32> -> vector<4x32xf32>
    %340 = vector.extract_strided_slice %339 {offsets = [0, 0], sizes = [2, 32], strides = [1, 1]} : vector<4x32xf32> to vector<2x32xf32>
    %341 = vector.extract_strided_slice %339 {offsets = [2, 0], sizes = [2, 32], strides = [1, 1]} : vector<4x32xf32> to vector<2x32xf32>
    %342 = arith.mulf %340, %340 : vector<2x32xf32>
    %343 = arith.subf %341, %342 : vector<2x32xf32>
    %cst_79 = arith.constant 9.99999974E-6 : f32
    %344 = vector.broadcast %cst_79 : f32 to vector<2x32xf32>
    %345 = arith.addf %343, %344 : vector<2x32xf32>
    %346 = math.rsqrt %345 : vector<2x32xf32>
    %347 = arith.subf %336, %340 : vector<2x32xf32>
    %348 = arith.mulf %347, %346 : vector<2x32xf32>
    %349 = vector.broadcast %17 : vector<1x32xf32> to vector<2x32xf32>
    %350 = arith.mulf %348, %349 : vector<2x32xf32>
    %351 = vector.broadcast %18 : vector<1x32xf32> to vector<2x32xf32>
    %352 = arith.addf %350, %351 : vector<2x32xf32>
    %353 = math.tanh %352 : vector<2x32xf32>
    %354 = arith.mulf %331, %353 : vector<2x32xf32>
    %355 = vector.extract_strided_slice %354 {offsets = [0, 0], sizes = [2, 16], strides = [1, 1]} : vector<2x32xf32> to vector<2x16xf32>
    %c4_80 = arith.constant 4 : index
    %c0_81 = arith.constant 0 : index
    %c0_82 = arith.constant 0 : index
    %356 = vector.load %arg6[%c4_80, %c0_81, %c0_82] : memref<8x2x32xf32, #tpu.memory_space<vmem>>, vector<1x2x16xf32>
    %357 = vector.shape_cast %356 : vector<1x2x16xf32> to vector<2x16xf32>
    %358 = vector.shape_cast %355 : vector<2x16xf32> to vector<1x2x16xf32>
    tpu.vector_store %arg6[%c4_80, %c0_81, %c0_82], %358 {strides = array<i32>} : memref<8x2x32xf32, #tpu.memory_space<vmem>>, vector<1x2x16xf32>,
    %359 = vector.extract_strided_slice %354 {offsets = [0, 16], sizes = [2, 16], strides = [1, 1]} : vector<2x32xf32> to vector<2x16xf32>
    %c3_83 = arith.constant 3 : index
    %c0_84 = arith.constant 0 : index
    %c16_85 = arith.constant 16 : index
    %360 = vector.load %arg6[%c3_83, %c0_84, %c16_85] : memref<8x2x32xf32, #tpu.memory_space<vmem>>, vector<1x2x16xf32>
    %361 = vector.shape_cast %360 : vector<1x2x16xf32> to vector<2x16xf32>
    %362 = vector.shape_cast %359 : vector<2x16xf32> to vector<1x2x16xf32>
    tpu.vector_store %arg6[%c3_83, %c0_84, %c16_85], %362 {strides = array<i32>} : memref<8x2x32xf32, #tpu.memory_space<vmem>>, vector<1x2x16xf32>,
    %cst_86 = arith.constant dense<0.000000e+00> : vector<2x128xf32>
    %363 = tpu.matmul %354, %9, %cst_86 {dimension_numbers = #tpu.dot_dimension_numbers<[1], [0], [0], [1], [0, 0, 1, 1], [], []>} : vector<2x32xf32>, vector<32x128xf32>, vector<2x128xf32> -> vector<2x128xf32>
    %364 = vector.broadcast %14 : vector<1x128xf32> to vector<2x128xf32>
    %365 = arith.addf %363, %364 : vector<2x128xf32>
    %366 = arith.mulf %365, %365 : vector<2x128xf32>
    %367 = tpu.concatenate %365, %366 in 0 : vector<2x128xf32>, vector<2x128xf32> -> vector<4x128xf32>
    %cst_87 = arith.constant dense<0.000000e+00> : vector<4x128xf32>
    %368 = tpu.matmul %367, %0, %cst_87 {dimension_numbers = #tpu.dot_dimension_numbers<[1], [0], [0], [1], [0, 0, 1, 1], [], []>} : vector<4x128xf32>, vector<128x128xf32>, vector<4x128xf32> -> vector<4x128xf32>
    %369 = vector.extract_strided_slice %368 {offsets = [0, 0], sizes = [2, 128], strides = [1, 1]} : vector<4x128xf32> to vector<2x128xf32>
    %370 = vector.extract_strided_slice %368 {offsets = [2, 0], sizes = [2, 128], strides = [1, 1]} : vector<4x128xf32> to vector<2x128xf32>
    %371 = arith.mulf %369, %369 : vector<2x128xf32>
    %372 = arith.subf %370, %371 : vector<2x128xf32>
    %cst_88 = arith.constant 9.99999974E-6 : f32
    %373 = vector.broadcast %cst_88 : f32 to vector<2x128xf32>
    %374 = arith.addf %372, %373 : vector<2x128xf32>
    %375 = math.rsqrt %374 : vector<2x128xf32>
    %376 = arith.subf %365, %369 : vector<2x128xf32>
    %377 = arith.mulf %376, %375 : vector<2x128xf32>
    %378 = vector.broadcast %15 : vector<1x128xf32> to vector<2x128xf32>
    %379 = arith.mulf %377, %378 : vector<2x128xf32>
    %380 = vector.broadcast %16 : vector<1x128xf32> to vector<2x128xf32>
    %381 = arith.addf %379, %380 : vector<2x128xf32>
    %c5_89 = arith.constant 5 : index
    %c0_90 = arith.constant 0 : index
    %c0_91 = arith.constant 0 : index
    %382 = vector.load %arg5[%c5_89, %c0_90, %c0_91] : memref<8x2x128xf32, #tpu.memory_space<vmem>>, vector<1x2x128xf32>
    %383 = vector.shape_cast %382 : vector<1x2x128xf32> to vector<2x128xf32>
    %384 = arith.addf %383, %381 : vector<2x128xf32>
    %385 = arith.negf %384 : vector<2x128xf32>
    %386 = math.exp %385 : vector<2x128xf32>
    %cst_92 = arith.constant 1.000000e+00 : f32
    %387 = vector.broadcast %cst_92 : f32 to vector<2x128xf32>
    %388 = arith.addf %387, %386 : vector<2x128xf32>
    %389 = arith.divf %387, %388 : vector<2x128xf32>
    %390 = vector.extract_strided_slice %389 {offsets = [0, 0], sizes = [2, 32], strides = [1, 1]} : vector<2x128xf32> to vector<2x32xf32>
    %391 = vector.extract_strided_slice %389 {offsets = [0, 32], sizes = [2, 32], strides = [1, 1]} : vector<2x128xf32> to vector<2x32xf32>
    %392 = vector.extract_strided_slice %389 {offsets = [0, 96], sizes = [2, 32], strides = [1, 1]} : vector<2x128xf32> to vector<2x32xf32>
    %393 = vector.extract_strided_slice %384 {offsets = [0, 64], sizes = [2, 32], strides = [1, 1]} : vector<2x128xf32> to vector<2x32xf32>
    %394 = math.tanh %393 : vector<2x32xf32>
    %395 = arith.mulf %391, %336 : vector<2x32xf32>
    %396 = arith.mulf %390, %394 : vector<2x32xf32>
    %397 = arith.addf %395, %396 : vector<2x32xf32>
    %398 = arith.mulf %397, %397 : vector<2x32xf32>
    %399 = tpu.concatenate %397, %398 in 0 : vector<2x32xf32>, vector<2x32xf32> -> vector<4x32xf32>
    %cst_93 = arith.constant dense<0.000000e+00> : vector<4x32xf32>
    %400 = tpu.matmul %399, %2, %cst_93 {dimension_numbers = #tpu.dot_dimension_numbers<[1], [0], [0], [1], [0, 0, 1, 1], [], []>} : vector<4x32xf32>, vector<32x32xf32>, vector<4x32xf32> -> vector<4x32xf32>
    %401 = vector.extract_strided_slice %400 {offsets = [0, 0], sizes = [2, 32], strides = [1, 1]} : vector<4x32xf32> to vector<2x32xf32>
    %402 = vector.extract_strided_slice %400 {offsets = [2, 0], sizes = [2, 32], strides = [1, 1]} : vector<4x32xf32> to vector<2x32xf32>
    %403 = arith.mulf %401, %401 : vector<2x32xf32>
    %404 = arith.subf %402, %403 : vector<2x32xf32>
    %cst_94 = arith.constant 9.99999974E-6 : f32
    %405 = vector.broadcast %cst_94 : f32 to vector<2x32xf32>
    %406 = arith.addf %404, %405 : vector<2x32xf32>
    %407 = math.rsqrt %406 : vector<2x32xf32>
    %408 = arith.subf %397, %401 : vector<2x32xf32>
    %409 = arith.mulf %408, %407 : vector<2x32xf32>
    %410 = vector.broadcast %17 : vector<1x32xf32> to vector<2x32xf32>
    %411 = arith.mulf %409, %410 : vector<2x32xf32>
    %412 = vector.broadcast %18 : vector<1x32xf32> to vector<2x32xf32>
    %413 = arith.addf %411, %412 : vector<2x32xf32>
    %414 = math.tanh %413 : vector<2x32xf32>
    %415 = arith.mulf %392, %414 : vector<2x32xf32>
    %416 = vector.extract_strided_slice %415 {offsets = [0, 0], sizes = [2, 16], strides = [1, 1]} : vector<2x32xf32> to vector<2x16xf32>
    %c5_95 = arith.constant 5 : index
    %c0_96 = arith.constant 0 : index
    %c0_97 = arith.constant 0 : index
    %417 = vector.load %arg6[%c5_95, %c0_96, %c0_97] : memref<8x2x32xf32, #tpu.memory_space<vmem>>, vector<1x2x16xf32>
    %418 = vector.shape_cast %417 : vector<1x2x16xf32> to vector<2x16xf32>
    %419 = vector.shape_cast %416 : vector<2x16xf32> to vector<1x2x16xf32>
    tpu.vector_store %arg6[%c5_95, %c0_96, %c0_97], %419 {strides = array<i32>} : memref<8x2x32xf32, #tpu.memory_space<vmem>>, vector<1x2x16xf32>,
    %420 = vector.extract_strided_slice %415 {offsets = [0, 16], sizes = [2, 16], strides = [1, 1]} : vector<2x32xf32> to vector<2x16xf32>
    %c2_98 = arith.constant 2 : index
    %c0_99 = arith.constant 0 : index
    %c16_100 = arith.constant 16 : index
    %421 = vector.load %arg6[%c2_98, %c0_99, %c16_100] : memref<8x2x32xf32, #tpu.memory_space<vmem>>, vector<1x2x16xf32>
    %422 = vector.shape_cast %421 : vector<1x2x16xf32> to vector<2x16xf32>
    %423 = vector.shape_cast %420 : vector<2x16xf32> to vector<1x2x16xf32>
    tpu.vector_store %arg6[%c2_98, %c0_99, %c16_100], %423 {strides = array<i32>} : memref<8x2x32xf32, #tpu.memory_space<vmem>>, vector<1x2x16xf32>,
    %cst_101 = arith.constant dense<0.000000e+00> : vector<2x128xf32>
    %424 = tpu.matmul %415, %9, %cst_101 {dimension_numbers = #tpu.dot_dimension_numbers<[1], [0], [0], [1], [0, 0, 1, 1], [], []>} : vector<2x32xf32>, vector<32x128xf32>, vector<2x128xf32> -> vector<2x128xf32>
    %425 = vector.broadcast %14 : vector<1x128xf32> to vector<2x128xf32>
    %426 = arith.addf %424, %425 : vector<2x128xf32>
    %427 = arith.mulf %426, %426 : vector<2x128xf32>
    %428 = tpu.concatenate %426, %427 in 0 : vector<2x128xf32>, vector<2x128xf32> -> vector<4x128xf32>
    %cst_102 = arith.constant dense<0.000000e+00> : vector<4x128xf32>
    %429 = tpu.matmul %428, %0, %cst_102 {dimension_numbers = #tpu.dot_dimension_numbers<[1], [0], [0], [1], [0, 0, 1, 1], [], []>} : vector<4x128xf32>, vector<128x128xf32>, vector<4x128xf32> -> vector<4x128xf32>
    %430 = vector.extract_strided_slice %429 {offsets = [0, 0], sizes = [2, 128], strides = [1, 1]} : vector<4x128xf32> to vector<2x128xf32>
    %431 = vector.extract_strided_slice %429 {offsets = [2, 0], sizes = [2, 128], strides = [1, 1]} : vector<4x128xf32> to vector<2x128xf32>
    %432 = arith.mulf %430, %430 : vector<2x128xf32>
    %433 = arith.subf %431, %432 : vector<2x128xf32>
    %cst_103 = arith.constant 9.99999974E-6 : f32
    %434 = vector.broadcast %cst_103 : f32 to vector<2x128xf32>
    %435 = arith.addf %433, %434 : vector<2x128xf32>
    %436 = math.rsqrt %435 : vector<2x128xf32>
    %437 = arith.subf %426, %430 : vector<2x128xf32>
    %438 = arith.mulf %437, %436 : vector<2x128xf32>
    %439 = vector.broadcast %15 : vector<1x128xf32> to vector<2x128xf32>
    %440 = arith.mulf %438, %439 : vector<2x128xf32>
    %441 = vector.broadcast %16 : vector<1x128xf32> to vector<2x128xf32>
    %442 = arith.addf %440, %441 : vector<2x128xf32>
    %c6_104 = arith.constant 6 : index
    %c0_105 = arith.constant 0 : index
    %c0_106 = arith.constant 0 : index
    %443 = vector.load %arg5[%c6_104, %c0_105, %c0_106] : memref<8x2x128xf32, #tpu.memory_space<vmem>>, vector<1x2x128xf32>
    %444 = vector.shape_cast %443 : vector<1x2x128xf32> to vector<2x128xf32>
    %445 = arith.addf %444, %442 : vector<2x128xf32>
    %446 = arith.negf %445 : vector<2x128xf32>
    %447 = math.exp %446 : vector<2x128xf32>
    %cst_107 = arith.constant 1.000000e+00 : f32
    %448 = vector.broadcast %cst_107 : f32 to vector<2x128xf32>
    %449 = arith.addf %448, %447 : vector<2x128xf32>
    %450 = arith.divf %448, %449 : vector<2x128xf32>
    %451 = vector.extract_strided_slice %450 {offsets = [0, 0], sizes = [2, 32], strides = [1, 1]} : vector<2x128xf32> to vector<2x32xf32>
    %452 = vector.extract_strided_slice %450 {offsets = [0, 32], sizes = [2, 32], strides = [1, 1]} : vector<2x128xf32> to vector<2x32xf32>
    %453 = vector.extract_strided_slice %450 {offsets = [0, 96], sizes = [2, 32], strides = [1, 1]} : vector<2x128xf32> to vector<2x32xf32>
    %454 = vector.extract_strided_slice %445 {offsets = [0, 64], sizes = [2, 32], strides = [1, 1]} : vector<2x128xf32> to vector<2x32xf32>
    %455 = math.tanh %454 : vector<2x32xf32>
    %456 = arith.mulf %452, %397 : vector<2x32xf32>
    %457 = arith.mulf %451, %455 : vector<2x32xf32>
    %458 = arith.addf %456, %457 : vector<2x32xf32>
    %459 = arith.mulf %458, %458 : vector<2x32xf32>
    %460 = tpu.concatenate %458, %459 in 0 : vector<2x32xf32>, vector<2x32xf32> -> vector<4x32xf32>
    %cst_108 = arith.constant dense<0.000000e+00> : vector<4x32xf32>
    %461 = tpu.matmul %460, %2, %cst_108 {dimension_numbers = #tpu.dot_dimension_numbers<[1], [0], [0], [1], [0, 0, 1, 1], [], []>} : vector<4x32xf32>, vector<32x32xf32>, vector<4x32xf32> -> vector<4x32xf32>
    %462 = vector.extract_strided_slice %461 {offsets = [0, 0], sizes = [2, 32], strides = [1, 1]} : vector<4x32xf32> to vector<2x32xf32>
    %463 = vector.extract_strided_slice %461 {offsets = [2, 0], sizes = [2, 32], strides = [1, 1]} : vector<4x32xf32> to vector<2x32xf32>
    %464 = arith.mulf %462, %462 : vector<2x32xf32>
    %465 = arith.subf %463, %464 : vector<2x32xf32>
    %cst_109 = arith.constant 9.99999974E-6 : f32
    %466 = vector.broadcast %cst_109 : f32 to vector<2x32xf32>
    %467 = arith.addf %465, %466 : vector<2x32xf32>
    %468 = math.rsqrt %467 : vector<2x32xf32>
    %469 = arith.subf %458, %462 : vector<2x32xf32>
    %470 = arith.mulf %469, %468 : vector<2x32xf32>
    %471 = vector.broadcast %17 : vector<1x32xf32> to vector<2x32xf32>
    %472 = arith.mulf %470, %471 : vector<2x32xf32>
    %473 = vector.broadcast %18 : vector<1x32xf32> to vector<2x32xf32>
    %474 = arith.addf %472, %473 : vector<2x32xf32>
    %475 = math.tanh %474 : vector<2x32xf32>
    %476 = arith.mulf %453, %475 : vector<2x32xf32>
    %477 = vector.extract_strided_slice %476 {offsets = [0, 0], sizes = [2, 16], strides = [1, 1]} : vector<2x32xf32> to vector<2x16xf32>
    %c6_110 = arith.constant 6 : index
    %c0_111 = arith.constant 0 : index
    %c0_112 = arith.constant 0 : index
    %478 = vector.load %arg6[%c6_110, %c0_111, %c0_112] : memref<8x2x32xf32, #tpu.memory_space<vmem>>, vector<1x2x16xf32>
    %479 = vector.shape_cast %478 : vector<1x2x16xf32> to vector<2x16xf32>
    %480 = vector.shape_cast %477 : vector<2x16xf32> to vector<1x2x16xf32>
    tpu.vector_store %arg6[%c6_110, %c0_111, %c0_112], %480 {strides = array<i32>} : memref<8x2x32xf32, #tpu.memory_space<vmem>>, vector<1x2x16xf32>,
    %481 = vector.extract_strided_slice %476 {offsets = [0, 16], sizes = [2, 16], strides = [1, 1]} : vector<2x32xf32> to vector<2x16xf32>
    %c1_113 = arith.constant 1 : index
    %c0_114 = arith.constant 0 : index
    %c16_115 = arith.constant 16 : index
    %482 = vector.load %arg6[%c1_113, %c0_114, %c16_115] : memref<8x2x32xf32, #tpu.memory_space<vmem>>, vector<1x2x16xf32>
    %483 = vector.shape_cast %482 : vector<1x2x16xf32> to vector<2x16xf32>
    %484 = vector.shape_cast %481 : vector<2x16xf32> to vector<1x2x16xf32>
    tpu.vector_store %arg6[%c1_113, %c0_114, %c16_115], %484 {strides = array<i32>} : memref<8x2x32xf32, #tpu.memory_space<vmem>>, vector<1x2x16xf32>,
    %cst_116 = arith.constant dense<0.000000e+00> : vector<2x128xf32>
    %485 = tpu.matmul %476, %9, %cst_116 {dimension_numbers = #tpu.dot_dimension_numbers<[1], [0], [0], [1], [0, 0, 1, 1], [], []>} : vector<2x32xf32>, vector<32x128xf32>, vector<2x128xf32> -> vector<2x128xf32>
    %486 = vector.broadcast %14 : vector<1x128xf32> to vector<2x128xf32>
    %487 = arith.addf %485, %486 : vector<2x128xf32>
    %488 = arith.mulf %487, %487 : vector<2x128xf32>
    %489 = tpu.concatenate %487, %488 in 0 : vector<2x128xf32>, vector<2x128xf32> -> vector<4x128xf32>
    %cst_117 = arith.constant dense<0.000000e+00> : vector<4x128xf32>
    %490 = tpu.matmul %489, %0, %cst_117 {dimension_numbers = #tpu.dot_dimension_numbers<[1], [0], [0], [1], [0, 0, 1, 1], [], []>} : vector<4x128xf32>, vector<128x128xf32>, vector<4x128xf32> -> vector<4x128xf32>
    %491 = vector.extract_strided_slice %490 {offsets = [0, 0], sizes = [2, 128], strides = [1, 1]} : vector<4x128xf32> to vector<2x128xf32>
    %492 = vector.extract_strided_slice %490 {offsets = [2, 0], sizes = [2, 128], strides = [1, 1]} : vector<4x128xf32> to vector<2x128xf32>
    %493 = arith.mulf %491, %491 : vector<2x128xf32>
    %494 = arith.subf %492, %493 : vector<2x128xf32>
    %cst_118 = arith.constant 9.99999974E-6 : f32
    %495 = vector.broadcast %cst_118 : f32 to vector<2x128xf32>
    %496 = arith.addf %494, %495 : vector<2x128xf32>
    %497 = math.rsqrt %496 : vector<2x128xf32>
    %498 = arith.subf %487, %491 : vector<2x128xf32>
    %499 = arith.mulf %498, %497 : vector<2x128xf32>
    %500 = vector.broadcast %15 : vector<1x128xf32> to vector<2x128xf32>
    %501 = arith.mulf %499, %500 : vector<2x128xf32>
    %502 = vector.broadcast %16 : vector<1x128xf32> to vector<2x128xf32>
    %503 = arith.addf %501, %502 : vector<2x128xf32>
    %c7_119 = arith.constant 7 : index
    %c0_120 = arith.constant 0 : index
    %c0_121 = arith.constant 0 : index
    %504 = vector.load %arg5[%c7_119, %c0_120, %c0_121] : memref<8x2x128xf32, #tpu.memory_space<vmem>>, vector<1x2x128xf32>
    %505 = vector.shape_cast %504 : vector<1x2x128xf32> to vector<2x128xf32>
    %506 = arith.addf %505, %503 : vector<2x128xf32>
    %507 = arith.negf %506 : vector<2x128xf32>
    %508 = math.exp %507 : vector<2x128xf32>
    %cst_122 = arith.constant 1.000000e+00 : f32
    %509 = vector.broadcast %cst_122 : f32 to vector<2x128xf32>
    %510 = arith.addf %509, %508 : vector<2x128xf32>
    %511 = arith.divf %509, %510 : vector<2x128xf32>
    %512 = vector.extract_strided_slice %511 {offsets = [0, 0], sizes = [2, 32], strides = [1, 1]} : vector<2x128xf32> to vector<2x32xf32>
    %513 = vector.extract_strided_slice %511 {offsets = [0, 32], sizes = [2, 32], strides = [1, 1]} : vector<2x128xf32> to vector<2x32xf32>
    %514 = vector.extract_strided_slice %511 {offsets = [0, 96], sizes = [2, 32], strides = [1, 1]} : vector<2x128xf32> to vector<2x32xf32>
    %515 = vector.extract_strided_slice %506 {offsets = [0, 64], sizes = [2, 32], strides = [1, 1]} : vector<2x128xf32> to vector<2x32xf32>
    %516 = math.tanh %515 : vector<2x32xf32>
    %517 = arith.mulf %513, %458 : vector<2x32xf32>
    %518 = arith.mulf %512, %516 : vector<2x32xf32>
    %519 = arith.addf %517, %518 : vector<2x32xf32>
    %520 = arith.mulf %519, %519 : vector<2x32xf32>
    %521 = tpu.concatenate %519, %520 in 0 : vector<2x32xf32>, vector<2x32xf32> -> vector<4x32xf32>
    %cst_123 = arith.constant dense<0.000000e+00> : vector<4x32xf32>
    %522 = tpu.matmul %521, %2, %cst_123 {dimension_numbers = #tpu.dot_dimension_numbers<[1], [0], [0], [1], [0, 0, 1, 1], [], []>} : vector<4x32xf32>, vector<32x32xf32>, vector<4x32xf32> -> vector<4x32xf32>
    %523 = vector.extract_strided_slice %522 {offsets = [0, 0], sizes = [2, 32], strides = [1, 1]} : vector<4x32xf32> to vector<2x32xf32>
    %524 = vector.extract_strided_slice %522 {offsets = [2, 0], sizes = [2, 32], strides = [1, 1]} : vector<4x32xf32> to vector<2x32xf32>
    %525 = arith.mulf %523, %523 : vector<2x32xf32>
    %526 = arith.subf %524, %525 : vector<2x32xf32>
    %cst_124 = arith.constant 9.99999974E-6 : f32
    %527 = vector.broadcast %cst_124 : f32 to vector<2x32xf32>
    %528 = arith.addf %526, %527 : vector<2x32xf32>
    %529 = math.rsqrt %528 : vector<2x32xf32>
    %530 = arith.subf %519, %523 : vector<2x32xf32>
    %531 = arith.mulf %530, %529 : vector<2x32xf32>
    %532 = vector.broadcast %17 : vector<1x32xf32> to vector<2x32xf32>
    %533 = arith.mulf %531, %532 : vector<2x32xf32>
    %534 = vector.broadcast %18 : vector<1x32xf32> to vector<2x32xf32>
    %535 = arith.addf %533, %534 : vector<2x32xf32>
    %536 = math.tanh %535 : vector<2x32xf32>
    %537 = arith.mulf %514, %536 : vector<2x32xf32>
    %538 = vector.extract_strided_slice %537 {offsets = [0, 0], sizes = [2, 16], strides = [1, 1]} : vector<2x32xf32> to vector<2x16xf32>
    %c7_125 = arith.constant 7 : index
    %c0_126 = arith.constant 0 : index
    %c0_127 = arith.constant 0 : index
    %539 = vector.load %arg6[%c7_125, %c0_126, %c0_127] : memref<8x2x32xf32, #tpu.memory_space<vmem>>, vector<1x2x16xf32>
    %540 = vector.shape_cast %539 : vector<1x2x16xf32> to vector<2x16xf32>
    %541 = vector.shape_cast %538 : vector<2x16xf32> to vector<1x2x16xf32>
    tpu.vector_store %arg6[%c7_125, %c0_126, %c0_127], %541 {strides = array<i32>} : memref<8x2x32xf32, #tpu.memory_space<vmem>>, vector<1x2x16xf32>,
    %542 = vector.extract_strided_slice %537 {offsets = [0, 16], sizes = [2, 16], strides = [1, 1]} : vector<2x32xf32> to vector<2x16xf32>
    %c0_128 = arith.constant 0 : index
    %c0_129 = arith.constant 0 : index
    %c16_130 = arith.constant 16 : index
    %543 = vector.load %arg6[%c0_128, %c0_129, %c16_130] : memref<8x2x32xf32, #tpu.memory_space<vmem>>, vector<1x2x16xf32>
    %544 = vector.shape_cast %543 : vector<1x2x16xf32> to vector<2x16xf32>
    %545 = vector.shape_cast %542 : vector<2x16xf32> to vector<1x2x16xf32>
    tpu.vector_store %arg6[%c0_128, %c0_129, %c16_130], %545 {strides = array<i32>} : memref<8x2x32xf32, #tpu.memory_space<vmem>>, vector<1x2x16xf32>,
    %c0_131 = arith.constant 0 : index
    %c0_132 = arith.constant 0 : index
    %c0_133 = arith.constant 0 : index
    %546 = vector.load %arg6[%c0_131, %c0_132, %c0_133] : memref<8x2x32xf32, #tpu.memory_space<vmem>>, vector<8x2x32xf32>
    %547 = vector.shape_cast %546 : vector<8x2x32xf32> to vector<16x32xf32>
    %c32 = arith.constant 32 : index
    %c0_134 = arith.constant 0 : index
    %548 = vector.load %arg1[%c32, %c0_134] : memref<64x128xf32, #tpu.memory_space<vmem>>, vector<32x128xf32>
    %c32_135 = arith.constant 32 : index
    %c0_136 = arith.constant 0 : index
    %549 = vector.load %arg2[%c32_135, %c0_136] : memref<64x128xf32, #tpu.memory_space<vmem>>, vector<32x128xf32>
    %c8 = arith.constant 8 : index
    %c0_137 = arith.constant 0 : index
    %550 = vector.load %arg3[%c8, %c0_137] : memref<184x128xf32, #tpu.memory_space<vmem>>, vector<8x128xf32>
    %551 = vector.extract_strided_slice %550 {offsets = [0, 0], sizes = [1, 128], strides = [1, 1]} : vector<8x128xf32> to vector<1x128xf32>
    %552 = vector.extract_strided_slice %550 {offsets = [1, 0], sizes = [1, 128], strides = [1, 1]} : vector<8x128xf32> to vector<1x128xf32>
    %553 = vector.extract_strided_slice %550 {offsets = [2, 0], sizes = [1, 128], strides = [1, 1]} : vector<8x128xf32> to vector<1x128xf32>
    %554 = vector.extract_strided_slice %550 {offsets = [3, 0], sizes = [1, 128], strides = [1, 1]} : vector<8x128xf32> to vector<1x128xf32>
    %555 = vector.extract_strided_slice %550 {offsets = [4, 0], sizes = [1, 128], strides = [1, 1]} : vector<8x128xf32> to vector<1x128xf32>
    %556 = vector.extract_strided_slice %550 {offsets = [5, 0], sizes = [1, 128], strides = [1, 1]} : vector<8x128xf32> to vector<1x128xf32>
    %557 = vector.extract_strided_slice %550 {offsets = [6, 0], sizes = [1, 32], strides = [1, 1]} : vector<8x128xf32> to vector<1x32xf32>
    %558 = vector.extract_strided_slice %550 {offsets = [7, 0], sizes = [1, 32], strides = [1, 1]} : vector<8x128xf32> to vector<1x32xf32>
    %cst_138 = arith.constant dense<0.000000e+00> : vector<16x128xf32>
    %559 = tpu.matmul %547, %548, %cst_138 {dimension_numbers = #tpu.dot_dimension_numbers<[1], [0], [0], [1], [0, 0, 1, 1], [], []>} : vector<16x32xf32>, vector<32x128xf32>, vector<16x128xf32> -> vector<16x128xf32>
    %560 = vector.broadcast %551 : vector<1x128xf32> to vector<16x128xf32>
    %561 = arith.addf %559, %560 : vector<16x128xf32>
    %562 = arith.mulf %561, %561 : vector<16x128xf32>
    %563 = tpu.concatenate %561, %562 in 0 : vector<16x128xf32>, vector<16x128xf32> -> vector<32x128xf32>
    %cst_139 = arith.constant dense<0.000000e+00> : vector<32x128xf32>
    %564 = tpu.matmul %563, %0, %cst_139 {dimension_numbers = #tpu.dot_dimension_numbers<[1], [0], [0], [1], [0, 0, 1, 1], [], []>} : vector<32x128xf32>, vector<128x128xf32>, vector<32x128xf32> -> vector<32x128xf32>
    %565 = vector.extract_strided_slice %564 {offsets = [0, 0], sizes = [16, 128], strides = [1, 1]} : vector<32x128xf32> to vector<16x128xf32>
    %566 = vector.extract_strided_slice %564 {offsets = [16, 0], sizes = [16, 128], strides = [1, 1]} : vector<32x128xf32> to vector<16x128xf32>
    %567 = arith.mulf %565, %565 : vector<16x128xf32>
    %568 = arith.subf %566, %567 : vector<16x128xf32>
    %cst_140 = arith.constant 9.99999974E-6 : f32
    %569 = vector.broadcast %cst_140 : f32 to vector<16x128xf32>
    %570 = arith.addf %568, %569 : vector<16x128xf32>
    %571 = math.rsqrt %570 : vector<16x128xf32>
    %572 = arith.subf %561, %565 : vector<16x128xf32>
    %573 = arith.mulf %572, %571 : vector<16x128xf32>
    %574 = vector.broadcast %552 : vector<1x128xf32> to vector<16x128xf32>
    %575 = arith.mulf %573, %574 : vector<16x128xf32>
    %576 = vector.broadcast %553 : vector<1x128xf32> to vector<16x128xf32>
    %577 = arith.addf %575, %576 : vector<16x128xf32>
    %578 = vector.shape_cast %577 : vector<16x128xf32> to vector<8x2x128xf32>
    %579 = vector.extract_strided_slice %578 {offsets = [7, 0, 0], sizes = [1, 2, 128], strides = [1, 1, 1]} : vector<8x2x128xf32> to vector<1x2x128xf32>
    %580 = vector.extract_strided_slice %578 {offsets = [6, 0, 0], sizes = [1, 2, 128], strides = [1, 1, 1]} : vector<8x2x128xf32> to vector<1x2x128xf32>
    %581 = vector.extract_strided_slice %578 {offsets = [5, 0, 0], sizes = [1, 2, 128], strides = [1, 1, 1]} : vector<8x2x128xf32> to vector<1x2x128xf32>
    %582 = vector.extract_strided_slice %578 {offsets = [4, 0, 0], sizes = [1, 2, 128], strides = [1, 1, 1]} : vector<8x2x128xf32> to vector<1x2x128xf32>
    %583 = vector.extract_strided_slice %578 {offsets = [3, 0, 0], sizes = [1, 2, 128], strides = [1, 1, 1]} : vector<8x2x128xf32> to vector<1x2x128xf32>
    %584 = vector.extract_strided_slice %578 {offsets = [2, 0, 0], sizes = [1, 2, 128], strides = [1, 1, 1]} : vector<8x2x128xf32> to vector<1x2x128xf32>
    %585 = vector.extract_strided_slice %578 {offsets = [1, 0, 0], sizes = [1, 2, 128], strides = [1, 1, 1]} : vector<8x2x128xf32> to vector<1x2x128xf32>
    %586 = vector.extract_strided_slice %578 {offsets = [0, 0, 0], sizes = [1, 2, 128], strides = [1, 1, 1]} : vector<8x2x128xf32> to vector<1x2x128xf32>
    %587 = tpu.concatenate %579, %580, %581, %582, %583, %584, %585, %586 in 0 : vector<1x2x128xf32>, vector<1x2x128xf32>, vector<1x2x128xf32>, vector<1x2x128xf32>, vector<1x2x128xf32>, vector<1x2x128xf32>, vector<1x2x128xf32>, vector<1x2x128xf32> -> vector<8x2x128xf32>
    %588 = vector.shape_cast %4 : vector<1x128xf32> to vector<1x1x128xf32>
    %589 = vector.broadcast %588 : vector<1x1x128xf32> to vector<8x2x128xf32>
    %590 = arith.mulf %578, %589 : vector<8x2x128xf32>
    %591 = vector.shape_cast %5 : vector<1x128xf32> to vector<1x1x128xf32>
    %592 = vector.broadcast %591 : vector<1x1x128xf32> to vector<8x2x128xf32>
    %593 = arith.mulf %587, %592 : vector<8x2x128xf32>
    %594 = arith.addf %590, %593 : vector<8x2x128xf32>
    %c0_141 = arith.constant 0 : index
    %c0_142 = arith.constant 0 : index
    %c0_143 = arith.constant 0 : index
    %595 = vector.load %arg5[%c0_141, %c0_142, %c0_143] : memref<8x2x128xf32, #tpu.memory_space<vmem>>, vector<8x2x128xf32>
    tpu.vector_store %arg5[%c0_141, %c0_142, %c0_143], %594 {strides = array<i32>} : memref<8x2x128xf32, #tpu.memory_space<vmem>>, vector<8x2x128xf32>,
    %cst_144 = arith.constant 0.000000e+00 : f32
    %596 = vector.broadcast %cst_144 : f32 to vector<2x32xf32>
    %cst_145 = arith.constant 0.000000e+00 : f32
    %597 = vector.broadcast %cst_145 : f32 to vector<2x32xf32>
    %cst_146 = arith.constant dense<0.000000e+00> : vector<2x128xf32>
    %598 = tpu.matmul %596, %549, %cst_146 {dimension_numbers = #tpu.dot_dimension_numbers<[1], [0], [0], [1], [0, 0, 1, 1], [], []>} : vector<2x32xf32>, vector<32x128xf32>, vector<2x128xf32> -> vector<2x128xf32>
    %599 = vector.broadcast %554 : vector<1x128xf32> to vector<2x128xf32>
    %600 = arith.addf %598, %599 : vector<2x128xf32>
    %601 = arith.mulf %600, %600 : vector<2x128xf32>
    %602 = tpu.concatenate %600, %601 in 0 : vector<2x128xf32>, vector<2x128xf32> -> vector<4x128xf32>
    %cst_147 = arith.constant dense<0.000000e+00> : vector<4x128xf32>
    %603 = tpu.matmul %602, %0, %cst_147 {dimension_numbers = #tpu.dot_dimension_numbers<[1], [0], [0], [1], [0, 0, 1, 1], [], []>} : vector<4x128xf32>, vector<128x128xf32>, vector<4x128xf32> -> vector<4x128xf32>
    %604 = vector.extract_strided_slice %603 {offsets = [0, 0], sizes = [2, 128], strides = [1, 1]} : vector<4x128xf32> to vector<2x128xf32>
    %605 = vector.extract_strided_slice %603 {offsets = [2, 0], sizes = [2, 128], strides = [1, 1]} : vector<4x128xf32> to vector<2x128xf32>
    %606 = arith.mulf %604, %604 : vector<2x128xf32>
    %607 = arith.subf %605, %606 : vector<2x128xf32>
    %cst_148 = arith.constant 9.99999974E-6 : f32
    %608 = vector.broadcast %cst_148 : f32 to vector<2x128xf32>
    %609 = arith.addf %607, %608 : vector<2x128xf32>
    %610 = math.rsqrt %609 : vector<2x128xf32>
    %611 = arith.subf %600, %604 : vector<2x128xf32>
    %612 = arith.mulf %611, %610 : vector<2x128xf32>
    %613 = vector.broadcast %555 : vector<1x128xf32> to vector<2x128xf32>
    %614 = arith.mulf %612, %613 : vector<2x128xf32>
    %615 = vector.broadcast %556 : vector<1x128xf32> to vector<2x128xf32>
    %616 = arith.addf %614, %615 : vector<2x128xf32>
    %c0_149 = arith.constant 0 : index
    %c0_150 = arith.constant 0 : index
    %c0_151 = arith.constant 0 : index
    %617 = vector.load %arg5[%c0_149, %c0_150, %c0_151] : memref<8x2x128xf32, #tpu.memory_space<vmem>>, vector<1x2x128xf32>
    %618 = vector.shape_cast %617 : vector<1x2x128xf32> to vector<2x128xf32>
    %619 = arith.addf %618, %616 : vector<2x128xf32>
    %620 = arith.negf %619 : vector<2x128xf32>
    %621 = math.exp %620 : vector<2x128xf32>
    %cst_152 = arith.constant 1.000000e+00 : f32
    %622 = vector.broadcast %cst_152 : f32 to vector<2x128xf32>
    %623 = arith.addf %622, %621 : vector<2x128xf32>
    %624 = arith.divf %622, %623 : vector<2x128xf32>
    %625 = vector.extract_strided_slice %624 {offsets = [0, 0], sizes = [2, 32], strides = [1, 1]} : vector<2x128xf32> to vector<2x32xf32>
    %626 = vector.extract_strided_slice %624 {offsets = [0, 32], sizes = [2, 32], strides = [1, 1]} : vector<2x128xf32> to vector<2x32xf32>
    %627 = vector.extract_strided_slice %624 {offsets = [0, 96], sizes = [2, 32], strides = [1, 1]} : vector<2x128xf32> to vector<2x32xf32>
    %628 = vector.extract_strided_slice %619 {offsets = [0, 64], sizes = [2, 32], strides = [1, 1]} : vector<2x128xf32> to vector<2x32xf32>
    %629 = math.tanh %628 : vector<2x32xf32>
    %630 = arith.mulf %626, %597 : vector<2x32xf32>
    %631 = arith.mulf %625, %629 : vector<2x32xf32>
    %632 = arith.addf %630, %631 : vector<2x32xf32>
    %633 = arith.mulf %632, %632 : vector<2x32xf32>
    %634 = tpu.concatenate %632, %633 in 0 : vector<2x32xf32>, vector<2x32xf32> -> vector<4x32xf32>
    %cst_153 = arith.constant dense<0.000000e+00> : vector<4x32xf32>
    %635 = tpu.matmul %634, %2, %cst_153 {dimension_numbers = #tpu.dot_dimension_numbers<[1], [0], [0], [1], [0, 0, 1, 1], [], []>} : vector<4x32xf32>, vector<32x32xf32>, vector<4x32xf32> -> vector<4x32xf32>
    %636 = vector.extract_strided_slice %635 {offsets = [0, 0], sizes = [2, 32], strides = [1, 1]} : vector<4x32xf32> to vector<2x32xf32>
    %637 = vector.extract_strided_slice %635 {offsets = [2, 0], sizes = [2, 32], strides = [1, 1]} : vector<4x32xf32> to vector<2x32xf32>
    %638 = arith.mulf %636, %636 : vector<2x32xf32>
    %639 = arith.subf %637, %638 : vector<2x32xf32>
    %cst_154 = arith.constant 9.99999974E-6 : f32
    %640 = vector.broadcast %cst_154 : f32 to vector<2x32xf32>
    %641 = arith.addf %639, %640 : vector<2x32xf32>
    %642 = math.rsqrt %641 : vector<2x32xf32>
    %643 = arith.subf %632, %636 : vector<2x32xf32>
    %644 = arith.mulf %643, %642 : vector<2x32xf32>
    %645 = vector.broadcast %557 : vector<1x32xf32> to vector<2x32xf32>
    %646 = arith.mulf %644, %645 : vector<2x32xf32>
    %647 = vector.broadcast %558 : vector<1x32xf32> to vector<2x32xf32>
    %648 = arith.addf %646, %647 : vector<2x32xf32>
    %649 = math.tanh %648 : vector<2x32xf32>
    %650 = arith.mulf %627, %649 : vector<2x32xf32>
    %651 = vector.extract_strided_slice %650 {offsets = [0, 0], sizes = [2, 16], strides = [1, 1]} : vector<2x32xf32> to vector<2x16xf32>
    %c0_155 = arith.constant 0 : index
    %c0_156 = arith.constant 0 : index
    %c0_157 = arith.constant 0 : index
    %652 = vector.load %arg6[%c0_155, %c0_156, %c0_157] : memref<8x2x32xf32, #tpu.memory_space<vmem>>, vector<1x2x16xf32>
    %653 = vector.shape_cast %652 : vector<1x2x16xf32> to vector<2x16xf32>
    %654 = vector.shape_cast %651 : vector<2x16xf32> to vector<1x2x16xf32>
    tpu.vector_store %arg6[%c0_155, %c0_156, %c0_157], %654 {strides = array<i32>} : memref<8x2x32xf32, #tpu.memory_space<vmem>>, vector<1x2x16xf32>,
    %655 = vector.extract_strided_slice %650 {offsets = [0, 16], sizes = [2, 16], strides = [1, 1]} : vector<2x32xf32> to vector<2x16xf32>
    %c7_158 = arith.constant 7 : index
    %c0_159 = arith.constant 0 : index
    %c16_160 = arith.constant 16 : index
    %656 = vector.load %arg6[%c7_158, %c0_159, %c16_160] : memref<8x2x32xf32, #tpu.memory_space<vmem>>, vector<1x2x16xf32>
    %657 = vector.shape_cast %656 : vector<1x2x16xf32> to vector<2x16xf32>
    %658 = vector.shape_cast %655 : vector<2x16xf32> to vector<1x2x16xf32>
    tpu.vector_store %arg6[%c7_158, %c0_159, %c16_160], %658 {strides = array<i32>} : memref<8x2x32xf32, #tpu.memory_space<vmem>>, vector<1x2x16xf32>,
    %cst_161 = arith.constant dense<0.000000e+00> : vector<2x128xf32>
    %659 = tpu.matmul %650, %549, %cst_161 {dimension_numbers = #tpu.dot_dimension_numbers<[1], [0], [0], [1], [0, 0, 1, 1], [], []>} : vector<2x32xf32>, vector<32x128xf32>, vector<2x128xf32> -> vector<2x128xf32>
    %660 = vector.broadcast %554 : vector<1x128xf32> to vector<2x128xf32>
    %661 = arith.addf %659, %660 : vector<2x128xf32>
    %662 = arith.mulf %661, %661 : vector<2x128xf32>
    %663 = tpu.concatenate %661, %662 in 0 : vector<2x128xf32>, vector<2x128xf32> -> vector<4x128xf32>
    %cst_162 = arith.constant dense<0.000000e+00> : vector<4x128xf32>
    %664 = tpu.matmul %663, %0, %cst_162 {dimension_numbers = #tpu.dot_dimension_numbers<[1], [0], [0], [1], [0, 0, 1, 1], [], []>} : vector<4x128xf32>, vector<128x128xf32>, vector<4x128xf32> -> vector<4x128xf32>
    %665 = vector.extract_strided_slice %664 {offsets = [0, 0], sizes = [2, 128], strides = [1, 1]} : vector<4x128xf32> to vector<2x128xf32>
    %666 = vector.extract_strided_slice %664 {offsets = [2, 0], sizes = [2, 128], strides = [1, 1]} : vector<4x128xf32> to vector<2x128xf32>
    %667 = arith.mulf %665, %665 : vector<2x128xf32>
    %668 = arith.subf %666, %667 : vector<2x128xf32>
    %cst_163 = arith.constant 9.99999974E-6 : f32
    %669 = vector.broadcast %cst_163 : f32 to vector<2x128xf32>
    %670 = arith.addf %668, %669 : vector<2x128xf32>
    %671 = math.rsqrt %670 : vector<2x128xf32>
    %672 = arith.subf %661, %665 : vector<2x128xf32>
    %673 = arith.mulf %672, %671 : vector<2x128xf32>
    %674 = vector.broadcast %555 : vector<1x128xf32> to vector<2x128xf32>
    %675 = arith.mulf %673, %674 : vector<2x128xf32>
    %676 = vector.broadcast %556 : vector<1x128xf32> to vector<2x128xf32>
    %677 = arith.addf %675, %676 : vector<2x128xf32>
    %c1_164 = arith.constant 1 : index
    %c0_165 = arith.constant 0 : index
    %c0_166 = arith.constant 0 : index
    %678 = vector.load %arg5[%c1_164, %c0_165, %c0_166] : memref<8x2x128xf32, #tpu.memory_space<vmem>>, vector<1x2x128xf32>
    %679 = vector.shape_cast %678 : vector<1x2x128xf32> to vector<2x128xf32>
    %680 = arith.addf %679, %677 : vector<2x128xf32>
    %681 = arith.negf %680 : vector<2x128xf32>
    %682 = math.exp %681 : vector<2x128xf32>
    %cst_167 = arith.constant 1.000000e+00 : f32
    %683 = vector.broadcast %cst_167 : f32 to vector<2x128xf32>
    %684 = arith.addf %683, %682 : vector<2x128xf32>
    %685 = arith.divf %683, %684 : vector<2x128xf32>
    %686 = vector.extract_strided_slice %685 {offsets = [0, 0], sizes = [2, 32], strides = [1, 1]} : vector<2x128xf32> to vector<2x32xf32>
    %687 = vector.extract_strided_slice %685 {offsets = [0, 32], sizes = [2, 32], strides = [1, 1]} : vector<2x128xf32> to vector<2x32xf32>
    %688 = vector.extract_strided_slice %685 {offsets = [0, 96], sizes = [2, 32], strides = [1, 1]} : vector<2x128xf32> to vector<2x32xf32>
    %689 = vector.extract_strided_slice %680 {offsets = [0, 64], sizes = [2, 32], strides = [1, 1]} : vector<2x128xf32> to vector<2x32xf32>
    %690 = math.tanh %689 : vector<2x32xf32>
    %691 = arith.mulf %687, %632 : vector<2x32xf32>
    %692 = arith.mulf %686, %690 : vector<2x32xf32>
    %693 = arith.addf %691, %692 : vector<2x32xf32>
    %694 = arith.mulf %693, %693 : vector<2x32xf32>
    %695 = tpu.concatenate %693, %694 in 0 : vector<2x32xf32>, vector<2x32xf32> -> vector<4x32xf32>
    %cst_168 = arith.constant dense<0.000000e+00> : vector<4x32xf32>
    %696 = tpu.matmul %695, %2, %cst_168 {dimension_numbers = #tpu.dot_dimension_numbers<[1], [0], [0], [1], [0, 0, 1, 1], [], []>} : vector<4x32xf32>, vector<32x32xf32>, vector<4x32xf32> -> vector<4x32xf32>
    %697 = vector.extract_strided_slice %696 {offsets = [0, 0], sizes = [2, 32], strides = [1, 1]} : vector<4x32xf32> to vector<2x32xf32>
    %698 = vector.extract_strided_slice %696 {offsets = [2, 0], sizes = [2, 32], strides = [1, 1]} : vector<4x32xf32> to vector<2x32xf32>
    %699 = arith.mulf %697, %697 : vector<2x32xf32>
    %700 = arith.subf %698, %699 : vector<2x32xf32>
    %cst_169 = arith.constant 9.99999974E-6 : f32
    %701 = vector.broadcast %cst_169 : f32 to vector<2x32xf32>
    %702 = arith.addf %700, %701 : vector<2x32xf32>
    %703 = math.rsqrt %702 : vector<2x32xf32>
    %704 = arith.subf %693, %697 : vector<2x32xf32>
    %705 = arith.mulf %704, %703 : vector<2x32xf32>
    %706 = vector.broadcast %557 : vector<1x32xf32> to vector<2x32xf32>
    %707 = arith.mulf %705, %706 : vector<2x32xf32>
    %708 = vector.broadcast %558 : vector<1x32xf32> to vector<2x32xf32>
    %709 = arith.addf %707, %708 : vector<2x32xf32>
    %710 = math.tanh %709 : vector<2x32xf32>
    %711 = arith.mulf %688, %710 : vector<2x32xf32>
    %712 = vector.extract_strided_slice %711 {offsets = [0, 0], sizes = [2, 16], strides = [1, 1]} : vector<2x32xf32> to vector<2x16xf32>
    %c1_170 = arith.constant 1 : index
    %c0_171 = arith.constant 0 : index
    %c0_172 = arith.constant 0 : index
    %713 = vector.load %arg6[%c1_170, %c0_171, %c0_172] : memref<8x2x32xf32, #tpu.memory_space<vmem>>, vector<1x2x16xf32>
    %714 = vector.shape_cast %713 : vector<1x2x16xf32> to vector<2x16xf32>
    %715 = vector.shape_cast %712 : vector<2x16xf32> to vector<1x2x16xf32>
    tpu.vector_store %arg6[%c1_170, %c0_171, %c0_172], %715 {strides = array<i32>} : memref<8x2x32xf32, #tpu.memory_space<vmem>>, vector<1x2x16xf32>,
    %716 = vector.extract_strided_slice %711 {offsets = [0, 16], sizes = [2, 16], strides = [1, 1]} : vector<2x32xf32> to vector<2x16xf32>
    %c6_173 = arith.constant 6 : index
    %c0_174 = arith.constant 0 : index
    %c16_175 = arith.constant 16 : index
    %717 = vector.load %arg6[%c6_173, %c0_174, %c16_175] : memref<8x2x32xf32, #tpu.memory_space<vmem>>, vector<1x2x16xf32>
    %718 = vector.shape_cast %717 : vector<1x2x16xf32> to vector<2x16xf32>
    %719 = vector.shape_cast %716 : vector<2x16xf32> to vector<1x2x16xf32>
    tpu.vector_store %arg6[%c6_173, %c0_174, %c16_175], %719 {strides = array<i32>} : memref<8x2x32xf32, #tpu.memory_space<vmem>>, vector<1x2x16xf32>,
    %cst_176 = arith.constant dense<0.000000e+00> : vector<2x128xf32>
    %720 = tpu.matmul %711, %549, %cst_176 {dimension_numbers = #tpu.dot_dimension_numbers<[1], [0], [0], [1], [0, 0, 1, 1], [], []>} : vector<2x32xf32>, vector<32x128xf32>, vector<2x128xf32> -> vector<2x128xf32>
    %721 = vector.broadcast %554 : vector<1x128xf32> to vector<2x128xf32>
    %722 = arith.addf %720, %721 : vector<2x128xf32>
    %723 = arith.mulf %722, %722 : vector<2x128xf32>
    %724 = tpu.concatenate %722, %723 in 0 : vector<2x128xf32>, vector<2x128xf32> -> vector<4x128xf32>
    %cst_177 = arith.constant dense<0.000000e+00> : vector<4x128xf32>
    %725 = tpu.matmul %724, %0, %cst_177 {dimension_numbers = #tpu.dot_dimension_numbers<[1], [0], [0], [1], [0, 0, 1, 1], [], []>} : vector<4x128xf32>, vector<128x128xf32>, vector<4x128xf32> -> vector<4x128xf32>
    %726 = vector.extract_strided_slice %725 {offsets = [0, 0], sizes = [2, 128], strides = [1, 1]} : vector<4x128xf32> to vector<2x128xf32>
    %727 = vector.extract_strided_slice %725 {offsets = [2, 0], sizes = [2, 128], strides = [1, 1]} : vector<4x128xf32> to vector<2x128xf32>
    %728 = arith.mulf %726, %726 : vector<2x128xf32>
    %729 = arith.subf %727, %728 : vector<2x128xf32>
    %cst_178 = arith.constant 9.99999974E-6 : f32
    %730 = vector.broadcast %cst_178 : f32 to vector<2x128xf32>
    %731 = arith.addf %729, %730 : vector<2x128xf32>
    %732 = math.rsqrt %731 : vector<2x128xf32>
    %733 = arith.subf %722, %726 : vector<2x128xf32>
    %734 = arith.mulf %733, %732 : vector<2x128xf32>
    %735 = vector.broadcast %555 : vector<1x128xf32> to vector<2x128xf32>
    %736 = arith.mulf %734, %735 : vector<2x128xf32>
    %737 = vector.broadcast %556 : vector<1x128xf32> to vector<2x128xf32>
    %738 = arith.addf %736, %737 : vector<2x128xf32>
    %c2_179 = arith.constant 2 : index
    %c0_180 = arith.constant 0 : index
    %c0_181 = arith.constant 0 : index
    %739 = vector.load %arg5[%c2_179, %c0_180, %c0_181] : memref<8x2x128xf32, #tpu.memory_space<vmem>>, vector<1x2x128xf32>
    %740 = vector.shape_cast %739 : vector<1x2x128xf32> to vector<2x128xf32>
    %741 = arith.addf %740, %738 : vector<2x128xf32>
    %742 = arith.negf %741 : vector<2x128xf32>
    %743 = math.exp %742 : vector<2x128xf32>
    %cst_182 = arith.constant 1.000000e+00 : f32
    %744 = vector.broadcast %cst_182 : f32 to vector<2x128xf32>
    %745 = arith.addf %744, %743 : vector<2x128xf32>
    %746 = arith.divf %744, %745 : vector<2x128xf32>
    %747 = vector.extract_strided_slice %746 {offsets = [0, 0], sizes = [2, 32], strides = [1, 1]} : vector<2x128xf32> to vector<2x32xf32>
    %748 = vector.extract_strided_slice %746 {offsets = [0, 32], sizes = [2, 32], strides = [1, 1]} : vector<2x128xf32> to vector<2x32xf32>
    %749 = vector.extract_strided_slice %746 {offsets = [0, 96], sizes = [2, 32], strides = [1, 1]} : vector<2x128xf32> to vector<2x32xf32>
    %750 = vector.extract_strided_slice %741 {offsets = [0, 64], sizes = [2, 32], strides = [1, 1]} : vector<2x128xf32> to vector<2x32xf32>
    %751 = math.tanh %750 : vector<2x32xf32>
    %752 = arith.mulf %748, %693 : vector<2x32xf32>
    %753 = arith.mulf %747, %751 : vector<2x32xf32>
    %754 = arith.addf %752, %753 : vector<2x32xf32>
    %755 = arith.mulf %754, %754 : vector<2x32xf32>
    %756 = tpu.concatenate %754, %755 in 0 : vector<2x32xf32>, vector<2x32xf32> -> vector<4x32xf32>
    %cst_183 = arith.constant dense<0.000000e+00> : vector<4x32xf32>
    %757 = tpu.matmul %756, %2, %cst_183 {dimension_numbers = #tpu.dot_dimension_numbers<[1], [0], [0], [1], [0, 0, 1, 1], [], []>} : vector<4x32xf32>, vector<32x32xf32>, vector<4x32xf32> -> vector<4x32xf32>
    %758 = vector.extract_strided_slice %757 {offsets = [0, 0], sizes = [2, 32], strides = [1, 1]} : vector<4x32xf32> to vector<2x32xf32>
    %759 = vector.extract_strided_slice %757 {offsets = [2, 0], sizes = [2, 32], strides = [1, 1]} : vector<4x32xf32> to vector<2x32xf32>
    %760 = arith.mulf %758, %758 : vector<2x32xf32>
    %761 = arith.subf %759, %760 : vector<2x32xf32>
    %cst_184 = arith.constant 9.99999974E-6 : f32
    %762 = vector.broadcast %cst_184 : f32 to vector<2x32xf32>
    %763 = arith.addf %761, %762 : vector<2x32xf32>
    %764 = math.rsqrt %763 : vector<2x32xf32>
    %765 = arith.subf %754, %758 : vector<2x32xf32>
    %766 = arith.mulf %765, %764 : vector<2x32xf32>
    %767 = vector.broadcast %557 : vector<1x32xf32> to vector<2x32xf32>
    %768 = arith.mulf %766, %767 : vector<2x32xf32>
    %769 = vector.broadcast %558 : vector<1x32xf32> to vector<2x32xf32>
    %770 = arith.addf %768, %769 : vector<2x32xf32>
    %771 = math.tanh %770 : vector<2x32xf32>
    %772 = arith.mulf %749, %771 : vector<2x32xf32>
    %773 = vector.extract_strided_slice %772 {offsets = [0, 0], sizes = [2, 16], strides = [1, 1]} : vector<2x32xf32> to vector<2x16xf32>
    %c2_185 = arith.constant 2 : index
    %c0_186 = arith.constant 0 : index
    %c0_187 = arith.constant 0 : index
    %774 = vector.load %arg6[%c2_185, %c0_186, %c0_187] : memref<8x2x32xf32, #tpu.memory_space<vmem>>, vector<1x2x16xf32>
    %775 = vector.shape_cast %774 : vector<1x2x16xf32> to vector<2x16xf32>
    %776 = vector.shape_cast %773 : vector<2x16xf32> to vector<1x2x16xf32>
    tpu.vector_store %arg6[%c2_185, %c0_186, %c0_187], %776 {strides = array<i32>} : memref<8x2x32xf32, #tpu.memory_space<vmem>>, vector<1x2x16xf32>,
    %777 = vector.extract_strided_slice %772 {offsets = [0, 16], sizes = [2, 16], strides = [1, 1]} : vector<2x32xf32> to vector<2x16xf32>
    %c5_188 = arith.constant 5 : index
    %c0_189 = arith.constant 0 : index
    %c16_190 = arith.constant 16 : index
    %778 = vector.load %arg6[%c5_188, %c0_189, %c16_190] : memref<8x2x32xf32, #tpu.memory_space<vmem>>, vector<1x2x16xf32>
    %779 = vector.shape_cast %778 : vector<1x2x16xf32> to vector<2x16xf32>
    %780 = vector.shape_cast %777 : vector<2x16xf32> to vector<1x2x16xf32>
    tpu.vector_store %arg6[%c5_188, %c0_189, %c16_190], %780 {strides = array<i32>} : memref<8x2x32xf32, #tpu.memory_space<vmem>>, vector<1x2x16xf32>,
    %cst_191 = arith.constant dense<0.000000e+00> : vector<2x128xf32>
    %781 = tpu.matmul %772, %549, %cst_191 {dimension_numbers = #tpu.dot_dimension_numbers<[1], [0], [0], [1], [0, 0, 1, 1], [], []>} : vector<2x32xf32>, vector<32x128xf32>, vector<2x128xf32> -> vector<2x128xf32>
    %782 = vector.broadcast %554 : vector<1x128xf32> to vector<2x128xf32>
    %783 = arith.addf %781, %782 : vector<2x128xf32>
    %784 = arith.mulf %783, %783 : vector<2x128xf32>
    %785 = tpu.concatenate %783, %784 in 0 : vector<2x128xf32>, vector<2x128xf32> -> vector<4x128xf32>
    %cst_192 = arith.constant dense<0.000000e+00> : vector<4x128xf32>
    %786 = tpu.matmul %785, %0, %cst_192 {dimension_numbers = #tpu.dot_dimension_numbers<[1], [0], [0], [1], [0, 0, 1, 1], [], []>} : vector<4x128xf32>, vector<128x128xf32>, vector<4x128xf32> -> vector<4x128xf32>
    %787 = vector.extract_strided_slice %786 {offsets = [0, 0], sizes = [2, 128], strides = [1, 1]} : vector<4x128xf32> to vector<2x128xf32>
    %788 = vector.extract_strided_slice %786 {offsets = [2, 0], sizes = [2, 128], strides = [1, 1]} : vector<4x128xf32> to vector<2x128xf32>
    %789 = arith.mulf %787, %787 : vector<2x128xf32>
    %790 = arith.subf %788, %789 : vector<2x128xf32>
    %cst_193 = arith.constant 9.99999974E-6 : f32
    %791 = vector.broadcast %cst_193 : f32 to vector<2x128xf32>
    %792 = arith.addf %790, %791 : vector<2x128xf32>
    %793 = math.rsqrt %792 : vector<2x128xf32>
    %794 = arith.subf %783, %787 : vector<2x128xf32>
    %795 = arith.mulf %794, %793 : vector<2x128xf32>
    %796 = vector.broadcast %555 : vector<1x128xf32> to vector<2x128xf32>
    %797 = arith.mulf %795, %796 : vector<2x128xf32>
    %798 = vector.broadcast %556 : vector<1x128xf32> to vector<2x128xf32>
    %799 = arith.addf %797, %798 : vector<2x128xf32>
    %c3_194 = arith.constant 3 : index
    %c0_195 = arith.constant 0 : index
    %c0_196 = arith.constant 0 : index
    %800 = vector.load %arg5[%c3_194, %c0_195, %c0_196] : memref<8x2x128xf32, #tpu.memory_space<vmem>>, vector<1x2x128xf32>
    %801 = vector.shape_cast %800 : vector<1x2x128xf32> to vector<2x128xf32>
    %802 = arith.addf %801, %799 : vector<2x128xf32>
    %803 = arith.negf %802 : vector<2x128xf32>
    %804 = math.exp %803 : vector<2x128xf32>
    %cst_197 = arith.constant 1.000000e+00 : f32
    %805 = vector.broadcast %cst_197 : f32 to vector<2x128xf32>
    %806 = arith.addf %805, %804 : vector<2x128xf32>
    %807 = arith.divf %805, %806 : vector<2x128xf32>
    %808 = vector.extract_strided_slice %807 {offsets = [0, 0], sizes = [2, 32], strides = [1, 1]} : vector<2x128xf32> to vector<2x32xf32>
    %809 = vector.extract_strided_slice %807 {offsets = [0, 32], sizes = [2, 32], strides = [1, 1]} : vector<2x128xf32> to vector<2x32xf32>
    %810 = vector.extract_strided_slice %807 {offsets = [0, 96], sizes = [2, 32], strides = [1, 1]} : vector<2x128xf32> to vector<2x32xf32>
    %811 = vector.extract_strided_slice %802 {offsets = [0, 64], sizes = [2, 32], strides = [1, 1]} : vector<2x128xf32> to vector<2x32xf32>
    %812 = math.tanh %811 : vector<2x32xf32>
    %813 = arith.mulf %809, %754 : vector<2x32xf32>
    %814 = arith.mulf %808, %812 : vector<2x32xf32>
    %815 = arith.addf %813, %814 : vector<2x32xf32>
    %816 = arith.mulf %815, %815 : vector<2x32xf32>
    %817 = tpu.concatenate %815, %816 in 0 : vector<2x32xf32>, vector<2x32xf32> -> vector<4x32xf32>
    %cst_198 = arith.constant dense<0.000000e+00> : vector<4x32xf32>
    %818 = tpu.matmul %817, %2, %cst_198 {dimension_numbers = #tpu.dot_dimension_numbers<[1], [0], [0], [1], [0, 0, 1, 1], [], []>} : vector<4x32xf32>, vector<32x32xf32>, vector<4x32xf32> -> vector<4x32xf32>
    %819 = vector.extract_strided_slice %818 {offsets = [0, 0], sizes = [2, 32], strides = [1, 1]} : vector<4x32xf32> to vector<2x32xf32>
    %820 = vector.extract_strided_slice %818 {offsets = [2, 0], sizes = [2, 32], strides = [1, 1]} : vector<4x32xf32> to vector<2x32xf32>
    %821 = arith.mulf %819, %819 : vector<2x32xf32>
    %822 = arith.subf %820, %821 : vector<2x32xf32>
    %cst_199 = arith.constant 9.99999974E-6 : f32
    %823 = vector.broadcast %cst_199 : f32 to vector<2x32xf32>
    %824 = arith.addf %822, %823 : vector<2x32xf32>
    %825 = math.rsqrt %824 : vector<2x32xf32>
    %826 = arith.subf %815, %819 : vector<2x32xf32>
    %827 = arith.mulf %826, %825 : vector<2x32xf32>
    %828 = vector.broadcast %557 : vector<1x32xf32> to vector<2x32xf32>
    %829 = arith.mulf %827, %828 : vector<2x32xf32>
    %830 = vector.broadcast %558 : vector<1x32xf32> to vector<2x32xf32>
    %831 = arith.addf %829, %830 : vector<2x32xf32>
    %832 = math.tanh %831 : vector<2x32xf32>
    %833 = arith.mulf %810, %832 : vector<2x32xf32>
    %834 = vector.extract_strided_slice %833 {offsets = [0, 0], sizes = [2, 16], strides = [1, 1]} : vector<2x32xf32> to vector<2x16xf32>
    %c3_200 = arith.constant 3 : index
    %c0_201 = arith.constant 0 : index
    %c0_202 = arith.constant 0 : index
    %835 = vector.load %arg6[%c3_200, %c0_201, %c0_202] : memref<8x2x32xf32, #tpu.memory_space<vmem>>, vector<1x2x16xf32>
    %836 = vector.shape_cast %835 : vector<1x2x16xf32> to vector<2x16xf32>
    %837 = vector.shape_cast %834 : vector<2x16xf32> to vector<1x2x16xf32>
    tpu.vector_store %arg6[%c3_200, %c0_201, %c0_202], %837 {strides = array<i32>} : memref<8x2x32xf32, #tpu.memory_space<vmem>>, vector<1x2x16xf32>,
    %838 = vector.extract_strided_slice %833 {offsets = [0, 16], sizes = [2, 16], strides = [1, 1]} : vector<2x32xf32> to vector<2x16xf32>
    %c4_203 = arith.constant 4 : index
    %c0_204 = arith.constant 0 : index
    %c16_205 = arith.constant 16 : index
    %839 = vector.load %arg6[%c4_203, %c0_204, %c16_205] : memref<8x2x32xf32, #tpu.memory_space<vmem>>, vector<1x2x16xf32>
    %840 = vector.shape_cast %839 : vector<1x2x16xf32> to vector<2x16xf32>
    %841 = vector.shape_cast %838 : vector<2x16xf32> to vector<1x2x16xf32>
    tpu.vector_store %arg6[%c4_203, %c0_204, %c16_205], %841 {strides = array<i32>} : memref<8x2x32xf32, #tpu.memory_space<vmem>>, vector<1x2x16xf32>,
    %cst_206 = arith.constant dense<0.000000e+00> : vector<2x128xf32>
    %842 = tpu.matmul %833, %549, %cst_206 {dimension_numbers = #tpu.dot_dimension_numbers<[1], [0], [0], [1], [0, 0, 1, 1], [], []>} : vector<2x32xf32>, vector<32x128xf32>, vector<2x128xf32> -> vector<2x128xf32>
    %843 = vector.broadcast %554 : vector<1x128xf32> to vector<2x128xf32>
    %844 = arith.addf %842, %843 : vector<2x128xf32>
    %845 = arith.mulf %844, %844 : vector<2x128xf32>
    %846 = tpu.concatenate %844, %845 in 0 : vector<2x128xf32>, vector<2x128xf32> -> vector<4x128xf32>
    %cst_207 = arith.constant dense<0.000000e+00> : vector<4x128xf32>
    %847 = tpu.matmul %846, %0, %cst_207 {dimension_numbers = #tpu.dot_dimension_numbers<[1], [0], [0], [1], [0, 0, 1, 1], [], []>} : vector<4x128xf32>, vector<128x128xf32>, vector<4x128xf32> -> vector<4x128xf32>
    %848 = vector.extract_strided_slice %847 {offsets = [0, 0], sizes = [2, 128], strides = [1, 1]} : vector<4x128xf32> to vector<2x128xf32>
    %849 = vector.extract_strided_slice %847 {offsets = [2, 0], sizes = [2, 128], strides = [1, 1]} : vector<4x128xf32> to vector<2x128xf32>
    %850 = arith.mulf %848, %848 : vector<2x128xf32>
    %851 = arith.subf %849, %850 : vector<2x128xf32>
    %cst_208 = arith.constant 9.99999974E-6 : f32
    %852 = vector.broadcast %cst_208 : f32 to vector<2x128xf32>
    %853 = arith.addf %851, %852 : vector<2x128xf32>
    %854 = math.rsqrt %853 : vector<2x128xf32>
    %855 = arith.subf %844, %848 : vector<2x128xf32>
    %856 = arith.mulf %855, %854 : vector<2x128xf32>
    %857 = vector.broadcast %555 : vector<1x128xf32> to vector<2x128xf32>
    %858 = arith.mulf %856, %857 : vector<2x128xf32>
    %859 = vector.broadcast %556 : vector<1x128xf32> to vector<2x128xf32>
    %860 = arith.addf %858, %859 : vector<2x128xf32>
    %c4_209 = arith.constant 4 : index
    %c0_210 = arith.constant 0 : index
    %c0_211 = arith.constant 0 : index
    %861 = vector.load %arg5[%c4_209, %c0_210, %c0_211] : memref<8x2x128xf32, #tpu.memory_space<vmem>>, vector<1x2x128xf32>
    %862 = vector.shape_cast %861 : vector<1x2x128xf32> to vector<2x128xf32>
    %863 = arith.addf %862, %860 : vector<2x128xf32>
    %864 = arith.negf %863 : vector<2x128xf32>
    %865 = math.exp %864 : vector<2x128xf32>
    %cst_212 = arith.constant 1.000000e+00 : f32
    %866 = vector.broadcast %cst_212 : f32 to vector<2x128xf32>
    %867 = arith.addf %866, %865 : vector<2x128xf32>
    %868 = arith.divf %866, %867 : vector<2x128xf32>
    %869 = vector.extract_strided_slice %868 {offsets = [0, 0], sizes = [2, 32], strides = [1, 1]} : vector<2x128xf32> to vector<2x32xf32>
    %870 = vector.extract_strided_slice %868 {offsets = [0, 32], sizes = [2, 32], strides = [1, 1]} : vector<2x128xf32> to vector<2x32xf32>
    %871 = vector.extract_strided_slice %868 {offsets = [0, 96], sizes = [2, 32], strides = [1, 1]} : vector<2x128xf32> to vector<2x32xf32>
    %872 = vector.extract_strided_slice %863 {offsets = [0, 64], sizes = [2, 32], strides = [1, 1]} : vector<2x128xf32> to vector<2x32xf32>
    %873 = math.tanh %872 : vector<2x32xf32>
    %874 = arith.mulf %870, %815 : vector<2x32xf32>
    %875 = arith.mulf %869, %873 : vector<2x32xf32>
    %876 = arith.addf %874, %875 : vector<2x32xf32>
    %877 = arith.mulf %876, %876 : vector<2x32xf32>
    %878 = tpu.concatenate %876, %877 in 0 : vector<2x32xf32>, vector<2x32xf32> -> vector<4x32xf32>
    %cst_213 = arith.constant dense<0.000000e+00> : vector<4x32xf32>
    %879 = tpu.matmul %878, %2, %cst_213 {dimension_numbers = #tpu.dot_dimension_numbers<[1], [0], [0], [1], [0, 0, 1, 1], [], []>} : vector<4x32xf32>, vector<32x32xf32>, vector<4x32xf32> -> vector<4x32xf32>
    %880 = vector.extract_strided_slice %879 {offsets = [0, 0], sizes = [2, 32], strides = [1, 1]} : vector<4x32xf32> to vector<2x32xf32>
    %881 = vector.extract_strided_slice %879 {offsets = [2, 0], sizes = [2, 32], strides = [1, 1]} : vector<4x32xf32> to vector<2x32xf32>
    %882 = arith.mulf %880, %880 : vector<2x32xf32>
    %883 = arith.subf %881, %882 : vector<2x32xf32>
    %cst_214 = arith.constant 9.99999974E-6 : f32
    %884 = vector.broadcast %cst_214 : f32 to vector<2x32xf32>
    %885 = arith.addf %883, %884 : vector<2x32xf32>
    %886 = math.rsqrt %885 : vector<2x32xf32>
    %887 = arith.subf %876, %880 : vector<2x32xf32>
    %888 = arith.mulf %887, %886 : vector<2x32xf32>
    %889 = vector.broadcast %557 : vector<1x32xf32> to vector<2x32xf32>
    %890 = arith.mulf %888, %889 : vector<2x32xf32>
    %891 = vector.broadcast %558 : vector<1x32xf32> to vector<2x32xf32>
    %892 = arith.addf %890, %891 : vector<2x32xf32>
    %893 = math.tanh %892 : vector<2x32xf32>
    %894 = arith.mulf %871, %893 : vector<2x32xf32>
    %895 = vector.extract_strided_slice %894 {offsets = [0, 0], sizes = [2, 16], strides = [1, 1]} : vector<2x32xf32> to vector<2x16xf32>
    %c4_215 = arith.constant 4 : index
    %c0_216 = arith.constant 0 : index
    %c0_217 = arith.constant 0 : index
    %896 = vector.load %arg6[%c4_215, %c0_216, %c0_217] : memref<8x2x32xf32, #tpu.memory_space<vmem>>, vector<1x2x16xf32>
    %897 = vector.shape_cast %896 : vector<1x2x16xf32> to vector<2x16xf32>
    %898 = vector.shape_cast %895 : vector<2x16xf32> to vector<1x2x16xf32>
    tpu.vector_store %arg6[%c4_215, %c0_216, %c0_217], %898 {strides = array<i32>} : memref<8x2x32xf32, #tpu.memory_space<vmem>>, vector<1x2x16xf32>,
    %899 = vector.extract_strided_slice %894 {offsets = [0, 16], sizes = [2, 16], strides = [1, 1]} : vector<2x32xf32> to vector<2x16xf32>
    %c3_218 = arith.constant 3 : index
    %c0_219 = arith.constant 0 : index
    %c16_220 = arith.constant 16 : index
    %900 = vector.load %arg6[%c3_218, %c0_219, %c16_220] : memref<8x2x32xf32, #tpu.memory_space<vmem>>, vector<1x2x16xf32>
    %901 = vector.shape_cast %900 : vector<1x2x16xf32> to vector<2x16xf32>
    %902 = vector.shape_cast %899 : vector<2x16xf32> to vector<1x2x16xf32>
    tpu.vector_store %arg6[%c3_218, %c0_219, %c16_220], %902 {strides = array<i32>} : memref<8x2x32xf32, #tpu.memory_space<vmem>>, vector<1x2x16xf32>,
    %cst_221 = arith.constant dense<0.000000e+00> : vector<2x128xf32>
    %903 = tpu.matmul %894, %549, %cst_221 {dimension_numbers = #tpu.dot_dimension_numbers<[1], [0], [0], [1], [0, 0, 1, 1], [], []>} : vector<2x32xf32>, vector<32x128xf32>, vector<2x128xf32> -> vector<2x128xf32>
    %904 = vector.broadcast %554 : vector<1x128xf32> to vector<2x128xf32>
    %905 = arith.addf %903, %904 : vector<2x128xf32>
    %906 = arith.mulf %905, %905 : vector<2x128xf32>
    %907 = tpu.concatenate %905, %906 in 0 : vector<2x128xf32>, vector<2x128xf32> -> vector<4x128xf32>
    %cst_222 = arith.constant dense<0.000000e+00> : vector<4x128xf32>
    %908 = tpu.matmul %907, %0, %cst_222 {dimension_numbers = #tpu.dot_dimension_numbers<[1], [0], [0], [1], [0, 0, 1, 1], [], []>} : vector<4x128xf32>, vector<128x128xf32>, vector<4x128xf32> -> vector<4x128xf32>
    %909 = vector.extract_strided_slice %908 {offsets = [0, 0], sizes = [2, 128], strides = [1, 1]} : vector<4x128xf32> to vector<2x128xf32>
    %910 = vector.extract_strided_slice %908 {offsets = [2, 0], sizes = [2, 128], strides = [1, 1]} : vector<4x128xf32> to vector<2x128xf32>
    %911 = arith.mulf %909, %909 : vector<2x128xf32>
    %912 = arith.subf %910, %911 : vector<2x128xf32>
    %cst_223 = arith.constant 9.99999974E-6 : f32
    %913 = vector.broadcast %cst_223 : f32 to vector<2x128xf32>
    %914 = arith.addf %912, %913 : vector<2x128xf32>
    %915 = math.rsqrt %914 : vector<2x128xf32>
    %916 = arith.subf %905, %909 : vector<2x128xf32>
    %917 = arith.mulf %916, %915 : vector<2x128xf32>
    %918 = vector.broadcast %555 : vector<1x128xf32> to vector<2x128xf32>
    %919 = arith.mulf %917, %918 : vector<2x128xf32>
    %920 = vector.broadcast %556 : vector<1x128xf32> to vector<2x128xf32>
    %921 = arith.addf %919, %920 : vector<2x128xf32>
    %c5_224 = arith.constant 5 : index
    %c0_225 = arith.constant 0 : index
    %c0_226 = arith.constant 0 : index
    %922 = vector.load %arg5[%c5_224, %c0_225, %c0_226] : memref<8x2x128xf32, #tpu.memory_space<vmem>>, vector<1x2x128xf32>
    %923 = vector.shape_cast %922 : vector<1x2x128xf32> to vector<2x128xf32>
    %924 = arith.addf %923, %921 : vector<2x128xf32>
    %925 = arith.negf %924 : vector<2x128xf32>
    %926 = math.exp %925 : vector<2x128xf32>
    %cst_227 = arith.constant 1.000000e+00 : f32
    %927 = vector.broadcast %cst_227 : f32 to vector<2x128xf32>
    %928 = arith.addf %927, %926 : vector<2x128xf32>
    %929 = arith.divf %927, %928 : vector<2x128xf32>
    %930 = vector.extract_strided_slice %929 {offsets = [0, 0], sizes = [2, 32], strides = [1, 1]} : vector<2x128xf32> to vector<2x32xf32>
    %931 = vector.extract_strided_slice %929 {offsets = [0, 32], sizes = [2, 32], strides = [1, 1]} : vector<2x128xf32> to vector<2x32xf32>
    %932 = vector.extract_strided_slice %929 {offsets = [0, 96], sizes = [2, 32], strides = [1, 1]} : vector<2x128xf32> to vector<2x32xf32>
    %933 = vector.extract_strided_slice %924 {offsets = [0, 64], sizes = [2, 32], strides = [1, 1]} : vector<2x128xf32> to vector<2x32xf32>
    %934 = math.tanh %933 : vector<2x32xf32>
    %935 = arith.mulf %931, %876 : vector<2x32xf32>
    %936 = arith.mulf %930, %934 : vector<2x32xf32>
    %937 = arith.addf %935, %936 : vector<2x32xf32>
    %938 = arith.mulf %937, %937 : vector<2x32xf32>
    %939 = tpu.concatenate %937, %938 in 0 : vector<2x32xf32>, vector<2x32xf32> -> vector<4x32xf32>
    %cst_228 = arith.constant dense<0.000000e+00> : vector<4x32xf32>
    %940 = tpu.matmul %939, %2, %cst_228 {dimension_numbers = #tpu.dot_dimension_numbers<[1], [0], [0], [1], [0, 0, 1, 1], [], []>} : vector<4x32xf32>, vector<32x32xf32>, vector<4x32xf32> -> vector<4x32xf32>
    %941 = vector.extract_strided_slice %940 {offsets = [0, 0], sizes = [2, 32], strides = [1, 1]} : vector<4x32xf32> to vector<2x32xf32>
    %942 = vector.extract_strided_slice %940 {offsets = [2, 0], sizes = [2, 32], strides = [1, 1]} : vector<4x32xf32> to vector<2x32xf32>
    %943 = arith.mulf %941, %941 : vector<2x32xf32>
    %944 = arith.subf %942, %943 : vector<2x32xf32>
    %cst_229 = arith.constant 9.99999974E-6 : f32
    %945 = vector.broadcast %cst_229 : f32 to vector<2x32xf32>
    %946 = arith.addf %944, %945 : vector<2x32xf32>
    %947 = math.rsqrt %946 : vector<2x32xf32>
    %948 = arith.subf %937, %941 : vector<2x32xf32>
    %949 = arith.mulf %948, %947 : vector<2x32xf32>
    %950 = vector.broadcast %557 : vector<1x32xf32> to vector<2x32xf32>
    %951 = arith.mulf %949, %950 : vector<2x32xf32>
    %952 = vector.broadcast %558 : vector<1x32xf32> to vector<2x32xf32>
    %953 = arith.addf %951, %952 : vector<2x32xf32>
    %954 = math.tanh %953 : vector<2x32xf32>
    %955 = arith.mulf %932, %954 : vector<2x32xf32>
    %956 = vector.extract_strided_slice %955 {offsets = [0, 0], sizes = [2, 16], strides = [1, 1]} : vector<2x32xf32> to vector<2x16xf32>
    %c5_230 = arith.constant 5 : index
    %c0_231 = arith.constant 0 : index
    %c0_232 = arith.constant 0 : index
    %957 = vector.load %arg6[%c5_230, %c0_231, %c0_232] : memref<8x2x32xf32, #tpu.memory_space<vmem>>, vector<1x2x16xf32>
    %958 = vector.shape_cast %957 : vector<1x2x16xf32> to vector<2x16xf32>
    %959 = vector.shape_cast %956 : vector<2x16xf32> to vector<1x2x16xf32>
    tpu.vector_store %arg6[%c5_230, %c0_231, %c0_232], %959 {strides = array<i32>} : memref<8x2x32xf32, #tpu.memory_space<vmem>>, vector<1x2x16xf32>,
    %960 = vector.extract_strided_slice %955 {offsets = [0, 16], sizes = [2, 16], strides = [1, 1]} : vector<2x32xf32> to vector<2x16xf32>
    %c2_233 = arith.constant 2 : index
    %c0_234 = arith.constant 0 : index
    %c16_235 = arith.constant 16 : index
    %961 = vector.load %arg6[%c2_233, %c0_234, %c16_235] : memref<8x2x32xf32, #tpu.memory_space<vmem>>, vector<1x2x16xf32>
    %962 = vector.shape_cast %961 : vector<1x2x16xf32> to vector<2x16xf32>
    %963 = vector.shape_cast %960 : vector<2x16xf32> to vector<1x2x16xf32>
    tpu.vector_store %arg6[%c2_233, %c0_234, %c16_235], %963 {strides = array<i32>} : memref<8x2x32xf32, #tpu.memory_space<vmem>>, vector<1x2x16xf32>,
    %cst_236 = arith.constant dense<0.000000e+00> : vector<2x128xf32>
    %964 = tpu.matmul %955, %549, %cst_236 {dimension_numbers = #tpu.dot_dimension_numbers<[1], [0], [0], [1], [0, 0, 1, 1], [], []>} : vector<2x32xf32>, vector<32x128xf32>, vector<2x128xf32> -> vector<2x128xf32>
    %965 = vector.broadcast %554 : vector<1x128xf32> to vector<2x128xf32>
    %966 = arith.addf %964, %965 : vector<2x128xf32>
    %967 = arith.mulf %966, %966 : vector<2x128xf32>
    %968 = tpu.concatenate %966, %967 in 0 : vector<2x128xf32>, vector<2x128xf32> -> vector<4x128xf32>
    %cst_237 = arith.constant dense<0.000000e+00> : vector<4x128xf32>
    %969 = tpu.matmul %968, %0, %cst_237 {dimension_numbers = #tpu.dot_dimension_numbers<[1], [0], [0], [1], [0, 0, 1, 1], [], []>} : vector<4x128xf32>, vector<128x128xf32>, vector<4x128xf32> -> vector<4x128xf32>
    %970 = vector.extract_strided_slice %969 {offsets = [0, 0], sizes = [2, 128], strides = [1, 1]} : vector<4x128xf32> to vector<2x128xf32>
    %971 = vector.extract_strided_slice %969 {offsets = [2, 0], sizes = [2, 128], strides = [1, 1]} : vector<4x128xf32> to vector<2x128xf32>
    %972 = arith.mulf %970, %970 : vector<2x128xf32>
    %973 = arith.subf %971, %972 : vector<2x128xf32>
    %cst_238 = arith.constant 9.99999974E-6 : f32
    %974 = vector.broadcast %cst_238 : f32 to vector<2x128xf32>
    %975 = arith.addf %973, %974 : vector<2x128xf32>
    %976 = math.rsqrt %975 : vector<2x128xf32>
    %977 = arith.subf %966, %970 : vector<2x128xf32>
    %978 = arith.mulf %977, %976 : vector<2x128xf32>
    %979 = vector.broadcast %555 : vector<1x128xf32> to vector<2x128xf32>
    %980 = arith.mulf %978, %979 : vector<2x128xf32>
    %981 = vector.broadcast %556 : vector<1x128xf32> to vector<2x128xf32>
    %982 = arith.addf %980, %981 : vector<2x128xf32>
    %c6_239 = arith.constant 6 : index
    %c0_240 = arith.constant 0 : index
    %c0_241 = arith.constant 0 : index
    %983 = vector.load %arg5[%c6_239, %c0_240, %c0_241] : memref<8x2x128xf32, #tpu.memory_space<vmem>>, vector<1x2x128xf32>
    %984 = vector.shape_cast %983 : vector<1x2x128xf32> to vector<2x128xf32>
    %985 = arith.addf %984, %982 : vector<2x128xf32>
    %986 = arith.negf %985 : vector<2x128xf32>
    %987 = math.exp %986 : vector<2x128xf32>
    %cst_242 = arith.constant 1.000000e+00 : f32
    %988 = vector.broadcast %cst_242 : f32 to vector<2x128xf32>
    %989 = arith.addf %988, %987 : vector<2x128xf32>
    %990 = arith.divf %988, %989 : vector<2x128xf32>
    %991 = vector.extract_strided_slice %990 {offsets = [0, 0], sizes = [2, 32], strides = [1, 1]} : vector<2x128xf32> to vector<2x32xf32>
    %992 = vector.extract_strided_slice %990 {offsets = [0, 32], sizes = [2, 32], strides = [1, 1]} : vector<2x128xf32> to vector<2x32xf32>
    %993 = vector.extract_strided_slice %990 {offsets = [0, 96], sizes = [2, 32], strides = [1, 1]} : vector<2x128xf32> to vector<2x32xf32>
    %994 = vector.extract_strided_slice %985 {offsets = [0, 64], sizes = [2, 32], strides = [1, 1]} : vector<2x128xf32> to vector<2x32xf32>
    %995 = math.tanh %994 : vector<2x32xf32>
    %996 = arith.mulf %992, %937 : vector<2x32xf32>
    %997 = arith.mulf %991, %995 : vector<2x32xf32>
    %998 = arith.addf %996, %997 : vector<2x32xf32>
    %999 = arith.mulf %998, %998 : vector<2x32xf32>
    %1000 = tpu.concatenate %998, %999 in 0 : vector<2x32xf32>, vector<2x32xf32> -> vector<4x32xf32>
    %cst_243 = arith.constant dense<0.000000e+00> : vector<4x32xf32>
    %1001 = tpu.matmul %1000, %2, %cst_243 {dimension_numbers = #tpu.dot_dimension_numbers<[1], [0], [0], [1], [0, 0, 1, 1], [], []>} : vector<4x32xf32>, vector<32x32xf32>, vector<4x32xf32> -> vector<4x32xf32>
    %1002 = vector.extract_strided_slice %1001 {offsets = [0, 0], sizes = [2, 32], strides = [1, 1]} : vector<4x32xf32> to vector<2x32xf32>
    %1003 = vector.extract_strided_slice %1001 {offsets = [2, 0], sizes = [2, 32], strides = [1, 1]} : vector<4x32xf32> to vector<2x32xf32>
    %1004 = arith.mulf %1002, %1002 : vector<2x32xf32>
    %1005 = arith.subf %1003, %1004 : vector<2x32xf32>
    %cst_244 = arith.constant 9.99999974E-6 : f32
    %1006 = vector.broadcast %cst_244 : f32 to vector<2x32xf32>
    %1007 = arith.addf %1005, %1006 : vector<2x32xf32>
    %1008 = math.rsqrt %1007 : vector<2x32xf32>
    %1009 = arith.subf %998, %1002 : vector<2x32xf32>
    %1010 = arith.mulf %1009, %1008 : vector<2x32xf32>
    %1011 = vector.broadcast %557 : vector<1x32xf32> to vector<2x32xf32>
    %1012 = arith.mulf %1010, %1011 : vector<2x32xf32>
    %1013 = vector.broadcast %558 : vector<1x32xf32> to vector<2x32xf32>
    %1014 = arith.addf %1012, %1013 : vector<2x32xf32>
    %1015 = math.tanh %1014 : vector<2x32xf32>
    %1016 = arith.mulf %993, %1015 : vector<2x32xf32>
    %1017 = vector.extract_strided_slice %1016 {offsets = [0, 0], sizes = [2, 16], strides = [1, 1]} : vector<2x32xf32> to vector<2x16xf32>
    %c6_245 = arith.constant 6 : index
    %c0_246 = arith.constant 0 : index
    %c0_247 = arith.constant 0 : index
    %1018 = vector.load %arg6[%c6_245, %c0_246, %c0_247] : memref<8x2x32xf32, #tpu.memory_space<vmem>>, vector<1x2x16xf32>
    %1019 = vector.shape_cast %1018 : vector<1x2x16xf32> to vector<2x16xf32>
    %1020 = vector.shape_cast %1017 : vector<2x16xf32> to vector<1x2x16xf32>
    tpu.vector_store %arg6[%c6_245, %c0_246, %c0_247], %1020 {strides = array<i32>} : memref<8x2x32xf32, #tpu.memory_space<vmem>>, vector<1x2x16xf32>,
    %1021 = vector.extract_strided_slice %1016 {offsets = [0, 16], sizes = [2, 16], strides = [1, 1]} : vector<2x32xf32> to vector<2x16xf32>
    %c1_248 = arith.constant 1 : index
    %c0_249 = arith.constant 0 : index
    %c16_250 = arith.constant 16 : index
    %1022 = vector.load %arg6[%c1_248, %c0_249, %c16_250] : memref<8x2x32xf32, #tpu.memory_space<vmem>>, vector<1x2x16xf32>
    %1023 = vector.shape_cast %1022 : vector<1x2x16xf32> to vector<2x16xf32>
    %1024 = vector.shape_cast %1021 : vector<2x16xf32> to vector<1x2x16xf32>
    tpu.vector_store %arg6[%c1_248, %c0_249, %c16_250], %1024 {strides = array<i32>} : memref<8x2x32xf32, #tpu.memory_space<vmem>>, vector<1x2x16xf32>,
    %cst_251 = arith.constant dense<0.000000e+00> : vector<2x128xf32>
    %1025 = tpu.matmul %1016, %549, %cst_251 {dimension_numbers = #tpu.dot_dimension_numbers<[1], [0], [0], [1], [0, 0, 1, 1], [], []>} : vector<2x32xf32>, vector<32x128xf32>, vector<2x128xf32> -> vector<2x128xf32>
    %1026 = vector.broadcast %554 : vector<1x128xf32> to vector<2x128xf32>
    %1027 = arith.addf %1025, %1026 : vector<2x128xf32>
    %1028 = arith.mulf %1027, %1027 : vector<2x128xf32>
    %1029 = tpu.concatenate %1027, %1028 in 0 : vector<2x128xf32>, vector<2x128xf32> -> vector<4x128xf32>
    %cst_252 = arith.constant dense<0.000000e+00> : vector<4x128xf32>
    %1030 = tpu.matmul %1029, %0, %cst_252 {dimension_numbers = #tpu.dot_dimension_numbers<[1], [0], [0], [1], [0, 0, 1, 1], [], []>} : vector<4x128xf32>, vector<128x128xf32>, vector<4x128xf32> -> vector<4x128xf32>
    %1031 = vector.extract_strided_slice %1030 {offsets = [0, 0], sizes = [2, 128], strides = [1, 1]} : vector<4x128xf32> to vector<2x128xf32>
    %1032 = vector.extract_strided_slice %1030 {offsets = [2, 0], sizes = [2, 128], strides = [1, 1]} : vector<4x128xf32> to vector<2x128xf32>
    %1033 = arith.mulf %1031, %1031 : vector<2x128xf32>
    %1034 = arith.subf %1032, %1033 : vector<2x128xf32>
    %cst_253 = arith.constant 9.99999974E-6 : f32
    %1035 = vector.broadcast %cst_253 : f32 to vector<2x128xf32>
    %1036 = arith.addf %1034, %1035 : vector<2x128xf32>
    %1037 = math.rsqrt %1036 : vector<2x128xf32>
    %1038 = arith.subf %1027, %1031 : vector<2x128xf32>
    %1039 = arith.mulf %1038, %1037 : vector<2x128xf32>
    %1040 = vector.broadcast %555 : vector<1x128xf32> to vector<2x128xf32>
    %1041 = arith.mulf %1039, %1040 : vector<2x128xf32>
    %1042 = vector.broadcast %556 : vector<1x128xf32> to vector<2x128xf32>
    %1043 = arith.addf %1041, %1042 : vector<2x128xf32>
    %c7_254 = arith.constant 7 : index
    %c0_255 = arith.constant 0 : index
    %c0_256 = arith.constant 0 : index
    %1044 = vector.load %arg5[%c7_254, %c0_255, %c0_256] : memref<8x2x128xf32, #tpu.memory_space<vmem>>, vector<1x2x128xf32>
    %1045 = vector.shape_cast %1044 : vector<1x2x128xf32> to vector<2x128xf32>
    %1046 = arith.addf %1045, %1043 : vector<2x128xf32>
    %1047 = arith.negf %1046 : vector<2x128xf32>
    %1048 = math.exp %1047 : vector<2x128xf32>
    %cst_257 = arith.constant 1.000000e+00 : f32
    %1049 = vector.broadcast %cst_257 : f32 to vector<2x128xf32>
    %1050 = arith.addf %1049, %1048 : vector<2x128xf32>
    %1051 = arith.divf %1049, %1050 : vector<2x128xf32>
    %1052 = vector.extract_strided_slice %1051 {offsets = [0, 0], sizes = [2, 32], strides = [1, 1]} : vector<2x128xf32> to vector<2x32xf32>
    %1053 = vector.extract_strided_slice %1051 {offsets = [0, 32], sizes = [2, 32], strides = [1, 1]} : vector<2x128xf32> to vector<2x32xf32>
    %1054 = vector.extract_strided_slice %1051 {offsets = [0, 96], sizes = [2, 32], strides = [1, 1]} : vector<2x128xf32> to vector<2x32xf32>
    %1055 = vector.extract_strided_slice %1046 {offsets = [0, 64], sizes = [2, 32], strides = [1, 1]} : vector<2x128xf32> to vector<2x32xf32>
    %1056 = math.tanh %1055 : vector<2x32xf32>
    %1057 = arith.mulf %1053, %998 : vector<2x32xf32>
    %1058 = arith.mulf %1052, %1056 : vector<2x32xf32>
    %1059 = arith.addf %1057, %1058 : vector<2x32xf32>
    %1060 = arith.mulf %1059, %1059 : vector<2x32xf32>
    %1061 = tpu.concatenate %1059, %1060 in 0 : vector<2x32xf32>, vector<2x32xf32> -> vector<4x32xf32>
    %cst_258 = arith.constant dense<0.000000e+00> : vector<4x32xf32>
    %1062 = tpu.matmul %1061, %2, %cst_258 {dimension_numbers = #tpu.dot_dimension_numbers<[1], [0], [0], [1], [0, 0, 1, 1], [], []>} : vector<4x32xf32>, vector<32x32xf32>, vector<4x32xf32> -> vector<4x32xf32>
    %1063 = vector.extract_strided_slice %1062 {offsets = [0, 0], sizes = [2, 32], strides = [1, 1]} : vector<4x32xf32> to vector<2x32xf32>
    %1064 = vector.extract_strided_slice %1062 {offsets = [2, 0], sizes = [2, 32], strides = [1, 1]} : vector<4x32xf32> to vector<2x32xf32>
    %1065 = arith.mulf %1063, %1063 : vector<2x32xf32>
    %1066 = arith.subf %1064, %1065 : vector<2x32xf32>
    %cst_259 = arith.constant 9.99999974E-6 : f32
    %1067 = vector.broadcast %cst_259 : f32 to vector<2x32xf32>
    %1068 = arith.addf %1066, %1067 : vector<2x32xf32>
    %1069 = math.rsqrt %1068 : vector<2x32xf32>
    %1070 = arith.subf %1059, %1063 : vector<2x32xf32>
    %1071 = arith.mulf %1070, %1069 : vector<2x32xf32>
    %1072 = vector.broadcast %557 : vector<1x32xf32> to vector<2x32xf32>
    %1073 = arith.mulf %1071, %1072 : vector<2x32xf32>
    %1074 = vector.broadcast %558 : vector<1x32xf32> to vector<2x32xf32>
    %1075 = arith.addf %1073, %1074 : vector<2x32xf32>
    %1076 = math.tanh %1075 : vector<2x32xf32>
    %1077 = arith.mulf %1054, %1076 : vector<2x32xf32>
    %1078 = vector.extract_strided_slice %1077 {offsets = [0, 0], sizes = [2, 16], strides = [1, 1]} : vector<2x32xf32> to vector<2x16xf32>
    %c7_260 = arith.constant 7 : index
    %c0_261 = arith.constant 0 : index
    %c0_262 = arith.constant 0 : index
    %1079 = vector.load %arg6[%c7_260, %c0_261, %c0_262] : memref<8x2x32xf32, #tpu.memory_space<vmem>>, vector<1x2x16xf32>
    %1080 = vector.shape_cast %1079 : vector<1x2x16xf32> to vector<2x16xf32>
    %1081 = vector.shape_cast %1078 : vector<2x16xf32> to vector<1x2x16xf32>
    tpu.vector_store %arg6[%c7_260, %c0_261, %c0_262], %1081 {strides = array<i32>} : memref<8x2x32xf32, #tpu.memory_space<vmem>>, vector<1x2x16xf32>,
    %1082 = vector.extract_strided_slice %1077 {offsets = [0, 16], sizes = [2, 16], strides = [1, 1]} : vector<2x32xf32> to vector<2x16xf32>
    %c0_263 = arith.constant 0 : index
    %c0_264 = arith.constant 0 : index
    %c16_265 = arith.constant 16 : index
    %1083 = vector.load %arg6[%c0_263, %c0_264, %c16_265] : memref<8x2x32xf32, #tpu.memory_space<vmem>>, vector<1x2x16xf32>
    %1084 = vector.shape_cast %1083 : vector<1x2x16xf32> to vector<2x16xf32>
    %1085 = vector.shape_cast %1082 : vector<2x16xf32> to vector<1x2x16xf32>
    tpu.vector_store %arg6[%c0_263, %c0_264, %c16_265], %1085 {strides = array<i32>} : memref<8x2x32xf32, #tpu.memory_space<vmem>>, vector<1x2x16xf32>,
    %c7_266 = arith.constant 7 : index
    %c0_267 = arith.constant 0 : index
    %c0_268 = arith.constant 0 : index
    %1086 = vector.load %arg6[%c7_266, %c0_267, %c0_268] : memref<8x2x32xf32, #tpu.memory_space<vmem>>, vector<1x2x32xf32>
    %1087 = vector.shape_cast %1086 : vector<1x2x32xf32> to vector<2x32xf32>
    %c0_269 = arith.constant 0 : index
    %c0_270 = arith.constant 0 : index
    %1088 = vector.load %arg4[%c0_269, %c0_270] : memref<2x32xf32, #tpu.memory_space<vmem>>, vector<2x32xf32>
    tpu.vector_store %arg4[%c0_269, %c0_270], %1087 {strides = array<i32>} : memref<2x32xf32, #tpu.memory_space<vmem>>, vector<2x32xf32>,
    return
  }
}

</mosaic_0001>

<bundles_post_ra>
// kernel: tpu_custom_call.1
= control target key start
LH: loop header
LB: loop body
LE: loop exit
PB: predicated region body
PF: predicated region fallthrough
CT: control target
= control target key end

     0   :  { %9 = vsyncpa [#allocation5], 0  ;;  %s9282_s0 = inlined_call_operand.hbm [shape: f32[8,2,16], index: 0, kind: input, shape index: {}]   ;;  %s9283_s1 = inlined_call_operand.hbm [shape: f32[64,128], index: 1, kind: input, shape index: {}]   ;;  %s9284_s2 = inlined_call_operand.hbm [shape: f32[64,128], index: 2, kind: input, shape index: {}]   ;;  %s9285_s3 = inlined_call_operand.hbm [shape: f32[184,128], index: 3, kind: input, shape index: {}]   ;;  %s9286_s4 = inlined_call_operand.hbm [shape: f32[2,32], index: 4, kind: output, shape index: {}]  }
   0x1   :  { %10 = vsyncpa [#allocation8], 0 }
   0x2   :  { %11 = vsyncpa [#allocation11], 0 }
   0x3   :  { %12 = vsyncpa [#allocation6], 0  ;;  %s8063_s15 = smov [#allocation7]   ;;  %s7945_s19 = scalar_lea.hbm %s9283_s1, 1024 }
   0x4   :  { %s30_s16 = sshll.u32 %s8063_s15, 4  ;;  %p7946_p0 = scmp.ne.s32.totalorder %s9283_s1, %s7945_s19  ;;  %s31_s16 = int_to_ptr.vmem [resolvable:$true] %s30_s16 }
   0x5   :  { %p7949_p1 = scmp.lt.u32.totalorder %s7945_s19, %s9283_s1 }
   0x7   :  { %p7951_p2 = pnand %p7949_p1, %p7946_p0 }
   0x9   :  { %7954 = shalt.err (!%p7951_p2)
}
   0xa   :  { %s7955_s24 = scalar_lea.vmem %s31_s16, 1024  ;;  %p7960_p4 = scmp.lt.s32.totalorder %s31_s16, %s31_s16 }
   0xb   :  { %p7956_p3 = scmp.ne.s32.totalorder %s31_s16, %s7955_s24  ;;  %p7961_p5 = scmp.lt.s32.totalorder %s7955_s24, %s7955_s24 }
   0xd   :  { %p7962_p6 = por %p7961_p5, %p7960_p4 }
   0xf   :  { %p7963_p7 = pnand %p7962_p6, %p7956_p3 }
  0x11   :  { %7966 = shalt.err (!%p7963_p7)
}
  0x12   :  { %s8064_s25 = smov 128   ;;  %s8065_s26 = smov 8  }
  0x13   :  { %36 = dma.hbm_to_vmem [thread:$0]  %s9283_s1, 1024, %s31_s16, [#allocation8], %s8064_s25, %s8064_s25, %s8065_s26  }
  0x14   :  { %s8066_s29 = smov [#allocation4]   ;;  %s7967_s7 = scalar_lea.hbm %s9282_s0, 256 }
  0x15   :  { %s18_s30 = sshll.u32 %s8066_s29, 4  ;;  %p7968_p8 = scmp.ne.s32.totalorder %s9282_s0, %s7967_s7  ;;  %s19_s30 = int_to_ptr.vmem [resolvable:$true] %s18_s30 }
  0x16   :  { %p7971_p9 = scmp.lt.u32.totalorder %s7967_s7, %s9282_s0 }
  0x18   :  { %p7973_p10 = pnand %p7971_p9, %p7968_p8 }
  0x1a   :  { %7976 = shalt.err (!%p7973_p10)
}
  0x1b   :  { %s7977_s12 = scalar_lea.vmem %s19_s30, 256  ;;  %p7982_p12 = scmp.lt.s32.totalorder %s19_s30, %s19_s30 }
  0x1c   :  { %p7978_p11 = scmp.ne.s32.totalorder %s19_s30, %s7977_s12  ;;  %p7983_p13 = scmp.lt.s32.totalorder %s7977_s12, %s7977_s12 }
  0x1e   :  { %p7984_p0 = por %p7983_p13, %p7982_p12 }
  0x20   :  { %p7985_p1 = pnand %p7984_p0, %p7978_p11 }
  0x22   :  { %7988 = shalt.err (!%p7985_p1)
}
  0x23   :  { %s8067_s1 = smov 32   ;;  %s8068_s13 = smov 2  }
  0x24   :  { %24 = dma.hbm_to_vmem [thread:$0]  %s9282_s0, 256, %s19_s30, [#allocation5], %s8067_s1, %s8067_s1, %s8068_s13  }
  0x25   :  { %s8069_s16 = smov [#allocation9]   ;;  %s8070_s18 = smov [#allocation10]  }
  0x26   :  { %s42_s17 = sshll.u32 %s8069_s16, 4  ;;  %s54_s19 = sshll.u32 %s8070_s18, 4  ;;  %s43_s17 = int_to_ptr.vmem [resolvable:$true] %s42_s17  ;;  %s8132_s19 = int_to_ptr.vmem [resolvable:$true] %s54_s19 }
  0x27   :  { %s7989_s22 = scalar_lea.hbm %s9284_s2, 1024 }
  0x28   :  { %p7990_p2 = scmp.ne.s32.totalorder %s9284_s2, %s7989_s22  ;;  %p7993_p3 = scmp.lt.u32.totalorder %s7989_s22, %s9284_s2 }
  0x2a   :  { %p7995_p4 = pnand %p7993_p3, %p7990_p2 }
  0x2c   :  { %7998 = shalt.err (!%p7995_p4)
}
  0x2d   :  { %s7999_s0 = scalar_lea.vmem %s43_s17, 1024  ;;  %p8004_p6 = scmp.lt.s32.totalorder %s43_s17, %s43_s17 }
  0x2e   :  { %p8000_p5 = scmp.ne.s32.totalorder %s43_s17, %s7999_s0  ;;  %p8005_p7 = scmp.lt.s32.totalorder %s7999_s0, %s7999_s0 }
  0x30   :  { %p8006_p8 = por %p8005_p7, %p8004_p6 }
  0x32   :  { %p8007_p9 = pnand %p8006_p8, %p8000_p5 }
  0x34   :  { %8010 = shalt.err (!%p8007_p9)
}
  0x35   :  { %48 = dma.hbm_to_vmem [thread:$0]  %s9284_s2, 1024, %s43_s17, [#allocation8], %s8064_s25, %s8064_s25, %s8065_s26  }
  0x36   :  { %s8011_s7 = scalar_lea.hbm %s9285_s3, 2944 }
  0x37   :  { %p8012_p10 = scmp.ne.s32.totalorder %s9285_s3, %s8011_s7  ;;  %p8015_p11 = scmp.lt.u32.totalorder %s8011_s7, %s9285_s3 }
  0x39   :  { %p8017_p12 = pnand %p8015_p11, %p8012_p10 }
  0x3b   :  { %8020 = shalt.err (!%p8017_p12)
}
  0x3c   :  { %s8021_s12 = scalar_lea.vmem %s8132_s19, 2944  ;;  %p8026_p0 = scmp.lt.s32.totalorder %s8132_s19, %s8132_s19 }
  0x3d   :  { %p8022_p13 = scmp.ne.s32.totalorder %s8132_s19, %s8021_s12  ;;  %p8027_p1 = scmp.lt.s32.totalorder %s8021_s12, %s8021_s12 }
  0x3f   :  { %p8028_p2 = por %p8027_p1, %p8026_p0 }
  0x41   :  { %p8029_p3 = pnand %p8028_p2, %p8022_p13 }
  0x43   :  { %8032 = shalt.err (!%p8029_p3)
}
  0x44   :  { %60 = dma.hbm_to_vmem [thread:$0]  %s9285_s3, 2944, %s8132_s19, [#allocation11], %s8064_s25, %s8064_s25, %s8065_s26  }
  0x45   :  { %8055 = dma.done.wait [#allocation5], 256  }
  0x46   :  { %8056 = vsyncadd [#allocation5], 4294967040 }
  0x47   :  { %8057 = dma.done.wait [#allocation8], 2048  }
  0x48   :  { %8058 = vsyncadd [#allocation8], 4294965248 }
  0x49   :  { %8059 = dma.done.wait [#allocation11], 2944  }
  0x4a   :  { %8060 = vsyncadd [#allocation11], 4294964352  ;;  %v109_v0 = vlaneseq  ;;  %v8071_v1 = vmov 1983009808   ;;  %v102_v5 = vld [vmem:[#allocation7] sm:$0xff]  ;;  %v103_v6 = vld [vmem:[#allocation7 + $0x8] sm:$0xff] }
  0x4b   :  { %v124_v2 = vunpack.c.l.s4 %v8071_v1  ;;  %v94_v7 = vld [vmem:[#allocation4] sm:$0x3]  ;;  %v7078_v9 = vpack.c.bf16 %v103_v6, %v102_v5  ;;  %v95_v10 = vld [vmem:[#allocation4 + $0x2] sm:$0x3]  ;;  %v96_v11 = vld [vmem:[#allocation4 + $0x4] sm:$0x3] }
  0x4c   :  { %v8169_v3 = vshrl.u32 %v109_v0, 7  ;;  %v97_v12 = vld [vmem:[#allocation4 + $0x6] sm:$0x3]  ;;  %v121_v13 = vcombine.low %v94_v7, %v95_v10  ;;  %v98_v15 = vld [vmem:[#allocation4 + $0x8] sm:$0x3]  ;;  %v104_v23 = vld [vmem:[#allocation9] sm:$0xff] }
  0x4d   :  { %v125_v4 = vunpack.c.0.s8 %v124_v2  ;;  %v122_v14 = vcombine.low %v96_v11, %v97_v12  ;;  %v99_v16 = vld [vmem:[#allocation4 + $0xa] sm:$0x3]  ;;  %v100_v17 = vld [vmem:[#allocation4 + $0xc] sm:$0x3]  ;;  %7079 = vmatprep.subr.bf16.mxu0 %v7078_v9  ;;  %v101_v18 = vld [vmem:[#allocation4 + $0xe] sm:$0x3] }
  0x4e   :  { %v138_v19 = vcombine.low %v98_v15, %v99_v16  ;;  %7081 = vmatpush3.bf16.msra.mxu0 %v7078_v9  ;;  %v139_v22 = vcombine.low %v100_v17, %v101_v18  ;;  %v105_v24 = vld [vmem:[#allocation9 + $0x8] sm:$0xff]  ;;  %v73_v25 = vld [vmem:[#allocation10 + $0x10] sm:$0xff]  ;;  %vm155_vm0 = vcmask 130048   ;;  %v8072_v26 = vmov 0.0|0.0   ;;  %v74_v28 = vld [vmem:[#allocation10 + $0x18] sm:$0xff]  ;;  %s8075_s3 = smov 64  }
  0x4f   :  { %v8172_v8 = vsub.s32 %v125_v4, %v8169_v3  ;;  %7114 = vmatprep.subr.bf16.mxu0 %v8072_v26  ;;  %v75_v29 = vld [vmem:[#allocation10 + $0x20] sm:$0xff]  ;;  %v76_v30 = vld [vmem:[#allocation10 + $0x28] sm:$0xff]  ;;  %v8179_v33 = vpack.c.bf16 %v74_v28, %v73_v25  ;;  %v8183_v35 = vpack.c.bf16 %v105_v24, %v104_v23  ;;  %v77_v36 = vld [vmem:[#allocation10 + $0x30] sm:$0xff]  ;;  %vm8073_vm1 = vmmov 0   ;;  %s8076_s25 = smov 96   ;;  %s8077_s26 = smov [#allocation12]  }
  0x50   :  { %v8181_v34 = vpack.c.bf16 %v76_v30, %v75_v29  ;;  %v78_v37 = vld [vmem:[#allocation10 + $0x38] sm:$0xff]  ;;  %v106_v39 = vld [vmem:[#allocation9 + $0x10] sm:$0xff]  ;;  %v8074_v43 = vmov 0.0   ;;  %v79_v44 = vld [vmem:[#allocation10 + $0x40] sm:$0xff]  ;;  %v8244_v59 = vsub.s32 0, %v8169_v3  ;;  %v432_v0 = vsub.s32 3, %v8169_v3 }
  0x51   :  { %v129_v20 = vrot.slane %v121_v13, %v8172_v8  ;;  %v136_v21 = vrot.slane %v122_v14, %v8172_v8  ;;  %v146_v27 = vrot.slane %v138_v19, %v8172_v8  ;;  %v153_v32 = vrot.slane %v139_v22, %v8172_v8  ;;  %v107_v40 = vld [vmem:[#allocation9 + $0x18] sm:$0xff]  ;;  %7083 = vmatprep.subr.bf16.mxu1 %v8179_v33  ;;  %v80_v45 = vld [vmem:[#allocation10 + $0x48] sm:$0xff]  ;;  %v81_v47 = vld [vmem:[#allocation10 + $0x50] sm:$0xff]  ;;  %s5529_s14 = sshll.u32 %s8077_s26, 4  ;;  %s5530_s14 = int_to_ptr.vmem [resolvable:$true] %s5529_s14 }
  0x52   :  { %7085 = vmatpush3.bf16.msra.mxu1 %v8179_v33  ;;  %v8190_v41 = vpack.c.bf16 %v78_v37, %v77_v36  ;;  %v8193_v42 = vpack.c.bf16 %v107_v40, %v106_v39  ;;  %v8200_v46 = vpack.c.bf16 %v80_v45, %v79_v44  ;;  %v82_v48 = vld [vmem:[#allocation10 + $0x58] sm:$0xff]  ;;  %v83_v50 = vld [vmem:[#allocation10 + $0x60] sm:$0xff]  ;;  %v84_v51 = vld [vmem:[#allocation10 + $0x68] sm:$0xff]  ;;  %vm512_vm2 = vcmask 1041408   ;;  %s8033_s15 = scalar_lea.vmem %s5530_s14, 32  ;;  %p8038_p5 = scmp.lt.s32.totalorder %s5530_s14, %s5530_s14 }
  0x53   :  { %v137_v31 = vcombine.low %v129_v20, %v136_v21  ;;  %v154_v38 = vcombine.low %v146_v27, %v153_v32  ;;  %7087 = vmatprep.subr.bf16.mxu1 %v8181_v34  ;;  %v8207_v49 = vpack.c.bf16 %v82_v48, %v81_v47  ;;  %v8215_v52 = vpack.c.bf16 %v84_v51, %v83_v50  ;;  %v85_v53 = vld [vmem:[#allocation10 + $0x70] sm:$0xff]  ;;  %v86_v54 = vld [vmem:[#allocation10 + $0x78] sm:$0xff]  ;;  %v87_v56 = vld [vmem:[#allocation10 + $0x80] sm:$0xff]  ;;  %p8034_p4 = scmp.ne.s32.totalorder %s5530_s14, %s8033_s15  ;;  %p8039_p6 = scmp.lt.s32.totalorder %s8033_s15, %s8033_s15 }
  0x54   :  { %v8221_v55 = vpack.c.bf16 %v86_v54, %v85_v53  ;;  %v88_v57 = vld [vmem:[#allocation10 + $0x88] sm:$0xff]  ;;  %v8246_v60 = vld [vmem:[#allocation10] sm:$0xff]  ;;  %v8276_v28 = vsub.s32 1, %v8169_v3  ;;  %v342_v30 = vsub.s32 2, %v8169_v3  ;;  %v93_v47 = vld [vmem:[#allocation10 + $0xb0] sm:$0xff]  ;;  %v598_v51 = vsub.s32 4, %v8169_v3 }
  0x55   :  { %6076 = vmatprep.mubr.msk.f32.mxu0 %vm155_vm0, %v137_v31  ;;  %v8236_v58 = vpack.c.bf16 %v88_v57, %v87_v56  ;;  %v112_v61 = vrot.slane %v8246_v60, %v8244_v59  ;;  %v8254_v5 = vrot.slane %v8246_v60, %v432_v0  ;;  %v8287_v54 = vrot.slane %v93_v47, %v8244_v59  ;;  %p8040_p7 = por %p8039_p6, %p8038_p5 }
  0x56   :  { %6077 = vmatmul.mubr.msk.f32.vlgmr.msra.gmra.mrb[0].mxu0 %vm155_vm0, %v154_v38  ;;  %7089 = vmatpush3.bf16.msra.mxu1 %v8181_v34  ;;  %v337_v36 = vrot.slane %v8246_v60, %v8276_v28  ;;  %v343_v45 = vrot.slane %v8246_v60, %v342_v30  ;;  %v8290_v57 = vrot.slane %v93_v47, %v8276_v28  ;;  %vm434_vm3 = vcmask 261120  }
  0x57   :  { %7116 = vmatpush3.bf16.msra.mxu0 %v8183_v35  ;;  %6125 = vmatprep.mubr.msk.f32.mxu0 %vm8073_vm1, %v8074_v43  ;;  %vm752_vm4 = vcmask 123904   ;;  %vm755_vm5 = vcmask 255104   ;;  %vm5521_vm6 = vcmask 254976   ;;  %p8041_p8 = pnand %p8040_p7, %p8034_p4 }
  0x58   :  { %7117 = vmatprep.subr.bf16.mxu0 %v8072_v26  ;;  %7091 = vmatprep.subr.bf16.mxu1 %v8190_v41 }
  0x5a   :  { %7093 = vmatpush3.bf16.msra.mxu1 %v8190_v41 }
  0x5b   :  { %7119 = vmatpush3.bf16.msra.mxu0 %v8193_v42  ;;  %7095 = vmatprep.subr.bf16.mxu1 %v8200_v46 }
  0x5c   :  { %7120 = vmatprep.subr.bf16.mxu0 %v8072_v26 }
  0x5e   :  { %6126 = vmatmul.mubr.f32.vlgmr.msra.gmra.mrb[2].mxu0 %v8074_v43  ;;  %7097 = vmatpush3.bf16.msra.mxu1 %v8200_v46 }
  0x5f   :  { %7122 = vmatpush3.bf16.msra.mxu0 %v8179_v33  ;;  %6160 = vmatprep.mubr.msk.f32.mxu0 %vm8073_vm1, %v8074_v43 }
  0x60   :  { %7123 = vmatprep.subr.bf16.mxu0 %v8072_v26  ;;  %7099 = vmatprep.subr.bf16.mxu1 %v8207_v49 }
  0x62   :  { %7101 = vmatpush3.bf16.msra.mxu1 %v8207_v49 }
  0x63   :  { %7125 = vmatpush3.bf16.msra.mxu0 %v8181_v34  ;;  %7103 = vmatprep.subr.bf16.mxu1 %v8215_v52 }
  0x64   :  { %7126 = vmatprep.subr.bf16.mxu0 %v8072_v26 }
  0x66   :  { %7105 = vmatpush3.bf16.msra.mxu1 %v8215_v52 }
  0x67   :  { %7128 = vmatpush3.bf16.msra.mxu0 %v8190_v41  ;;  %7107 = vmatprep.subr.bf16.mxu1 %v8221_v55 }
  0x68   :  { %7129 = vmatprep.subr.bf16.mxu0 %v8072_v26 }
  0x6a   :  { %7109 = vmatpush3.bf16.msra.mxu1 %v8221_v55 }
  0x6b   :  { %7131 = vmatpush3.bf16.msra.mxu0 %v8200_v46  ;;  %7111 = vmatprep.subr.bf16.mxu1 %v8236_v58 }
  0x6c   :  { %7132 = vmatprep.subr.bf16.mxu0 %v8072_v26 }
  0x6e   :  { %7113 = vmatpush3.bf16.msra.mxu1 %v8236_v58 }
  0x6f   :  { %7134 = vmatpush3.bf16.msra.mxu0 %v8207_v49  ;;  %7150 = vmatprep.subr.bf16.mxu1 %v8072_v26 }
  0x70   :  { %7135 = vmatprep.subr.bf16.mxu0 %v8072_v26 }
  0x73   :  { %7137 = vmatpush3.bf16.msra.mxu0 %v8215_v52 }
  0x74   :  { %7138 = vmatprep.subr.bf16.mxu0 %v8072_v26 }
  0x77   :  { %7140 = vmatpush3.bf16.msra.mxu0 %v8221_v55 }
  0x78   :  { %7141 = vmatprep.subr.bf16.mxu0 %v8072_v26 }
  0x7b   :  { %7143 = vmatpush3.bf16.msra.mxu0 %v8236_v58 }
  0x7c   :  { %7144 = vmatprep.subr.bf16.mxu0 %v8072_v26 }
 0x129   :  { %v6078_v62 = vpop.f32.mrb[0].mxu0 }
 0x12a   :  { %v226_v63 = vpop.f32.mrb[1].mxu0  ;;  %v232_v2 = vadd.f32 %v6078_v62, %v112_v61 }
 0x12b   :  { %v227_v1 = vadd.f32 %v226_v63, %v112_v61 }
 0x12c   :  { %v236_v6 = vmul.f32 %v232_v2, %v232_v2 }
 0x12d   :  { %6111 = vmatprep.mubr.f32.mxu1 %v227_v1  ;;  %v235_v4 = vmul.f32 %v227_v1, %v227_v1 }
 0x12e   :  { %6112 = vmatmul.mubr.f32.vlgmr.msra.gmra.mrb[0].mxu1 %v232_v2 }
 0x12f   :  { %6114 = vmatprep.mubr.f32.mxu1 %v235_v4  ;;  %7152 = vmatpush3.bf16.msra.mxu1 %v8183_v35 }
 0x130   :  { %7153 = vmatprep.subr.bf16.mxu1 %v8072_v26 }
 0x131   :  { %v504_v7 = vpop.f32.mrb[2].mxu0 }
 0x132   :  { %v8259_v9 = vadd.f32 %v504_v7, %v8254_v5  ;;  %6115 = vmatmul.mubr.f32.gmra.mrb[2].mxu1 %v236_v6  ;;  %v6127_v10 = vpop.f32.mrb[3].mxu0 }
 0x133   :  { %7155 = vmatpush3.bf16.msra.mxu1 %v8193_v42  ;;  %6182 = vmatprep.mubr.msk.f32.mxu1 %vm8073_vm1, %v8074_v43 }
 0x134   :  { %v508_v11 = vmul.f32 %v8259_v9, %v8259_v9  ;;  %7180 = vmatprep.subr.bf16.mxu1 %v8072_v26 }
 0x136   :  { %v510_v12 = vrot.slane %v508_v11, 6 }
 0x138   :  { %v513_v13 = vsel %vm512_vm2, %v8259_v9, %v510_v12 }
 0x139   :  { %6161 = vmatmul.mubr.f32.vlgmr.msra.gmra.mrb[4].mxu0 %v513_v13 }
 0x13a   :  { %6171 = vmatprep.mubr.msk.f32.mxu0 %vm8073_vm1, %v8074_v43 }
 0x201   :  { %v6113_v14 = vpop.f32.mrb[0].mxu1 }
 0x202   :  { %v303_v15 = vpop.f32.mrb[1].mxu1  ;;  %v323_v16 = vmul.f32 %v6113_v14, %v6113_v14  ;;  %v331_v32 = vsub.f32 %v232_v2, %v6113_v14  ;;  %v603_v2 = vsub.s32 5, %v8169_v3 }
 0x203   :  { %v322_v17 = vmul.f32 %v303_v15, %v303_v15  ;;  %v330_v39 = vsub.f32 %v227_v1, %v303_v15  ;;  %v8296_v1 = vrot.slane %v8246_v60, %v598_v51 }
 0x205   :  { %v6116_v18 = vpop.f32.mrb[2].mxu1 }
 0x206   :  { %v325_v19 = vsub.f32 %v6116_v18, %v323_v16  ;;  %v313_v20 = vpop.f32.mrb[3].mxu1 }
 0x207   :  { %v324_v21 = vsub.f32 %v313_v20, %v322_v17 }
 0x208   :  { %v327_v22 = vadd.f32 1e-05, %v325_v19 }
 0x209   :  { %v326_v23 = vadd.f32 1e-05, %v324_v21 }
 0x20a   :  { %7745 = vrsqrt.f32 %v327_v22 }
 0x20b   :  { %7747 = vrsqrt.f32 %v326_v23 }
 0x20c   :  { %v8271_v24 = vpop.f32.mrb[4].mxu0 }
 0x20d   :  { %v584_v25 = vmul.f32 %v8271_v24, %v8271_v24  ;;  %v6162_v27 = vpop.f32.mrb[5].mxu0 }
 0x20f   :  { %v586_v29 = vrot.slane %v584_v25, 6 }
 0x211   :  { %v588_v31 = vsub.f32 %v8271_v24, %v586_v29 }
 0x213   :  { %v589_v37 = vadd.f32 1e-05, %v588_v31 }
 0x214   :  { %v7746_v38 = vpop.eup %7745 }
 0x215   :  { %v7748_v40 = vpop.eup %7747  ;;  %v333_v44 = vmul.f32 %v7746_v38, %v331_v32  ;;  %7749 = vrsqrt.f32 %v589_v37 }
 0x216   :  { %v332_v48 = vmul.f32 %v7748_v40, %v330_v39 }
 0x217   :  { %v339_v50 = vmul.f32 %v337_v36, %v333_v44 }
 0x218   :  { %v338_v53 = vmul.f32 %v337_v36, %v332_v48 }
 0x219   :  { %v345_v56 = vadd.f32 %v343_v45, %v339_v50 }
 0x21a   :  { %v344_v61 = vadd.f32 %v343_v45, %v338_v53 }
 0x21b   :  { %v365_v62 = vcombine.high %v345_v56, %v345_v56  ;;  %v372_v63 = vrot.slane %v345_v56, %v8172_v8  ;;  %v591_v56 = vsub.f32 %v8259_v9, %v8271_v24 }
 0x21c   :  { %v348_v4 = vcombine.high %v344_v61, %v344_v61  ;;  %v355_v6 = vrot.slane %v344_v61, %v8172_v8 }
 0x21d   :  { %v379_v7 = vrot.slane %v365_v62, %v8172_v8  ;;  %v380_v10 = vcombine.high %v372_v63, %v372_v63  ;;  %v398_v11 = vmul.f32 %v8287_v54, %v372_v63  ;;  %v409_v12 = vmul.f32 %v8290_v57, %v372_v63 }
 0x21e   :  { %v362_v13 = vrot.slane %v348_v4, %v8172_v8  ;;  %v363_v14 = vcombine.high %v355_v6, %v355_v6  ;;  %v394_v15 = vmul.f32 %v8287_v54, %v355_v6  ;;  %v413_v16 = vmul.f32 %v8290_v57, %v355_v6 }
 0x21f   :  { %v381_v17 = vcombine.high %v379_v7, %v379_v7  ;;  %v399_v18 = vmul.f32 %v8287_v54, %v380_v10  ;;  %v400_v19 = vmul.f32 %v8287_v54, %v379_v7  ;;  %v407_v20 = vmul.f32 %v8290_v57, %v379_v7  ;;  %v7750_v27 = vpop.eup %7749 }
 0x220   :  { %v408_v21 = vmul.f32 %v8290_v57, %v380_v10  ;;  %v364_v22 = vcombine.high %v362_v13, %v362_v13  ;;  %v395_v23 = vmul.f32 %v8287_v54, %v363_v14  ;;  %v396_v25 = vmul.f32 %v8287_v54, %v362_v13 }
 0x221   :  { %v401_v29 = vmul.f32 %v8287_v54, %v381_v17  ;;  %v406_v31 = vmul.f32 %v8290_v57, %v381_v17  ;;  %v411_v32 = vmul.f32 %v8290_v57, %v362_v13  ;;  %v412_v36 = vmul.f32 %v8290_v57, %v363_v14  ;;  %v89_v13 = vld [vmem:[#allocation10 + $0x90] sm:$0xff]  ;;  %v90_v14 = vld [vmem:[#allocation10 + $0x98] sm:$0xff]  ;;  %v92_v17 = vld [vmem:[#allocation10 + $0xa8] sm:$0xff] }
 0x222   :  { %v397_v37 = vmul.f32 %v8287_v54, %v364_v22  ;;  %v410_v38 = vmul.f32 %v8290_v57, %v364_v22  ;;  %v415_v39 = vadd.f32 %v407_v20, %v395_v23  ;;  %v416_v40 = vadd.f32 %v408_v21, %v396_v25 }
 0x223   :  { %v414_v44 = vadd.f32 %v406_v31, %v394_v15  ;;  %v419_v45 = vadd.f32 %v411_v32, %v399_v18  ;;  %v420_v47 = vadd.f32 %v412_v36, %v400_v19  ;;  %v421_v48 = vadd.f32 %v413_v16, %v401_v29  ;;  %v91_v15 = vld [vmem:[#allocation10 + $0xa0] sm:$0xff] }
 0x224   :  { %v417_v50 = vadd.f32 %v409_v12, %v397_v37  ;;  %v418_v53 = vadd.f32 %v410_v38, %v398_v11  ;;  %423 = vst [vmem:[#allocation2 + $0x2] sm:$0x3] %v415_v39  ;;  %424 = vst [vmem:[#allocation2 + $0x4] sm:$0x3] %v416_v40  ;;  %v593_v61 = vrot.slane %v7750_v27, 2  ;;  %v8323_v63 = vrot.slane %v8246_v60, %v603_v2 }
 0x225   :  { %422 = vst [vmem:[#allocation2] sm:$0x3] %v414_v44  ;;  %427 = vst [vmem:[#allocation2 + $0xa] sm:$0x3] %v419_v45  ;;  %v8328_v16 = vpack.c.bf16 %v90_v14, %v89_v13  ;;  %v8333_v20 = vpack.c.bf16 %v92_v17, %v91_v15  ;;  %v726_v36 = vsub.s32 6, %v8169_v3 }
 0x226   :  { %428 = vst [vmem:[#allocation2 + $0xc] sm:$0x3] %v420_v47  ;;  %429 = vst [vmem:[#allocation2 + $0xe] sm:$0x3] %v421_v48  ;;  %v595_v62 = vmul.f32 %v593_v61, %v591_v56  ;;  %v735_v48 = vsub.s32 7, %v8169_v3 }
 0x227   :  { %425 = vst [vmem:[#allocation2 + $0x6] sm:$0x3] %v417_v50  ;;  %426 = vst [vmem:[#allocation2 + $0x8] sm:$0x3] %v418_v53  ;;  %7146 = vmatpush3.bf16.msra.mxu0 %v8328_v16  ;;  %v727_v40 = vrot.slane %v8246_v60, %v726_v36 }
 0x228   :  { %v600_v4 = vmul.f32 %v8296_v1, %v595_v62  ;;  %7147 = vmatprep.subr.bf16.mxu0 %v8072_v26  ;;  %v736_v56 = vrot.slane %v8246_v60, %v735_v48 }
 0x22a   :  { %v605_v6 = vadd.f32 %v8323_v63, %v600_v4 }
 0x22b   :  { %7149 = vmatpush3.bf16.msra.mxu0 %v8333_v20 }
 0x22c   :  { %v606_v7 = vld [vmem:[#allocation2] sm:$0x3]  ;;  %7156 = vmatprep.subr.bf16.mxu0 %v8072_v26 }
 0x22d   :  { %v607_v10 = vadd.f32 %v606_v7, %v605_v6 }
 0x22f   :  { %7751 = vtanh.f32 %v607_v10  ;;  %v5542_v24 = vmul.f32 -1.442695, %v607_v10 }
 0x231   :  { %7753 = vpow2.f32 %v5542_v24 }
 0x239   :  { %v7752_v9 = vpop.eup %7751 }
 0x23a   :  { %617 = vrot.lane.b32.xlu0 %v7752_v9, %s8075_s3 }
 0x23b   :  { %v7754_v11 = vpop.eup %7753 }
 0x23c   :  { %v611_v12 = vadd.f32 1.0, %v7754_v11 }
 0x23e   :  { %7755 = vrcp.f32 %v611_v12 }
 0x248   :  { %v8330_v18 = vpop.eup %7755 }
 0x249   :  { %v615_v22 = vmul.f32 0.0, %v8330_v18 }
 0x2ac   :  { %v618_v19 = vpop.permute.xlu0 %617 }
 0x2ad   :  { %v620_v21 = vmul.f32 %v8330_v18, %v618_v19 }
 0x2af   :  { %622 = vrot.lane.b32.xlu0 %v620_v21, %s8067_s1 }
 0x321   :  { %v623_v23 = vpop.permute.xlu0 %622 }
 0x322   :  { %v8341_v25 = vadd.f32 %v623_v23, %v615_v22 }
 0x324   :  { %v626_v27 = vmul.f32 %v8341_v25, %v8341_v25 }
 0x326   :  { %v628_v29 = vrot.slane %v626_v27, 6 }
 0x328   :  { %v630_v31 = vsel %vm512_vm2, %v8341_v25, %v628_v29 }
 0x329   :  { %632 = vrot.lane.b32.xlu1 %v630_v31, %s8076_s25 }
 0x39b   :  { %v633_v32 = vpop.permute.xlu1 %632 }
 0x39c   :  { %6172 = vmatmul.mubr.msk.f32.vlgmr.msra.gmra.mrb[6].mxu0 %vm434_vm3, %v633_v32 }
 0x39d   :  { %7158 = vmatpush3.bf16.msra.mxu0 %v8179_v33  ;;  %6217 = vmatprep.mubr.msk.f32.mxu0 %vm8073_vm1, %v8074_v43 }
 0x39e   :  { %7159 = vmatprep.subr.bf16.mxu0 %v8072_v26 }
 0x3a1   :  { %7161 = vmatpush3.bf16.msra.mxu0 %v8181_v34 }
 0x3a2   :  { %7162 = vmatprep.subr.bf16.mxu0 %v8072_v26 }
 0x3a5   :  { %7164 = vmatpush3.bf16.msra.mxu0 %v8190_v41 }
 0x3a6   :  { %7165 = vmatprep.subr.bf16.mxu0 %v8072_v26 }
 0x3a9   :  { %7167 = vmatpush3.bf16.msra.mxu0 %v8200_v46 }
 0x3aa   :  { %7168 = vmatprep.subr.bf16.mxu0 %v8072_v26 }
 0x3ad   :  { %7170 = vmatpush3.bf16.msra.mxu0 %v8207_v49 }
 0x3ae   :  { %7171 = vmatprep.subr.bf16.mxu0 %v8072_v26 }
 0x3b1   :  { %7173 = vmatpush3.bf16.msra.mxu0 %v8215_v52 }
 0x3b2   :  { %7174 = vmatprep.subr.bf16.mxu0 %v8072_v26 }
 0x3b5   :  { %7176 = vmatpush3.bf16.msra.mxu0 %v8221_v55 }
 0x3b6   :  { %7177 = vmatprep.subr.bf16.mxu0 %v8072_v26 }
 0x3b9   :  { %7179 = vmatpush3.bf16.msra.mxu0 %v8236_v58 }
 0x3ba   :  { %7216 = vmatprep.subr.bf16.mxu0 %v8072_v26 }
 0x46f   :  { %v702_v37 = vpop.f32.mrb[6].mxu0 }
 0x470   :  { %v706_v38 = vmul.f32 %v702_v37, %v702_v37  ;;  %714 = vrot.lane.b32.xlu1 %v702_v37, %s8067_s1  ;;  %v6173_v39 = vpop.f32.mrb[7].mxu0 }
 0x472   :  { %v708_v44 = vrot.slane %v706_v38, 6 }
 0x474   :  { %v710_v45 = vsub.f32 %v702_v37, %v708_v44  ;;  %729 = vrot.lane.b32.xlu1 %v727_v40, %s8067_s1 }
 0x476   :  { %v711_v47 = vadd.f32 1e-05, %v710_v45 }
 0x478   :  { %7757 = vrsqrt.f32 %v711_v47  ;;  %v919_v47 = vld [vmem:[#allocation2 + $0x2] sm:$0x3] }
 0x482   :  { %v7758_v50 = vpop.eup %7757 }
 0x483   :  { %v719_v53 = vrot.slane %v7758_v50, 2 }
 0x485   :  { %720 = vrot.lane.b32.xlu0 %v719_v53, %s8067_s1 }
 0x489   :  { %738 = vrot.lane.b32.xlu0 %v736_v56, %s8067_s1 }
 0x4e2   :  { %v715_v61 = vpop.permute.xlu1 %714 }
 0x4e3   :  { %v717_v62 = vsub.f32 %v8341_v25, %v715_v61 }
 0x4e6   :  { %v8380_v6 = vpop.permute.xlu1 %729 }
 0x4f7   :  { %v721_v4 = vpop.permute.xlu0 %720 }
 0x4f8   :  { %v723_v7 = vmul.f32 %v721_v4, %v717_v62 }
 0x4fa   :  { %v732_v10 = vmul.f32 %v8380_v6, %v723_v7 }
 0x4fb   :  { %v8383_v9 = vpop.permute.xlu0 %738 }
 0x4fc   :  { %v741_v24 = vadd.f32 %v8383_v9, %v732_v10 }
 0x4fe   :  { %7759 = vtanh.f32 %v741_v24 }
 0x508   :  { %v7760_v11 = vpop.eup %7759 }
 0x509   :  { %744 = vrot.lane.b32.xlu1 %v7760_v11, %s8075_s3 }
 0x57b   :  { %v745_v60 = vpop.permute.xlu1 %744 }
 0x57c   :  { %v747_v12 = vmul.f32 %v8330_v18, %v745_v60 }
 0x57e   :  { %749 = vrot.lane.b32.xlu0 %v747_v12, %s8067_s1 }
 0x5f0   :  { %v750_v13 = vpop.permute.xlu0 %749 }
 0x5f1   :  { %753 = vst.msk [vmem:[#allocation3] sm:$0x3] %vm752_vm4, %v750_v13  ;;  %6183 = vmatmul.mubr.msk.f32.vlgmr.msra.gmra.mrb[4].mxu1 %vm434_vm3, %v750_v13 }
 0x5f2   :  { %756 = vst.msk [vmem:[#allocation3 + $0xe] sm:$0x3] %vm755_vm5, %v750_v13  ;;  %7182 = vmatpush3.bf16.msra.mxu1 %v8328_v16  ;;  %6228 = vmatprep.mubr.msk.f32.mxu1 %vm8073_vm1, %v8074_v43 }
 0x5f3   :  { %7183 = vmatprep.subr.bf16.mxu1 %v8072_v26 }
 0x5f6   :  { %7185 = vmatpush3.bf16.msra.mxu1 %v8333_v20 }
 0x5f7   :  { %7186 = vmatprep.subr.bf16.mxu1 %v8072_v26 }
 0x6c4   :  { %v825_v14 = vpop.f32.mrb[4].mxu1 }
 0x6c5   :  { %v826_v15 = vadd.f32 %v825_v14, %v8254_v5  ;;  %v6184_v17 = vpop.f32.mrb[5].mxu1 }
 0x6c7   :  { %v829_v18 = vmul.f32 %v826_v15, %v826_v15 }
 0x6c9   :  { %v831_v19 = vrot.slane %v829_v18, 6 }
 0x6cb   :  { %v833_v21 = vsel %vm512_vm2, %v826_v15, %v831_v19 }
 0x6cc   :  { %6218 = vmatmul.mubr.f32.vlgmr.msra.gmra.mrb[8].mxu0 %v833_v21 }
 0x6cd   :  { %7218 = vmatpush3.bf16.msra.mxu0 %v8328_v16  ;;  %6285 = vmatprep.mubr.msk.f32.mxu0 %vm8073_vm1, %v8074_v43 }
 0x6ce   :  { %7219 = vmatprep.subr.bf16.mxu0 %v8072_v26 }
 0x6d1   :  { %7221 = vmatpush3.bf16.msra.mxu0 %v8333_v20 }
 0x6d2   :  { %7222 = vmatprep.subr.bf16.mxu0 %v8072_v26 }
 0x79f   :  { %v900_v22 = vpop.f32.mrb[8].mxu0 }
 0x7a0   :  { %v904_v23 = vmul.f32 %v900_v22, %v900_v22  ;;  %v6219_v27 = vpop.f32.mrb[9].mxu0  ;;  %v911_v38 = vsub.f32 %v826_v15, %v900_v22 }
 0x7a2   :  { %v906_v29 = vrot.slane %v904_v23, 6 }
 0x7a4   :  { %v908_v31 = vsub.f32 %v900_v22, %v906_v29 }
 0x7a6   :  { %v909_v32 = vadd.f32 1e-05, %v908_v31 }
 0x7a8   :  { %7761 = vrsqrt.f32 %v909_v32 }
 0x7b2   :  { %v7762_v37 = vpop.eup %7761 }
 0x7b3   :  { %v913_v39 = vrot.slane %v7762_v37, 2 }
 0x7b5   :  { %v915_v40 = vmul.f32 %v913_v39, %v911_v38 }
 0x7b7   :  { %v916_v44 = vmul.f32 %v915_v40, %v8296_v1 }
 0x7b9   :  { %v917_v45 = vadd.f32 %v916_v44, %v8323_v63 }
 0x7bb   :  { %v920_v50 = vadd.f32 %v919_v47, %v917_v45 }
 0x7bd   :  { %7763 = vtanh.f32 %v920_v50  ;;  %v5545_v56 = vmul.f32 -1.442695, %v920_v50 }
 0x7bf   :  { %7765 = vpow2.f32 %v5545_v56 }
 0x7c7   :  { %v7764_v53 = vpop.eup %7763 }
 0x7c8   :  { %930 = vrot.lane.b32.xlu1 %v7764_v53, %s8075_s3 }
 0x7c9   :  { %v7766_v61 = vpop.eup %7765 }
 0x7ca   :  { %v924_v62 = vadd.f32 1.0, %v7766_v61 }
 0x7cc   :  { %7767 = vrcp.f32 %v924_v62 }
 0x7d6   :  { %v7768_v4 = vpop.eup %7767 }
 0x7d7   :  { %v928_v24 = vmul.f32 %v7768_v4, %v8341_v25 }
 0x83a   :  { %v931_v7 = vpop.permute.xlu1 %930 }
 0x83b   :  { %v933_v10 = vmul.f32 %v7768_v4, %v931_v7 }
 0x83d   :  { %935 = vrot.lane.b32.xlu0 %v933_v10, %s8067_s1 }
 0x8af   :  { %v936_v11 = vpop.permute.xlu0 %935 }
 0x8b0   :  { %v8411_v60 = vadd.f32 %v936_v11, %v928_v24 }
 0x8b2   :  { %v939_v12 = vmul.f32 %v8411_v60, %v8411_v60 }
 0x8b4   :  { %v941_v13 = vrot.slane %v939_v12, 6 }
 0x8b6   :  { %v943_v14 = vsel %vm512_vm2, %v8411_v60, %v941_v13 }
 0x8b7   :  { %945 = vrot.lane.b32.xlu1 %v943_v14, %s8076_s25 }
 0x929   :  { %v946_v15 = vpop.permute.xlu1 %945 }
 0x92a   :  { %6229 = vmatmul.mubr.msk.f32.vlgmr.msra.gmra.mrb[6].mxu1 %vm434_vm3, %v946_v15 }
 0x92b   :  { %7188 = vmatpush3.bf16.msra.mxu1 %v8183_v35  ;;  %6239 = vmatprep.mubr.msk.f32.mxu1 %vm8073_vm1, %v8074_v43 }
 0x92c   :  { %7189 = vmatprep.subr.bf16.mxu1 %v8072_v26 }
 0x92f   :  { %7191 = vmatpush3.bf16.msra.mxu1 %v8193_v42 }
 0x930   :  { %7192 = vmatprep.subr.bf16.mxu1 %v8072_v26 }
 0x9fd   :  { %v1015_v25 = vpop.f32.mrb[6].mxu1 }
 0x9fe   :  { %v1019_v17 = vmul.f32 %v1015_v25, %v1015_v25  ;;  %1027 = vrot.lane.b32.xlu0 %v1015_v25, %s8067_s1  ;;  %v6230_v18 = vpop.f32.mrb[7].mxu1 }
 0xa00   :  { %v1021_v19 = vrot.slane %v1019_v17, 6 }
 0xa02   :  { %v1023_v21 = vsub.f32 %v1015_v25, %v1021_v19 }
 0xa04   :  { %v1024_v22 = vadd.f32 1e-05, %v1023_v21  ;;  %v1215_v21 = vld [vmem:[#allocation2 + $0x4] sm:$0x3] }
 0xa06   :  { %7769 = vrsqrt.f32 %v1024_v22 }
 0xa10   :  { %v7770_v23 = vpop.eup %7769 }
 0xa11   :  { %v1032_v27 = vrot.slane %v7770_v23, 2 }
 0xa13   :  { %1033 = vrot.lane.b32.xlu1 %v1032_v27, %s8067_s1 }
 0xa70   :  { %v1028_v29 = vpop.permute.xlu0 %1027 }
 0xa71   :  { %v1030_v31 = vsub.f32 %v8411_v60, %v1028_v29 }
 0xa85   :  { %v1034_v32 = vpop.permute.xlu1 %1033 }
 0xa86   :  { %v1036_v37 = vmul.f32 %v1034_v32, %v1030_v31 }
 0xa88   :  { %v1037_v38 = vmul.f32 %v1036_v37, %v8380_v6 }
 0xa8a   :  { %v1038_v39 = vadd.f32 %v1037_v38, %v8383_v9 }
 0xa8c   :  { %7771 = vtanh.f32 %v1038_v39 }
 0xa96   :  { %v7772_v40 = vpop.eup %7771 }
 0xa97   :  { %1041 = vrot.lane.b32.xlu0 %v7772_v40, %s8075_s3 }
 0xb09   :  { %v1042_v44 = vpop.permute.xlu0 %1041 }
 0xb0a   :  { %v1044_v45 = vmul.f32 %v7768_v4, %v1042_v44 }
 0xb0c   :  { %1046 = vrot.lane.b32.xlu1 %v1044_v45, %s8067_s1 }
 0xb7e   :  { %v1047_v47 = vpop.permute.xlu1 %1046 }
 0xb7f   :  { %1050 = vst.msk [vmem:[#allocation3 + $0x2] sm:$0x3] %vm752_vm4, %v1047_v47  ;;  %6240 = vmatmul.mubr.msk.f32.vlgmr.msra.gmra.mrb[8].mxu1 %vm434_vm3, %v1047_v47 }
 0xb80   :  { %1052 = vst.msk [vmem:[#allocation3 + $0xc] sm:$0x3] %vm755_vm5, %v1047_v47  ;;  %7194 = vmatpush3.bf16.msra.mxu1 %v8179_v33  ;;  %6274 = vmatprep.mubr.msk.f32.mxu1 %vm8073_vm1, %v8074_v43 }
 0xb81   :  { %7195 = vmatprep.subr.bf16.mxu1 %v8072_v26 }
 0xb84   :  { %7197 = vmatpush3.bf16.msra.mxu1 %v8181_v34 }
 0xb85   :  { %7198 = vmatprep.subr.bf16.mxu1 %v8072_v26 }
 0xb88   :  { %7200 = vmatpush3.bf16.msra.mxu1 %v8190_v41 }
 0xb89   :  { %7201 = vmatprep.subr.bf16.mxu1 %v8072_v26 }
 0xb8c   :  { %7203 = vmatpush3.bf16.msra.mxu1 %v8200_v46 }
 0xb8d   :  { %7204 = vmatprep.subr.bf16.mxu1 %v8072_v26 }
 0xb90   :  { %7206 = vmatpush3.bf16.msra.mxu1 %v8207_v49 }
 0xb91   :  { %7207 = vmatprep.subr.bf16.mxu1 %v8072_v26 }
 0xb94   :  { %7209 = vmatpush3.bf16.msra.mxu1 %v8215_v52 }
 0xb95   :  { %7210 = vmatprep.subr.bf16.mxu1 %v8072_v26 }
 0xb98   :  { %7212 = vmatpush3.bf16.msra.mxu1 %v8221_v55 }
 0xb99   :  { %7213 = vmatprep.subr.bf16.mxu1 %v8072_v26 }
 0xb9c   :  { %7215 = vmatpush3.bf16.msra.mxu1 %v8236_v58 }
 0xb9d   :  { %7252 = vmatprep.subr.bf16.mxu1 %v8072_v26 }
 0xc52   :  { %v1121_v50 = vpop.f32.mrb[8].mxu1 }
 0xc53   :  { %v1122_v53 = vadd.f32 %v1121_v50, %v8254_v5  ;;  %v6241_v56 = vpop.f32.mrb[9].mxu1 }
 0xc55   :  { %v1125_v61 = vmul.f32 %v1122_v53, %v1122_v53 }
 0xc57   :  { %v1127_v62 = vrot.slane %v1125_v61, 6 }
 0xc59   :  { %v1129_v4 = vsel %vm512_vm2, %v1122_v53, %v1127_v62 }
 0xc5a   :  { %6275 = vmatmul.mubr.f32.vlgmr.msra.gmra.mrb[10].mxu1 %v1129_v4 }
 0xc5b   :  { %7254 = vmatpush3.bf16.msra.mxu1 %v8328_v16  ;;  %6342 = vmatprep.mubr.msk.f32.mxu1 %vm8073_vm1, %v8074_v43 }
 0xc5c   :  { %7255 = vmatprep.subr.bf16.mxu1 %v8072_v26 }
 0xc5f   :  { %7257 = vmatpush3.bf16.msra.mxu1 %v8333_v20 }
 0xc60   :  { %7258 = vmatprep.subr.bf16.mxu1 %v8072_v26 }
 0xd2d   :  { %v1196_v7 = vpop.f32.mrb[10].mxu1 }
 0xd2e   :  { %v1200_v10 = vmul.f32 %v1196_v7, %v1196_v7  ;;  %v6276_v24 = vpop.f32.mrb[11].mxu1  ;;  %v1207_v15 = vsub.f32 %v1122_v53, %v1196_v7 }
 0xd30   :  { %v1202_v11 = vrot.slane %v1200_v10, 6 }
 0xd32   :  { %v1204_v12 = vsub.f32 %v1196_v7, %v1202_v11 }
 0xd34   :  { %v1205_v13 = vadd.f32 1e-05, %v1204_v12 }
 0xd36   :  { %7773 = vrsqrt.f32 %v1205_v13 }
 0xd40   :  { %v7774_v14 = vpop.eup %7773 }
 0xd41   :  { %v1209_v25 = vrot.slane %v7774_v14, 2 }
 0xd43   :  { %v1211_v17 = vmul.f32 %v1209_v25, %v1207_v15 }
 0xd45   :  { %v1212_v18 = vmul.f32 %v1211_v17, %v8296_v1 }
 0xd47   :  { %v1213_v19 = vadd.f32 %v1212_v18, %v8323_v63 }
 0xd49   :  { %v1216_v22 = vadd.f32 %v1215_v21, %v1213_v19 }
 0xd4b   :  { %7775 = vtanh.f32 %v1216_v22  ;;  %v5548_v27 = vmul.f32 -1.442695, %v1216_v22 }
 0xd4d   :  { %7777 = vpow2.f32 %v5548_v27 }
 0xd55   :  { %v7776_v23 = vpop.eup %7775 }
 0xd56   :  { %1226 = vrot.lane.b32.xlu0 %v7776_v23, %s8075_s3 }
 0xd57   :  { %v7778_v29 = vpop.eup %7777 }
 0xd58   :  { %v1220_v31 = vadd.f32 1.0, %v7778_v29 }
 0xd5a   :  { %7779 = vrcp.f32 %v1220_v31 }
 0xd64   :  { %v7780_v32 = vpop.eup %7779 }
 0xd65   :  { %v1224_v39 = vmul.f32 %v7780_v32, %v8411_v60 }
 0xdc8   :  { %v1227_v37 = vpop.permute.xlu0 %1226 }
 0xdc9   :  { %v1229_v38 = vmul.f32 %v7780_v32, %v1227_v37 }
 0xdcb   :  { %1231 = vrot.lane.b32.xlu1 %v1229_v38, %s8067_s1 }
 0xe3d   :  { %v1232_v40 = vpop.permute.xlu1 %1231 }
 0xe3e   :  { %v8466_v44 = vadd.f32 %v1232_v40, %v1224_v39 }
 0xe40   :  { %v1235_v45 = vmul.f32 %v8466_v44, %v8466_v44 }
 0xe42   :  { %v1237_v47 = vrot.slane %v1235_v45, 6 }
 0xe44   :  { %v1239_v50 = vsel %vm512_vm2, %v8466_v44, %v1237_v47 }
 0xe45   :  { %1241 = vrot.lane.b32.xlu0 %v1239_v50, %s8076_s25 }
 0xeb7   :  { %v1242_v53 = vpop.permute.xlu0 %1241 }
 0xeb8   :  { %6286 = vmatmul.mubr.msk.f32.vlgmr.msra.gmra.mrb[10].mxu0 %vm434_vm3, %v1242_v53 }
 0xeb9   :  { %7224 = vmatpush3.bf16.msra.mxu0 %v8183_v35  ;;  %6296 = vmatprep.mubr.msk.f32.mxu0 %vm8073_vm1, %v8074_v43 }
 0xeba   :  { %7225 = vmatprep.subr.bf16.mxu0 %v8072_v26 }
 0xebd   :  { %7227 = vmatpush3.bf16.msra.mxu0 %v8193_v42 }
 0xebe   :  { %7228 = vmatprep.subr.bf16.mxu0 %v8072_v26 }
 0xf8b   :  { %v1311_v60 = vpop.f32.mrb[10].mxu0 }
 0xf8c   :  { %v1315_v56 = vmul.f32 %v1311_v60, %v1311_v60  ;;  %1323 = vrot.lane.b32.xlu1 %v1311_v60, %s8067_s1  ;;  %v6287_v61 = vpop.f32.mrb[11].mxu0 }
 0xf8e   :  { %v1317_v62 = vrot.slane %v1315_v56, 6 }
 0xf90   :  { %v1319_v4 = vsub.f32 %v1311_v60, %v1317_v62 }
 0xf92   :  { %v1320_v7 = vadd.f32 1e-05, %v1319_v4  ;;  %v1511_v4 = vld [vmem:[#allocation2 + $0x6] sm:$0x3] }
 0xf94   :  { %7781 = vrsqrt.f32 %v1320_v7 }
 0xf9e   :  { %v7782_v10 = vpop.eup %7781 }
 0xf9f   :  { %v1328_v24 = vrot.slane %v7782_v10, 2 }
 0xfa1   :  { %1329 = vrot.lane.b32.xlu0 %v1328_v24, %s8067_s1 }
 0xffe   :  { %v1324_v11 = vpop.permute.xlu1 %1323 }
 0xfff   :  { %v1326_v12 = vsub.f32 %v8466_v44, %v1324_v11 }
0x1013   :  { %v1330_v13 = vpop.permute.xlu0 %1329 }
0x1014   :  { %v1332_v14 = vmul.f32 %v1330_v13, %v1326_v12 }
0x1016   :  { %v1333_v15 = vmul.f32 %v1332_v14, %v8380_v6 }
0x1018   :  { %v1334_v25 = vadd.f32 %v1333_v15, %v8383_v9 }
0x101a   :  { %7783 = vtanh.f32 %v1334_v25 }
0x1024   :  { %v7784_v17 = vpop.eup %7783 }
0x1025   :  { %1337 = vrot.lane.b32.xlu1 %v7784_v17, %s8075_s3 }
0x1097   :  { %v1338_v18 = vpop.permute.xlu1 %1337 }
0x1098   :  { %v1340_v19 = vmul.f32 %v7780_v32, %v1338_v18 }
0x109a   :  { %1342 = vrot.lane.b32.xlu0 %v1340_v19, %s8067_s1 }
0x110c   :  { %v1343_v21 = vpop.permute.xlu0 %1342 }
0x110d   :  { %1346 = vst.msk [vmem:[#allocation3 + $0x4] sm:$0x3] %vm752_vm4, %v1343_v21  ;;  %6297 = vmatmul.mubr.msk.f32.vlgmr.msra.gmra.mrb[12].mxu0 %vm434_vm3, %v1343_v21 }
0x110e   :  { %1348 = vst.msk [vmem:[#allocation3 + $0xa] sm:$0x3] %vm755_vm5, %v1343_v21  ;;  %7230 = vmatpush3.bf16.msra.mxu0 %v8179_v33  ;;  %6331 = vmatprep.mubr.msk.f32.mxu0 %vm8073_vm1, %v8074_v43 }
0x110f   :  { %7231 = vmatprep.subr.bf16.mxu0 %v8072_v26 }
0x1112   :  { %7233 = vmatpush3.bf16.msra.mxu0 %v8181_v34 }
0x1113   :  { %7234 = vmatprep.subr.bf16.mxu0 %v8072_v26 }
0x1116   :  { %7236 = vmatpush3.bf16.msra.mxu0 %v8190_v41 }
0x1117   :  { %7237 = vmatprep.subr.bf16.mxu0 %v8072_v26 }
0x111a   :  { %7239 = vmatpush3.bf16.msra.mxu0 %v8200_v46 }
0x111b   :  { %7240 = vmatprep.subr.bf16.mxu0 %v8072_v26 }
0x111e   :  { %7242 = vmatpush3.bf16.msra.mxu0 %v8207_v49 }
0x111f   :  { %7243 = vmatprep.subr.bf16.mxu0 %v8072_v26 }
0x1122   :  { %7245 = vmatpush3.bf16.msra.mxu0 %v8215_v52 }
0x1123   :  { %7246 = vmatprep.subr.bf16.mxu0 %v8072_v26 }
0x1126   :  { %7248 = vmatpush3.bf16.msra.mxu0 %v8221_v55 }
0x1127   :  { %7249 = vmatprep.subr.bf16.mxu0 %v8072_v26 }
0x112a   :  { %7251 = vmatpush3.bf16.msra.mxu0 %v8236_v58 }
0x112b   :  { %7288 = vmatprep.subr.bf16.mxu0 %v8072_v26 }
0x11e0   :  { %v1417_v22 = vpop.f32.mrb[12].mxu0 }
0x11e1   :  { %v1418_v23 = vadd.f32 %v1417_v22, %v8254_v5  ;;  %v6298_v27 = vpop.f32.mrb[13].mxu0 }
0x11e3   :  { %v1421_v29 = vmul.f32 %v1418_v23, %v1418_v23 }
0x11e5   :  { %v1423_v31 = vrot.slane %v1421_v29, 6 }
0x11e7   :  { %v1425_v32 = vsel %vm512_vm2, %v1418_v23, %v1423_v31 }
0x11e8   :  { %6332 = vmatmul.mubr.f32.vlgmr.msra.gmra.mrb[14].mxu0 %v1425_v32 }
0x11e9   :  { %7290 = vmatpush3.bf16.msra.mxu0 %v8328_v16  ;;  %6399 = vmatprep.mubr.msk.f32.mxu0 %vm8073_vm1, %v8074_v43 }
0x11ea   :  { %7291 = vmatprep.subr.bf16.mxu0 %v8072_v26 }
0x11ed   :  { %7293 = vmatpush3.bf16.msra.mxu0 %v8333_v20 }
0x11ee   :  { %7294 = vmatprep.subr.bf16.mxu0 %v8072_v26 }
0x12bb   :  { %v1492_v37 = vpop.f32.mrb[14].mxu0 }
0x12bc   :  { %v1496_v38 = vmul.f32 %v1492_v37, %v1492_v37  ;;  %v6333_v39 = vpop.f32.mrb[15].mxu0  ;;  %v1503_v53 = vsub.f32 %v1418_v23, %v1492_v37 }
0x12be   :  { %v1498_v40 = vrot.slane %v1496_v38, 6 }
0x12c0   :  { %v1500_v45 = vsub.f32 %v1492_v37, %v1498_v40 }
0x12c2   :  { %v1501_v47 = vadd.f32 1e-05, %v1500_v45 }
0x12c4   :  { %7785 = vrsqrt.f32 %v1501_v47 }
0x12ce   :  { %v7786_v50 = vpop.eup %7785 }
0x12cf   :  { %v1505_v60 = vrot.slane %v7786_v50, 2 }
0x12d1   :  { %v1507_v56 = vmul.f32 %v1505_v60, %v1503_v53 }
0x12d3   :  { %v1508_v61 = vmul.f32 %v1507_v56, %v8296_v1 }
0x12d5   :  { %v1509_v62 = vadd.f32 %v1508_v61, %v8323_v63 }
0x12d7   :  { %v1512_v7 = vadd.f32 %v1511_v4, %v1509_v62 }
0x12d9   :  { %7787 = vtanh.f32 %v1512_v7  ;;  %v5551_v24 = vmul.f32 -1.442695, %v1512_v7 }
0x12db   :  { %7789 = vpow2.f32 %v5551_v24 }
0x12e3   :  { %v7788_v10 = vpop.eup %7787 }
0x12e4   :  { %1522 = vrot.lane.b32.xlu1 %v7788_v10, %s8075_s3 }
0x12e5   :  { %v7790_v11 = vpop.eup %7789 }
0x12e6   :  { %v1516_v12 = vadd.f32 1.0, %v7790_v11 }
0x12e8   :  { %7791 = vrcp.f32 %v1516_v12 }
0x12f2   :  { %v7792_v13 = vpop.eup %7791 }
0x12f3   :  { %v1520_v25 = vmul.f32 %v7792_v13, %v8466_v44 }
0x1356   :  { %v1523_v14 = vpop.permute.xlu1 %1522 }
0x1357   :  { %v1525_v15 = vmul.f32 %v7792_v13, %v1523_v14 }
0x1359   :  { %1527 = vrot.lane.b32.xlu0 %v1525_v15, %s8067_s1 }
0x13cb   :  { %v1528_v17 = vpop.permute.xlu0 %1527 }
0x13cc   :  { %v8521_v18 = vadd.f32 %v1528_v17, %v1520_v25 }
0x13ce   :  { %v1531_v19 = vmul.f32 %v8521_v18, %v8521_v18 }
0x13d0   :  { %v1533_v21 = vrot.slane %v1531_v19, 6 }
0x13d2   :  { %v1535_v22 = vsel %vm512_vm2, %v8521_v18, %v1533_v21 }
0x13d3   :  { %1537 = vrot.lane.b32.xlu1 %v1535_v22, %s8076_s25 }
0x1445   :  { %v1538_v23 = vpop.permute.xlu1 %1537 }
0x1446   :  { %6343 = vmatmul.mubr.msk.f32.vlgmr.msra.gmra.mrb[12].mxu1 %vm434_vm3, %v1538_v23 }
0x1447   :  { %7260 = vmatpush3.bf16.msra.mxu1 %v8183_v35  ;;  %6353 = vmatprep.mubr.msk.f32.mxu1 %vm8073_vm1, %v8074_v43 }
0x1448   :  { %7261 = vmatprep.subr.bf16.mxu1 %v8072_v26 }
0x144b   :  { %7263 = vmatpush3.bf16.msra.mxu1 %v8193_v42 }
0x144c   :  { %7264 = vmatprep.subr.bf16.mxu1 %v8072_v26 }
0x1519   :  { %v1607_v44 = vpop.f32.mrb[12].mxu1 }
0x151a   :  { %v1611_v27 = vmul.f32 %v1607_v44, %v1607_v44  ;;  %1619 = vrot.lane.b32.xlu0 %v1607_v44, %s8067_s1  ;;  %v6344_v29 = vpop.f32.mrb[13].mxu1 }
0x151c   :  { %v1613_v31 = vrot.slane %v1611_v27, 6 }
0x151e   :  { %v1615_v32 = vsub.f32 %v1607_v44, %v1613_v31 }
0x1520   :  { %v1616_v37 = vadd.f32 1e-05, %v1615_v32  ;;  %v1807_v32 = vld [vmem:[#allocation2 + $0x8] sm:$0x3] }
0x1522   :  { %7793 = vrsqrt.f32 %v1616_v37 }
0x152c   :  { %v7794_v38 = vpop.eup %7793 }
0x152d   :  { %v1624_v39 = vrot.slane %v7794_v38, 2 }
0x152f   :  { %1625 = vrot.lane.b32.xlu1 %v1624_v39, %s8067_s1 }
0x158c   :  { %v1620_v40 = vpop.permute.xlu0 %1619 }
0x158d   :  { %v1622_v45 = vsub.f32 %v8521_v18, %v1620_v40 }
0x15a1   :  { %v1626_v47 = vpop.permute.xlu1 %1625 }
0x15a2   :  { %v1628_v50 = vmul.f32 %v1626_v47, %v1622_v45 }
0x15a4   :  { %v1629_v53 = vmul.f32 %v1628_v50, %v8380_v6 }
0x15a6   :  { %v1630_v60 = vadd.f32 %v1629_v53, %v8383_v9 }
0x15a8   :  { %7795 = vtanh.f32 %v1630_v60 }
0x15b2   :  { %v7796_v56 = vpop.eup %7795 }
0x15b3   :  { %1633 = vrot.lane.b32.xlu0 %v7796_v56, %s8075_s3 }
0x1625   :  { %v1634_v61 = vpop.permute.xlu0 %1633 }
0x1626   :  { %v1636_v62 = vmul.f32 %v7792_v13, %v1634_v61 }
0x1628   :  { %1638 = vrot.lane.b32.xlu1 %v1636_v62, %s8067_s1 }
0x169a   :  { %v1639_v4 = vpop.permute.xlu1 %1638 }
0x169b   :  { %1642 = vst.msk [vmem:[#allocation3 + $0x6] sm:$0x3] %vm752_vm4, %v1639_v4  ;;  %6354 = vmatmul.mubr.msk.f32.vlgmr.msra.gmra.mrb[14].mxu1 %vm434_vm3, %v1639_v4 }
0x169c   :  { %1644 = vst.msk [vmem:[#allocation3 + $0x8] sm:$0x3] %vm755_vm5, %v1639_v4  ;;  %7266 = vmatpush3.bf16.msra.mxu1 %v8179_v33  ;;  %6388 = vmatprep.mubr.msk.f32.mxu1 %vm8073_vm1, %v8074_v43 }
0x169d   :  { %7267 = vmatprep.subr.bf16.mxu1 %v8072_v26 }
0x16a0   :  { %7269 = vmatpush3.bf16.msra.mxu1 %v8181_v34 }
0x16a1   :  { %7270 = vmatprep.subr.bf16.mxu1 %v8072_v26 }
0x16a4   :  { %7272 = vmatpush3.bf16.msra.mxu1 %v8190_v41 }
0x16a5   :  { %7273 = vmatprep.subr.bf16.mxu1 %v8072_v26 }
0x16a8   :  { %7275 = vmatpush3.bf16.msra.mxu1 %v8200_v46 }
0x16a9   :  { %7276 = vmatprep.subr.bf16.mxu1 %v8072_v26 }
0x16ac   :  { %7278 = vmatpush3.bf16.msra.mxu1 %v8207_v49 }
0x16ad   :  { %7279 = vmatprep.subr.bf16.mxu1 %v8072_v26 }
0x16b0   :  { %7281 = vmatpush3.bf16.msra.mxu1 %v8215_v52 }
0x16b1   :  { %7282 = vmatprep.subr.bf16.mxu1 %v8072_v26 }
0x16b4   :  { %7284 = vmatpush3.bf16.msra.mxu1 %v8221_v55 }
0x16b5   :  { %7285 = vmatprep.subr.bf16.mxu1 %v8072_v26 }
0x16b8   :  { %7287 = vmatpush3.bf16.msra.mxu1 %v8236_v58 }
0x16b9   :  { %7324 = vmatprep.subr.bf16.mxu1 %v8072_v26 }
0x176e   :  { %v1713_v7 = vpop.f32.mrb[14].mxu1 }
0x176f   :  { %v1714_v10 = vadd.f32 %v1713_v7, %v8254_v5  ;;  %v6355_v24 = vpop.f32.mrb[15].mxu1 }
0x1771   :  { %v1717_v11 = vmul.f32 %v1714_v10, %v1714_v10 }
0x1773   :  { %v1719_v12 = vrot.slane %v1717_v11, 6 }
0x1775   :  { %v1721_v13 = vsel %vm512_vm2, %v1714_v10, %v1719_v12 }
0x1776   :  { %6389 = vmatmul.mubr.f32.vlgmr.msra.gmra.mrb[16].mxu1 %v1721_v13 }
0x1777   :  { %7326 = vmatpush3.bf16.msra.mxu1 %v8328_v16  ;;  %6456 = vmatprep.mubr.msk.f32.mxu1 %vm8073_vm1, %v8074_v43 }
0x1778   :  { %7327 = vmatprep.subr.bf16.mxu1 %v8072_v26 }
0x177b   :  { %7329 = vmatpush3.bf16.msra.mxu1 %v8333_v20 }
0x177c   :  { %7330 = vmatprep.subr.bf16.mxu1 %v8072_v26 }
0x1849   :  { %v1788_v14 = vpop.f32.mrb[16].mxu1 }
0x184a   :  { %v1792_v15 = vmul.f32 %v1788_v14, %v1788_v14  ;;  %v6390_v25 = vpop.f32.mrb[17].mxu1  ;;  %v1799_v23 = vsub.f32 %v1714_v10, %v1788_v14 }
0x184c   :  { %v1794_v17 = vrot.slane %v1792_v15, 6 }
0x184e   :  { %v1796_v19 = vsub.f32 %v1788_v14, %v1794_v17 }
0x1850   :  { %v1797_v21 = vadd.f32 1e-05, %v1796_v19 }
0x1852   :  { %7797 = vrsqrt.f32 %v1797_v21 }
0x185c   :  { %v7798_v22 = vpop.eup %7797 }
0x185d   :  { %v1801_v44 = vrot.slane %v7798_v22, 2 }
0x185f   :  { %v1803_v27 = vmul.f32 %v1801_v44, %v1799_v23 }
0x1861   :  { %v1804_v29 = vmul.f32 %v1803_v27, %v8296_v1 }
0x1863   :  { %v1805_v31 = vadd.f32 %v1804_v29, %v8323_v63 }
0x1865   :  { %v1808_v37 = vadd.f32 %v1807_v32, %v1805_v31 }
0x1867   :  { %7799 = vtanh.f32 %v1808_v37  ;;  %v5554_v39 = vmul.f32 -1.442695, %v1808_v37 }
0x1869   :  { %7801 = vpow2.f32 %v5554_v39 }
0x1871   :  { %v7800_v38 = vpop.eup %7799 }
0x1872   :  { %1818 = vrot.lane.b32.xlu0 %v7800_v38, %s8075_s3 }
0x1873   :  { %v7802_v40 = vpop.eup %7801 }
0x1874   :  { %v1812_v45 = vadd.f32 1.0, %v7802_v40 }
0x1876   :  { %7803 = vrcp.f32 %v1812_v45 }
0x1880   :  { %v7804_v47 = vpop.eup %7803 }
0x1881   :  { %v1816_v60 = vmul.f32 %v7804_v47, %v8521_v18 }
0x18e4   :  { %v1819_v50 = vpop.permute.xlu0 %1818 }
0x18e5   :  { %v1821_v53 = vmul.f32 %v7804_v47, %v1819_v50 }
0x18e7   :  { %1823 = vrot.lane.b32.xlu1 %v1821_v53, %s8067_s1 }
0x1959   :  { %v1824_v56 = vpop.permute.xlu1 %1823 }
0x195a   :  { %v8576_v61 = vadd.f32 %v1824_v56, %v1816_v60 }
0x195c   :  { %v1827_v62 = vmul.f32 %v8576_v61, %v8576_v61 }
0x195e   :  { %v1829_v4 = vrot.slane %v1827_v62, 6 }
0x1960   :  { %v1831_v7 = vsel %vm512_vm2, %v8576_v61, %v1829_v4 }
0x1961   :  { %1833 = vrot.lane.b32.xlu0 %v1831_v7, %s8076_s25 }
0x19d3   :  { %v1834_v10 = vpop.permute.xlu0 %1833 }
0x19d4   :  { %6400 = vmatmul.mubr.msk.f32.vlgmr.msra.gmra.mrb[16].mxu0 %vm434_vm3, %v1834_v10 }
0x19d5   :  { %7296 = vmatpush3.bf16.msra.mxu0 %v8183_v35  ;;  %6410 = vmatprep.mubr.msk.f32.mxu0 %vm8073_vm1, %v8074_v43 }
0x19d6   :  { %7297 = vmatprep.subr.bf16.mxu0 %v8072_v26 }
0x19d9   :  { %7299 = vmatpush3.bf16.msra.mxu0 %v8193_v42 }
0x19da   :  { %7300 = vmatprep.subr.bf16.mxu0 %v8072_v26 }
0x1aa7   :  { %v1903_v18 = vpop.f32.mrb[16].mxu0 }
0x1aa8   :  { %v1907_v24 = vmul.f32 %v1903_v18, %v1903_v18  ;;  %1915 = vrot.lane.b32.xlu1 %v1903_v18, %s8067_s1  ;;  %v6401_v11 = vpop.f32.mrb[17].mxu0 }
0x1aaa   :  { %v1909_v12 = vrot.slane %v1907_v24, 6 }
0x1aac   :  { %v1911_v13 = vsub.f32 %v1903_v18, %v1909_v12 }
0x1aae   :  { %v1912_v14 = vadd.f32 1e-05, %v1911_v13  ;;  %v2101_v13 = vld [vmem:[#allocation2 + $0xa] sm:$0x3] }
0x1ab0   :  { %7805 = vrsqrt.f32 %v1912_v14 }
0x1aba   :  { %v7806_v15 = vpop.eup %7805 }
0x1abb   :  { %v1920_v25 = vrot.slane %v7806_v15, 2 }
0x1abd   :  { %1921 = vrot.lane.b32.xlu0 %v1920_v25, %s8067_s1 }
0x1b1a   :  { %v1916_v17 = vpop.permute.xlu1 %1915 }
0x1b1b   :  { %v1918_v19 = vsub.f32 %v8576_v61, %v1916_v17 }
0x1b2f   :  { %v1922_v21 = vpop.permute.xlu0 %1921 }
0x1b30   :  { %v1924_v22 = vmul.f32 %v1922_v21, %v1918_v19 }
0x1b32   :  { %v1925_v23 = vmul.f32 %v1924_v22, %v8380_v6 }
0x1b34   :  { %v1926_v44 = vadd.f32 %v1925_v23, %v8383_v9 }
0x1b36   :  { %7807 = vtanh.f32 %v1926_v44 }
0x1b40   :  { %v7808_v27 = vpop.eup %7807 }
0x1b41   :  { %1929 = vrot.lane.b32.xlu1 %v7808_v27, %s8075_s3 }
0x1bb3   :  { %v1930_v29 = vpop.permute.xlu1 %1929 }
0x1bb4   :  { %v1932_v31 = vmul.f32 %v7804_v47, %v1930_v29 }
0x1bb6   :  { %1934 = vrot.lane.b32.xlu0 %v1932_v31, %s8067_s1 }
0x1c28   :  { %v1935_v32 = vpop.permute.xlu0 %1934 }
0x1c29   :  { %1937 = vst.msk [vmem:[#allocation3 + $0x8] sm:$0x3] %vm752_vm4, %v1935_v32  ;;  %6411 = vmatmul.mubr.msk.f32.vlgmr.msra.gmra.mrb[18].mxu0 %vm434_vm3, %v1935_v32 }
0x1c2a   :  { %1938 = vst.msk [vmem:[#allocation3 + $0x6] sm:$0x3] %vm755_vm5, %v1935_v32  ;;  %7302 = vmatpush3.bf16.msra.mxu0 %v8179_v33  ;;  %6445 = vmatprep.mubr.msk.f32.mxu0 %vm8073_vm1, %v8074_v43 }
0x1c2b   :  { %7303 = vmatprep.subr.bf16.mxu0 %v8072_v26 }
0x1c2e   :  { %7305 = vmatpush3.bf16.msra.mxu0 %v8181_v34 }
0x1c2f   :  { %7306 = vmatprep.subr.bf16.mxu0 %v8072_v26 }
0x1c32   :  { %7308 = vmatpush3.bf16.msra.mxu0 %v8190_v41 }
0x1c33   :  { %7309 = vmatprep.subr.bf16.mxu0 %v8072_v26 }
0x1c36   :  { %7311 = vmatpush3.bf16.msra.mxu0 %v8200_v46 }
0x1c37   :  { %7312 = vmatprep.subr.bf16.mxu0 %v8072_v26 }
0x1c3a   :  { %7314 = vmatpush3.bf16.msra.mxu0 %v8207_v49 }
0x1c3b   :  { %7315 = vmatprep.subr.bf16.mxu0 %v8072_v26 }
0x1c3e   :  { %7317 = vmatpush3.bf16.msra.mxu0 %v8215_v52 }
0x1c3f   :  { %7318 = vmatprep.subr.bf16.mxu0 %v8072_v26 }
0x1c42   :  { %7320 = vmatpush3.bf16.msra.mxu0 %v8221_v55 }
0x1c43   :  { %7321 = vmatprep.subr.bf16.mxu0 %v8072_v26 }
0x1c46   :  { %7323 = vmatpush3.bf16.msra.mxu0 %v8236_v58 }
0x1c47   :  { %7360 = vmatprep.subr.bf16.mxu0 %v8072_v26 }
0x1cfc   :  { %v2007_v37 = vpop.f32.mrb[18].mxu0 }
0x1cfd   :  { %v2008_v38 = vadd.f32 %v2007_v37, %v8254_v5  ;;  %v6412_v39 = vpop.f32.mrb[19].mxu0 }
0x1cff   :  { %v2011_v40 = vmul.f32 %v2008_v38, %v2008_v38 }
0x1d01   :  { %v2013_v45 = vrot.slane %v2011_v40, 6 }
0x1d03   :  { %v2015_v47 = vsel %vm512_vm2, %v2008_v38, %v2013_v45 }
0x1d04   :  { %6446 = vmatmul.mubr.f32.vlgmr.msra.gmra.mrb[20].mxu0 %v2015_v47 }
0x1d05   :  { %7362 = vmatpush3.bf16.msra.mxu0 %v8328_v16  ;;  %6513 = vmatprep.mubr.msk.f32.mxu0 %vm8073_vm1, %v8074_v43 }
0x1d06   :  { %7363 = vmatprep.subr.bf16.mxu0 %v8072_v26 }
0x1d09   :  { %7365 = vmatpush3.bf16.msra.mxu0 %v8333_v20 }
0x1d0a   :  { %7366 = vmatprep.subr.bf16.mxu0 %v8072_v26 }
0x1dd7   :  { %v2082_v50 = vpop.f32.mrb[20].mxu0 }
0x1dd8   :  { %v2086_v53 = vmul.f32 %v2082_v50, %v2082_v50  ;;  %v6447_v60 = vpop.f32.mrb[21].mxu0  ;;  %v2093_v10 = vsub.f32 %v2008_v38, %v2082_v50 }
0x1dda   :  { %v2088_v56 = vrot.slane %v2086_v53, 6 }
0x1ddc   :  { %v2090_v62 = vsub.f32 %v2082_v50, %v2088_v56 }
0x1dde   :  { %v2091_v4 = vadd.f32 1e-05, %v2090_v62 }
0x1de0   :  { %7809 = vrsqrt.f32 %v2091_v4 }
0x1dea   :  { %v7810_v7 = vpop.eup %7809 }
0x1deb   :  { %v2095_v18 = vrot.slane %v7810_v7, 2 }
0x1ded   :  { %v2097_v24 = vmul.f32 %v2095_v18, %v2093_v10 }
0x1def   :  { %v2098_v11 = vmul.f32 %v2097_v24, %v8296_v1 }
0x1df1   :  { %v2099_v12 = vadd.f32 %v2098_v11, %v8323_v63 }
0x1df3   :  { %v2102_v14 = vadd.f32 %v2101_v13, %v2099_v12 }
0x1df5   :  { %7811 = vtanh.f32 %v2102_v14  ;;  %v5557_v25 = vmul.f32 -1.442695, %v2102_v14 }
0x1df7   :  { %7813 = vpow2.f32 %v5557_v25 }
0x1dff   :  { %v7812_v15 = vpop.eup %7811 }
0x1e00   :  { %2112 = vrot.lane.b32.xlu1 %v7812_v15, %s8075_s3 }
0x1e01   :  { %v7814_v17 = vpop.eup %7813 }
0x1e02   :  { %v2106_v19 = vadd.f32 1.0, %v7814_v17 }
0x1e04   :  { %7815 = vrcp.f32 %v2106_v19 }
0x1e0e   :  { %v7816_v21 = vpop.eup %7815 }
0x1e0f   :  { %v2110_v44 = vmul.f32 %v7816_v21, %v8576_v61 }
0x1e72   :  { %v2113_v22 = vpop.permute.xlu1 %2112 }
0x1e73   :  { %v2115_v23 = vmul.f32 %v7816_v21, %v2113_v22 }
0x1e75   :  { %2117 = vrot.lane.b32.xlu0 %v2115_v23, %s8067_s1 }
0x1ee7   :  { %v2118_v27 = vpop.permute.xlu0 %2117 }
0x1ee8   :  { %v8631_v29 = vadd.f32 %v2118_v27, %v2110_v44 }
0x1eea   :  { %v2121_v31 = vmul.f32 %v8631_v29, %v8631_v29 }
0x1eec   :  { %v2123_v32 = vrot.slane %v2121_v31, 6 }
0x1eee   :  { %v2125_v37 = vsel %vm512_vm2, %v8631_v29, %v2123_v32 }
0x1eef   :  { %2127 = vrot.lane.b32.xlu1 %v2125_v37, %s8076_s25 }
0x1f61   :  { %v2128_v38 = vpop.permute.xlu1 %2127 }
0x1f62   :  { %6457 = vmatmul.mubr.msk.f32.vlgmr.msra.gmra.mrb[18].mxu1 %vm434_vm3, %v2128_v38 }
0x1f63   :  { %7332 = vmatpush3.bf16.msra.mxu1 %v8183_v35  ;;  %6467 = vmatprep.mubr.msk.f32.mxu1 %vm8073_vm1, %v8074_v43 }
0x1f64   :  { %7333 = vmatprep.subr.bf16.mxu1 %v8072_v26 }
0x1f67   :  { %7335 = vmatpush3.bf16.msra.mxu1 %v8193_v42 }
0x1f68   :  { %7336 = vmatprep.subr.bf16.mxu1 %v8072_v26 }
0x2035   :  { %v2197_v61 = vpop.f32.mrb[18].mxu1 }
0x2036   :  { %v2201_v39 = vmul.f32 %v2197_v61, %v2197_v61  ;;  %2209 = vrot.lane.b32.xlu0 %v2197_v61, %s8067_s1  ;;  %v6458_v40 = vpop.f32.mrb[19].mxu1 }
0x2038   :  { %v2203_v45 = vrot.slane %v2201_v39, 6 }
0x203a   :  { %v2205_v47 = vsub.f32 %v2197_v61, %v2203_v45 }
0x203c   :  { %v2206_v50 = vadd.f32 1e-05, %v2205_v47  ;;  %v2395_v47 = vld [vmem:[#allocation2 + $0xc] sm:$0x3] }
0x203e   :  { %7817 = vrsqrt.f32 %v2206_v50 }
0x2048   :  { %v7818_v53 = vpop.eup %7817 }
0x2049   :  { %v2214_v60 = vrot.slane %v7818_v53, 2 }
0x204b   :  { %2215 = vrot.lane.b32.xlu1 %v2214_v60, %s8067_s1 }
0x20a8   :  { %v2210_v56 = vpop.permute.xlu0 %2209 }
0x20a9   :  { %v2212_v62 = vsub.f32 %v8631_v29, %v2210_v56 }
0x20bd   :  { %v2216_v4 = vpop.permute.xlu1 %2215 }
0x20be   :  { %v2218_v7 = vmul.f32 %v2216_v4, %v2212_v62 }
0x20c0   :  { %v2219_v10 = vmul.f32 %v2218_v7, %v8380_v6 }
0x20c2   :  { %v2220_v18 = vadd.f32 %v2219_v10, %v8383_v9 }
0x20c4   :  { %7819 = vtanh.f32 %v2220_v18 }
0x20ce   :  { %v7820_v24 = vpop.eup %7819 }
0x20cf   :  { %2223 = vrot.lane.b32.xlu0 %v7820_v24, %s8075_s3 }
0x2141   :  { %v2224_v11 = vpop.permute.xlu0 %2223 }
0x2142   :  { %v2226_v12 = vmul.f32 %v7816_v21, %v2224_v11 }
0x2144   :  { %2228 = vrot.lane.b32.xlu1 %v2226_v12, %s8067_s1 }
0x21b6   :  { %v2229_v13 = vpop.permute.xlu1 %2228 }
0x21b7   :  { %2231 = vst.msk [vmem:[#allocation3 + $0xa] sm:$0x3] %vm752_vm4, %v2229_v13  ;;  %6468 = vmatmul.mubr.msk.f32.vlgmr.msra.gmra.mrb[20].mxu1 %vm434_vm3, %v2229_v13 }
0x21b8   :  { %2232 = vst.msk [vmem:[#allocation3 + $0x4] sm:$0x3] %vm755_vm5, %v2229_v13  ;;  %7338 = vmatpush3.bf16.msra.mxu1 %v8179_v33  ;;  %6502 = vmatprep.mubr.msk.f32.mxu1 %vm8073_vm1, %v8074_v43 }
0x21b9   :  { %7339 = vmatprep.subr.bf16.mxu1 %v8072_v26 }
0x21bc   :  { %7341 = vmatpush3.bf16.msra.mxu1 %v8181_v34 }
0x21bd   :  { %7342 = vmatprep.subr.bf16.mxu1 %v8072_v26 }
0x21c0   :  { %7344 = vmatpush3.bf16.msra.mxu1 %v8190_v41 }
0x21c1   :  { %7345 = vmatprep.subr.bf16.mxu1 %v8072_v26 }
0x21c4   :  { %7347 = vmatpush3.bf16.msra.mxu1 %v8200_v46 }
0x21c5   :  { %7348 = vmatprep.subr.bf16.mxu1 %v8072_v26 }
0x21c8   :  { %7350 = vmatpush3.bf16.msra.mxu1 %v8207_v49 }
0x21c9   :  { %7351 = vmatprep.subr.bf16.mxu1 %v8072_v26 }
0x21cc   :  { %7353 = vmatpush3.bf16.msra.mxu1 %v8215_v52 }
0x21cd   :  { %7354 = vmatprep.subr.bf16.mxu1 %v8072_v26 }
0x21d0   :  { %7356 = vmatpush3.bf16.msra.mxu1 %v8221_v55 }
0x21d1   :  { %7357 = vmatprep.subr.bf16.mxu1 %v8072_v26 }
0x21d4   :  { %7359 = vmatpush3.bf16.msra.mxu1 %v8236_v58 }
0x21d5   :  { %7396 = vmatprep.subr.bf16.mxu1 %v8072_v26 }
0x228a   :  { %v2301_v14 = vpop.f32.mrb[20].mxu1 }
0x228b   :  { %v2302_v15 = vadd.f32 %v2301_v14, %v8254_v5  ;;  %v6469_v25 = vpop.f32.mrb[21].mxu1 }
0x228d   :  { %v2305_v17 = vmul.f32 %v2302_v15, %v2302_v15 }
0x228f   :  { %v2307_v19 = vrot.slane %v2305_v17, 6 }
0x2291   :  { %v2309_v21 = vsel %vm512_vm2, %v2302_v15, %v2307_v19 }
0x2292   :  { %6503 = vmatmul.mubr.f32.vlgmr.msra.gmra.mrb[22].mxu1 %v2309_v21 }
0x2293   :  { %7398 = vmatpush3.bf16.msra.mxu1 %v8328_v16  ;;  %6570 = vmatprep.mubr.msk.f32.mxu1 %vm8073_vm1, %v8074_v43 }
0x2294   :  { %7399 = vmatprep.subr.bf16.mxu1 %v8072_v26 }
0x2297   :  { %7401 = vmatpush3.bf16.msra.mxu1 %v8333_v20 }
0x2365   :  { %v2376_v22 = vpop.f32.mrb[22].mxu1 }
0x2366   :  { %v2380_v23 = vmul.f32 %v2376_v22, %v2376_v22  ;;  %v6504_v44 = vpop.f32.mrb[23].mxu1  ;;  %v2387_v38 = vsub.f32 %v2302_v15, %v2376_v22 }
0x2368   :  { %v2382_v27 = vrot.slane %v2380_v23, 6 }
0x236a   :  { %v2384_v31 = vsub.f32 %v2376_v22, %v2382_v27 }
0x236c   :  { %v2385_v32 = vadd.f32 1e-05, %v2384_v31 }
0x236e   :  { %7821 = vrsqrt.f32 %v2385_v32 }
0x2378   :  { %v7822_v37 = vpop.eup %7821 }
0x2379   :  { %v2389_v61 = vrot.slane %v7822_v37, 2 }
0x237b   :  { %v2391_v39 = vmul.f32 %v2389_v61, %v2387_v38 }
0x237d   :  { %v2392_v40 = vmul.f32 %v2391_v39, %v8296_v1 }
0x237f   :  { %v2393_v45 = vadd.f32 %v2392_v40, %v8323_v63 }
0x2381   :  { %v2396_v50 = vadd.f32 %v2395_v47, %v2393_v45 }
0x2383   :  { %7823 = vtanh.f32 %v2396_v50  ;;  %v5560_v60 = vmul.f32 -1.442695, %v2396_v50 }
0x2385   :  { %7825 = vpow2.f32 %v5560_v60 }
0x238d   :  { %v7824_v53 = vpop.eup %7823 }
0x238e   :  { %2406 = vrot.lane.b32.xlu0 %v7824_v53, %s8075_s3 }
0x238f   :  { %v7826_v56 = vpop.eup %7825 }
0x2390   :  { %v2400_v62 = vadd.f32 1.0, %v7826_v56 }
0x2392   :  { %7827 = vrcp.f32 %v2400_v62 }
0x239c   :  { %v7828_v4 = vpop.eup %7827 }
0x239d   :  { %v2404_v18 = vmul.f32 %v7828_v4, %v8631_v29 }
0x2400   :  { %v2407_v7 = vpop.permute.xlu0 %2406 }
0x2401   :  { %v2409_v10 = vmul.f32 %v7828_v4, %v2407_v7 }
0x2403   :  { %2411 = vrot.lane.b32.xlu1 %v2409_v10, %s8067_s1 }
0x2475   :  { %v2412_v24 = vpop.permute.xlu1 %2411 }
0x2476   :  { %v8685_v11 = vadd.f32 %v2412_v24, %v2404_v18 }
0x2478   :  { %v2415_v12 = vmul.f32 %v8685_v11, %v8685_v11 }
0x247a   :  { %v2417_v13 = vrot.slane %v2415_v12, 6 }
0x247c   :  { %v2419_v14 = vsel %vm512_vm2, %v8685_v11, %v2417_v13 }
0x247d   :  { %2421 = vrot.lane.b32.xlu0 %v2419_v14, %s8076_s25 }
0x24ef   :  { %v2422_v15 = vpop.permute.xlu0 %2421 }
0x24f0   :  { %6514 = vmatmul.mubr.msk.f32.vlgmr.msra.gmra.mrb[22].mxu0 %vm434_vm3, %v2422_v15 }
0x24f1   :  { %7368 = vmatpush3.bf16.msra.mxu0 %v8183_v35  ;;  %6524 = vmatprep.mubr.msk.f32.mxu0 %vm8073_vm1, %v8074_v43 }
0x24f2   :  { %7369 = vmatprep.subr.bf16.mxu0 %v8072_v26 }
0x24f5   :  { %7371 = vmatpush3.bf16.msra.mxu0 %v8193_v42 }
0x24f6   :  { %7372 = vmatprep.subr.bf16.mxu0 %v8072_v26 }
0x25c3   :  { %v2491_v29 = vpop.f32.mrb[22].mxu0 }
0x25c4   :  { %v2495_v25 = vmul.f32 %v2491_v29, %v2491_v29  ;;  %2503 = vrot.lane.b32.xlu1 %v2491_v29, %s8067_s1  ;;  %v6515_v17 = vpop.f32.mrb[23].mxu0 }
0x25c6   :  { %v2497_v19 = vrot.slane %v2495_v25, 6  ;;  %v2689_v25 = vld [vmem:[#allocation2 + $0xe] sm:$0x3] }
0x25c8   :  { %v2499_v21 = vsub.f32 %v2491_v29, %v2497_v19 }
0x25ca   :  { %v2500_v22 = vadd.f32 1e-05, %v2499_v21 }
0x25cc   :  { %7829 = vrsqrt.f32 %v2500_v22 }
0x25d6   :  { %v7830_v23 = vpop.eup %7829 }
0x25d7   :  { %v2508_v35 = vrot.slane %v7830_v23, 2 }
0x25d9   :  { %2509 = vrot.lane.b32.xlu0 %v2508_v35, %s8067_s1 }
0x2636   :  { %v2504_v44 = vpop.permute.xlu1 %2503 }
0x2637   :  { %v2506_v27 = vsub.f32 %v8685_v11, %v2504_v44 }
0x264b   :  { %v2510_v31 = vpop.permute.xlu0 %2509 }
0x264c   :  { %v2512_v42 = vmul.f32 %v2510_v31, %v2506_v27 }
0x264e   :  { %v2513_v32 = vmul.f32 %v2512_v42, %v8380_v6 }
0x2650   :  { %v2514_v37 = vadd.f32 %v2513_v32, %v8383_v9 }
0x2652   :  { %7831 = vtanh.f32 %v2514_v37 }
0x265c   :  { %v7832_v38 = vpop.eup %7831 }
0x265d   :  { %2517 = vrot.lane.b32.xlu1 %v7832_v38, %s8075_s3 }
0x26cf   :  { %v2518_v61 = vpop.permute.xlu1 %2517 }
0x26d0   :  { %v2520_v39 = vmul.f32 %v7828_v4, %v2518_v61 }
0x26d2   :  { %2522 = vrot.lane.b32.xlu0 %v2520_v39, %s8067_s1 }
0x2744   :  { %v2523_v40 = vpop.permute.xlu0 %2522 }
0x2745   :  { %2525 = vst.msk [vmem:[#allocation3 + $0xc] sm:$0x3] %vm752_vm4, %v2523_v40  ;;  %6525 = vmatmul.mubr.msk.f32.vlgmr.msra.gmra.mrb[24].mxu0 %vm434_vm3, %v2523_v40 }
0x2746   :  { %2526 = vst.msk [vmem:[#allocation3 + $0x2] sm:$0x3] %vm755_vm5, %v2523_v40  ;;  %7374 = vmatpush3.bf16.msra.mxu0 %v8179_v33  ;;  %6559 = vmatprep.mubr.msk.f32.mxu0 %vm8073_vm1, %v8074_v43 }
0x2747   :  { %7375 = vmatprep.subr.bf16.mxu0 %v8072_v26 }
0x274a   :  { %7377 = vmatpush3.bf16.msra.mxu0 %v8181_v34 }
0x274b   :  { %7378 = vmatprep.subr.bf16.mxu0 %v8072_v26 }
0x274e   :  { %7380 = vmatpush3.bf16.msra.mxu0 %v8190_v41 }
0x274f   :  { %7381 = vmatprep.subr.bf16.mxu0 %v8072_v26 }
0x2752   :  { %7383 = vmatpush3.bf16.msra.mxu0 %v8200_v46 }
0x2753   :  { %7384 = vmatprep.subr.bf16.mxu0 %v8072_v26 }
0x2756   :  { %7386 = vmatpush3.bf16.msra.mxu0 %v8207_v49 }
0x2757   :  { %7387 = vmatprep.subr.bf16.mxu0 %v8072_v26 }
0x275a   :  { %7389 = vmatpush3.bf16.msra.mxu0 %v8215_v52 }
0x275b   :  { %7390 = vmatprep.subr.bf16.mxu0 %v8072_v26 }
0x275e   :  { %7392 = vmatpush3.bf16.msra.mxu0 %v8221_v55 }
0x275f   :  { %7393 = vmatprep.subr.bf16.mxu0 %v8072_v26 }
0x2762   :  { %7395 = vmatpush3.bf16.msra.mxu0 %v8236_v58 }
0x2763   :  { %7442 = vmatprep.subr.bf16.mxu0 %v8072_v26 }
0x2818   :  { %v2595_v45 = vpop.f32.mrb[24].mxu0 }
0x2819   :  { %v2596_v47 = vadd.f32 %v2595_v45, %v8254_v5  ;;  %v6526_v50 = vpop.f32.mrb[25].mxu0 }
0x281b   :  { %v2599_v53 = vmul.f32 %v2596_v47, %v2596_v47 }
0x281d   :  { %v2601_v60 = vrot.slane %v2599_v53, 6 }
0x281f   :  { %v2603_v56 = vsel %vm512_vm2, %v2596_v47, %v2601_v60  ;;  %v2833_v60 = vld [vmem:[#allocation9 + $0x20] sm:$0xff] }
0x2820   :  { %6560 = vmatmul.mubr.f32.vlgmr.msra.gmra.mrb[26].mxu0 %v2603_v56  ;;  %v2834_v56 = vld [vmem:[#allocation9 + $0x28] sm:$0xff] }
0x2821   :  { %6630 = vmatprep.mubr.msk.f32.mxu0 %vm8073_vm1, %v8074_v43 }
0x28f3   :  { %v2670_v62 = vpop.f32.mrb[26].mxu0 }
0x28f4   :  { %v2674_v4 = vmul.f32 %v2670_v62, %v2670_v62  ;;  %v6561_v7 = vpop.f32.mrb[27].mxu0  ;;  %v2681_v13 = vsub.f32 %v2596_v47, %v2670_v62 }
0x28f5   :  { %v2836_v7 = vld [vmem:[#allocation9 + $0x38] sm:$0xff] }
0x28f6   :  { %v2676_v10 = vrot.slane %v2674_v4, 6  ;;  %v8745_v4 = vpack.c.bf16 %v2834_v56, %v2833_v60 }
0x28f8   :  { %v2678_v18 = vsub.f32 %v2670_v62, %v2676_v10  ;;  %v2835_v62 = vld [vmem:[#allocation9 + $0x30] sm:$0xff]  ;;  %7444 = vmatpush3.bf16.msra.mxu0 %v8745_v4 }
0x28f9   :  { %v8748_v10 = vpack.c.bf16 %v2836_v7, %v2835_v62  ;;  %7445 = vmatprep.subr.bf16.mxu0 %v8072_v26 }
0x28fa   :  { %v2679_v24 = vadd.f32 1e-05, %v2678_v18 }
0x28fc   :  { %7833 = vrsqrt.f32 %v2679_v24  ;;  %7447 = vmatpush3.bf16.msra.mxu0 %v8748_v10 }
0x28fd   :  { %7448 = vmatprep.subr.bf16.mxu0 %v8072_v26 }
0x28ff   :  { %6631 = vmatmul.mubr.f32.vlgmr.msra.gmra.mrb[28].mxu0 %v8074_v43 }
0x2900   :  { %7450 = vmatpush3.bf16.msra.mxu0 %v8179_v33  ;;  %6665 = vmatprep.mubr.msk.f32.mxu0 %vm8073_vm1, %v8074_v43 }
0x2901   :  { %7451 = vmatprep.subr.bf16.mxu0 %v8072_v26 }
0x2904   :  { %7453 = vmatpush3.bf16.msra.mxu0 %v8181_v34 }
0x2905   :  { %7454 = vmatprep.subr.bf16.mxu0 %v8072_v26 }
0x2906   :  { %v7834_v12 = vpop.eup %7833 }
0x2907   :  { %v2683_v14 = vrot.slane %v7834_v12, 2 }
0x2908   :  { %7456 = vmatpush3.bf16.msra.mxu0 %v8190_v41 }
0x2909   :  { %v2685_v5 = vmul.f32 %v2683_v14, %v2681_v13  ;;  %7457 = vmatprep.subr.bf16.mxu0 %v8072_v26 }
0x290b   :  { %v2686_v15 = vmul.f32 %v2685_v5, %v8296_v1 }
0x290c   :  { %7459 = vmatpush3.bf16.msra.mxu0 %v8200_v46 }
0x290d   :  { %v2687_v29 = vadd.f32 %v2686_v15, %v8323_v63  ;;  %7460 = vmatprep.subr.bf16.mxu0 %v8072_v26 }
0x290f   :  { %v2690_v17 = vadd.f32 %v2689_v25, %v2687_v29  ;;  %v8775_v29 = vld [vmem:[#allocation10 + $0x8] sm:$0xff] }
0x2910   :  { %7462 = vmatpush3.bf16.msra.mxu0 %v8207_v49  ;;  %v8780_v25 = vrot.slane %v8775_v29, %v432_v0 }
0x2911   :  { %7835 = vtanh.f32 %v2690_v17  ;;  %v5563_v21 = vmul.f32 -1.442695, %v2690_v17  ;;  %7463 = vmatprep.subr.bf16.mxu0 %v8072_v26 }
0x2913   :  { %7837 = vpow2.f32 %v5563_v21  ;;  %v2830_v21 = vld [vmem:[#allocation7 + $0x28] sm:$0xff] }
0x2914   :  { %7465 = vmatpush3.bf16.msra.mxu0 %v8215_v52 }
0x2915   :  { %7466 = vmatprep.subr.bf16.mxu0 %v8072_v26 }
0x2918   :  { %7468 = vmatpush3.bf16.msra.mxu0 %v8221_v55 }
0x2919   :  { %7469 = vmatprep.subr.bf16.mxu0 %v8072_v26 }
0x291b   :  { %v7836_v19 = vpop.eup %7835 }
0x291c   :  { %2700 = vrot.lane.b32.xlu1 %v7836_v19, %s8075_s3  ;;  %7471 = vmatpush3.bf16.msra.mxu0 %v8236_v58  ;;  %v2829_v19 = vld [vmem:[#allocation7 + $0x20] sm:$0xff] }
0x291d   :  { %v7838_v22 = vpop.eup %7837  ;;  %7508 = vmatprep.subr.bf16.mxu0 %v8072_v26 }
0x291e   :  { %v2694_v23 = vadd.f32 1.0, %v7838_v22  ;;  %v2831_v22 = vld [vmem:[#allocation7 + $0x30] sm:$0xff] }
0x2920   :  { %7839 = vrcp.f32 %v2694_v23  ;;  %v7402_v23 = vpack.c.bf16 %v2830_v21, %v2829_v19 }
0x2922   :  { %7403 = vmatprep.subr.bf16.mxu1 %v7402_v23 }
0x292a   :  { %v8734_v35 = vpop.eup %7839 }
0x292b   :  { %v2698_v1 = vmul.f32 %v8734_v35, %v8685_v11 }
0x298e   :  { %v2701_v44 = vpop.permute.xlu1 %2700 }
0x298f   :  { %v2703_v27 = vmul.f32 %v8734_v35, %v2701_v44  ;;  %v2832_v44 = vld [vmem:[#allocation7 + $0x38] sm:$0xff] }
0x2991   :  { %2705 = vrot.lane.b32.xlu0 %v2703_v27, %s8067_s1  ;;  %v7406_v27 = vpack.c.bf16 %v2832_v44, %v2831_v22 }
0x29d2   :  { %v3220_v17 = vpop.f32.mrb[28].mxu0 }
0x2a03   :  { %v2706_v63 = vpop.permute.xlu0 %2705 }
0x2a04   :  { %v2708_v31 = vadd.f32 %v2706_v63, %v2698_v1 }
0x2a06   :  { %v2709_v42 = vmul.f32 %v2708_v31, %v2708_v31 }
0x2a08   :  { %v2711_v32 = vrot.slane %v2709_v42, 6 }
0x2a0a   :  { %v2713_v37 = vsel %vm512_vm2, %v2708_v31, %v2711_v32 }
0x2a0b   :  { %2715 = vrot.lane.b32.xlu1 %v2713_v37, %s8076_s25  ;;  %v2823_v37 = vld [vmem:[#allocation3 + $0x4] sm:$0x3] }
0x2a7d   :  { %v2716_v38 = vpop.permute.xlu1 %2715 }
0x2a7e   :  { %6571 = vmatmul.mubr.msk.f32.vlgmr.msra.gmra.mrb[24].mxu1 %vm434_vm3, %v2716_v38  ;;  %v2826_v38 = vld [vmem:[#allocation3 + $0xa] sm:$0x3] }
0x2a7f   :  { %7405 = vmatpush3.bf16.msra.mxu1 %v7402_v23 }
0x2a80   :  { %7407 = vmatprep.subr.bf16.mxu1 %v7406_v27 }
0x2a83   :  { %7409 = vmatpush3.bf16.msra.mxu1 %v7406_v27 }
0x2a84   :  { %7411 = vmatprep.subr.bf16.mxu1 %v8179_v33 }
0x2b51   :  { %v2785_v61 = vpop.f32.mrb[24].mxu1 }
0x2b52   :  { %v2789_v39 = vmul.f32 %v2785_v61, %v2785_v61  ;;  %2797 = vrot.lane.b32.xlu0 %v2785_v61, %s8067_s1  ;;  %v6572_v40 = vpop.f32.mrb[25].mxu1 }
0x2b53   :  { %v2822_v40 = vld [vmem:[#allocation3 + $0x2] sm:$0x3] }
0x2b54   :  { %v2791_v45 = vrot.slane %v2789_v39, 6  ;;  %v2825_v39 = vld [vmem:[#allocation3 + $0x8] sm:$0x3] }
0x2b56   :  { %v2793_v47 = vsub.f32 %v2785_v61, %v2791_v45  ;;  %v2824_v61 = vld [vmem:[#allocation3 + $0x6] sm:$0x3] }
0x2b57   :  { %v2851_v45 = vcombine.low %v2823_v37, %v2824_v61 }
0x2b58   :  { %v2794_v50 = vadd.f32 1e-05, %v2793_v47 }
0x2b59   :  { %v2865_v62 = vrot.slane %v2851_v45, %v8172_v8 }
0x2b5a   :  { %7841 = vrsqrt.f32 %v2794_v50  ;;  %v2827_v50 = vld [vmem:[#allocation3 + $0xc] sm:$0x3] }
0x2b64   :  { %v7842_v11 = vpop.eup %7841 }
0x2b65   :  { %v2802_v53 = vrot.slane %v7842_v11, 2 }
0x2b67   :  { %2803 = vrot.lane.b32.xlu1 %v2802_v53, %s8067_s1 }
0x2bc4   :  { %v2798_v18 = vpop.permute.xlu0 %2797 }
0x2bc5   :  { %v2800_v24 = vsub.f32 %v2708_v31, %v2798_v18 }
0x2bd9   :  { %v2804_v12 = vpop.permute.xlu1 %2803 }
0x2bda   :  { %v2806_v13 = vmul.f32 %v2804_v12, %v2800_v24 }
0x2bdc   :  { %v2807_v14 = vmul.f32 %v2806_v13, %v8380_v6  ;;  %v6632_v6 = vpop.f32.mrb[29].mxu0 }
0x2bde   :  { %v2808_v5 = vadd.f32 %v2807_v14, %v8383_v9  ;;  %v8783_v9 = vadd.f32 %v3220_v17, %v8780_v25 }
0x2be0   :  { %7843 = vtanh.f32 %v2808_v5  ;;  %v3224_v1 = vmul.f32 %v8783_v9, %v8783_v9  ;;  %v2841_v5 = vrot.slane %v8775_v29, %v8244_v59 }
0x2be2   :  { %v3226_v63 = vrot.slane %v3224_v1, 6 }
0x2be4   :  { %v3228_v0 = vsel %vm512_vm2, %v8783_v9, %v3226_v63 }
0x2be5   :  { %6666 = vmatmul.mubr.f32.vlgmr.msra.gmra.mrb[30].mxu0 %v3228_v0 }
0x2be6   :  { %7510 = vmatpush3.bf16.msra.mxu0 %v8328_v16  ;;  %6733 = vmatprep.mubr.msk.f32.mxu0 %vm8073_vm1, %v8074_v43 }
0x2be7   :  { %7511 = vmatprep.subr.bf16.mxu0 %v8072_v26 }
0x2bea   :  { %v7844_v15 = vpop.eup %7843  ;;  %7513 = vmatpush3.bf16.msra.mxu0 %v8333_v20 }
0x2beb   :  { %2811 = vrot.lane.b32.xlu0 %v7844_v15, %s8075_s3  ;;  %7514 = vmatprep.subr.bf16.mxu0 %v8072_v26 }
0x2c5d   :  { %v2812_v31 = vpop.permute.xlu0 %2811 }
0x2c5e   :  { %v2814_v42 = vmul.f32 %v8734_v35, %v2812_v31  ;;  %v2867_v35 = vcombine.low %v2825_v39, %v2826_v38 }
0x2c60   :  { %2816 = vrot.lane.b32.xlu1 %v2814_v42, %s8067_s1  ;;  %v2875_v7 = vrot.slane %v2867_v35, %v8172_v8  ;;  %v3065_v35 = vrot.slane %v8775_v29, %v8276_v28  ;;  %v8840_v28 = vrot.slane %v8775_v29, %v598_v51 }
0x2cb8   :  { %v3295_v13 = vpop.f32.mrb[30].mxu0 }
0x2cb9   :  { %v6667_v14 = vpop.f32.mrb[31].mxu0  ;;  %v3299_v59 = vmul.f32 %v3295_v13, %v3295_v13 }
0x2cbb   :  { %v3301_v44 = vrot.slane %v3299_v59, 6 }
0x2cbd   :  { %v3303_v6 = vsub.f32 %v3295_v13, %v3301_v44 }
0x2cbf   :  { %v3304_v0 = vadd.f32 1e-05, %v3303_v6 }
0x2cc1   :  { %7845 = vrsqrt.f32 %v3304_v0 }
0x2cd2   :  { %v2817_v32 = vpop.permute.xlu1 %2816 }
0x2cd3   :  { %2819 = vst.msk [vmem:[#allocation3 + $0xe] sm:$0x3] %vm752_vm4, %v2817_v32 }
0x2cd4   :  { %2820 = vst.msk [vmem:[#allocation3] sm:$0x3] %vm755_vm5, %v2817_v32 }
0x2cda   :  { %v2828_v11 = vld [vmem:[#allocation3 + $0xe] sm:$0x3] }
0x2cdb   :  { %v2821_v47 = vld [vmem:[#allocation3] sm:$0x3]  ;;  %v2868_v60 = vcombine.low %v2827_v50, %v2828_v11 }
0x2cdc   :  { %v2850_v53 = vcombine.low %v2821_v47, %v2822_v40  ;;  %v7846_v40 = vpop.eup %7845 }
0x2cdd   :  { %v2882_v18 = vrot.slane %v2868_v60, %v8172_v8  ;;  %v3071_v60 = vrot.slane %v8775_v29, %v342_v30 }
0x2cde   :  { %v2858_v56 = vrot.slane %v2850_v53, %v8172_v8 }
0x2cdf   :  { %v2883_v12 = vcombine.low %v2875_v7, %v2882_v18  ;;  %v3306_v7 = vsub.f32 %v8783_v9, %v3295_v13  ;;  %v3308_v18 = vrot.slane %v7846_v40, 2 }
0x2ce0   :  { %v2866_v24 = vcombine.low %v2858_v56, %v2865_v62 }
0x2ce2   :  { %6581 = vmatprep.mubr.msk.f32.mxu1 %vm434_vm3, %v2866_v24 }
0x2ce3   :  { %6582 = vmatmul.mubr.msk.f32.vlgmr.msra.gmra.mrb[26].mxu1 %vm434_vm3, %v2883_v12 }
0x2ce4   :  { %7413 = vmatpush3.bf16.msra.mxu1 %v8179_v33 }
0x2ce5   :  { %7415 = vmatprep.subr.bf16.mxu1 %v8181_v34 }
0x2ce8   :  { %7417 = vmatpush3.bf16.msra.mxu1 %v8181_v34 }
0x2ce9   :  { %7419 = vmatprep.subr.bf16.mxu1 %v8190_v41 }
0x2cec   :  { %7421 = vmatpush3.bf16.msra.mxu1 %v8190_v41 }
0x2ced   :  { %7423 = vmatprep.subr.bf16.mxu1 %v8200_v46 }
0x2cf0   :  { %7425 = vmatpush3.bf16.msra.mxu1 %v8200_v46 }
0x2cf1   :  { %7427 = vmatprep.subr.bf16.mxu1 %v8207_v49 }
0x2cf4   :  { %7429 = vmatpush3.bf16.msra.mxu1 %v8207_v49 }
0x2cf5   :  { %7431 = vmatprep.subr.bf16.mxu1 %v8215_v52 }
0x2cf8   :  { %7433 = vmatpush3.bf16.msra.mxu1 %v8215_v52 }
0x2cf9   :  { %7435 = vmatprep.subr.bf16.mxu1 %v8221_v55 }
0x2cfc   :  { %7437 = vmatpush3.bf16.msra.mxu1 %v8221_v55 }
0x2cfd   :  { %7439 = vmatprep.subr.bf16.mxu1 %v8236_v58 }
0x2d00   :  { %7441 = vmatpush3.bf16.msra.mxu1 %v8236_v58 }
0x2d01   :  { %7472 = vmatprep.subr.bf16.mxu1 %v8072_v26 }
0x2db6   :  { %v6583_v15 = vpop.f32.mrb[26].mxu1 }
0x2db7   :  { %v2954_v17 = vpop.f32.mrb[27].mxu1  ;;  %v2960_v21 = vadd.f32 %v6583_v15, %v2841_v5 }
0x2db8   :  { %v2955_v19 = vadd.f32 %v2954_v17, %v2841_v5  ;;  %v3310_v17 = vmul.f32 %v3308_v18, %v3306_v7 }
0x2db9   :  { %v2964_v23 = vmul.f32 %v2960_v21, %v2960_v21 }
0x2dba   :  { %6616 = vmatprep.mubr.f32.mxu1 %v2955_v19  ;;  %v2963_v22 = vmul.f32 %v2955_v19, %v2955_v19 }
0x2dbb   :  { %6617 = vmatmul.mubr.f32.vlgmr.msra.gmra.mrb[28].mxu1 %v2960_v21 }
0x2dbc   :  { %6619 = vmatprep.mubr.f32.mxu1 %v2963_v22  ;;  %7474 = vmatpush3.bf16.msra.mxu1 %v8328_v16 }
0x2dbd   :  { %7475 = vmatprep.subr.bf16.mxu1 %v8072_v26 }
0x2dbf   :  { %6620 = vmatmul.mubr.f32.gmra.mrb[30].mxu1 %v2964_v23 }
0x2dc0   :  { %7477 = vmatpush3.bf16.msra.mxu1 %v8333_v20  ;;  %6676 = vmatprep.mubr.msk.f32.mxu1 %vm8073_vm1, %v8074_v43 }
0x2dc1   :  { %7478 = vmatprep.subr.bf16.mxu1 %v8072_v26 }
0x2e8e   :  { %v6618_v27 = vpop.f32.mrb[28].mxu1 }
0x2e8f   :  { %v3031_v1 = vpop.f32.mrb[29].mxu1  ;;  %v3051_v63 = vmul.f32 %v6618_v27, %v6618_v27  ;;  %v3059_v45 = vsub.f32 %v2960_v21, %v6618_v27 }
0x2e90   :  { %v3050_v31 = vmul.f32 %v3031_v1, %v3031_v1  ;;  %v3058_v50 = vsub.f32 %v2955_v19, %v3031_v1 }
0x2e92   :  { %v6621_v42 = vpop.f32.mrb[30].mxu1 }
0x2e93   :  { %v3053_v32 = vsub.f32 %v6621_v42, %v3051_v63  ;;  %v3041_v37 = vpop.f32.mrb[31].mxu1 }
0x2e94   :  { %v3052_v38 = vsub.f32 %v3041_v37, %v3050_v31 }
0x2e95   :  { %v3055_v61 = vadd.f32 1e-05, %v3053_v32 }
0x2e96   :  { %v3054_v39 = vadd.f32 1e-05, %v3052_v38 }
0x2e97   :  { %7847 = vrsqrt.f32 %v3055_v61 }
0x2e98   :  { %7849 = vrsqrt.f32 %v3054_v39 }
0x2ea1   :  { %v7848_v47 = vpop.eup %7847 }
0x2ea2   :  { %v7850_v11 = vpop.eup %7849  ;;  %v3061_v53 = vmul.f32 %v7848_v47, %v3059_v45 }
0x2ea3   :  { %v3060_v56 = vmul.f32 %v7850_v11, %v3058_v50 }
0x2ea4   :  { %v3067_v62 = vmul.f32 %v3065_v35, %v3061_v53 }
0x2ea5   :  { %v3066_v24 = vmul.f32 %v3065_v35, %v3060_v56 }
0x2ea6   :  { %v3073_v12 = vadd.f32 %v3071_v60, %v3067_v62 }
0x2ea7   :  { %v3072_v14 = vadd.f32 %v3071_v60, %v3066_v24 }
0x2ea8   :  { %v3093_v5 = vcombine.high %v3073_v12, %v3073_v12  ;;  %v3100_v15 = vrot.slane %v3073_v12, %v8172_v8 }
0x2ea9   :  { %v3076_v19 = vcombine.high %v3072_v14, %v3072_v14  ;;  %v3083_v30 = vrot.slane %v3072_v14, %v8172_v8 }
0x2eaa   :  { %v3107_v21 = vrot.slane %v3093_v5, %v8172_v8  ;;  %v3108_v22 = vcombine.high %v3100_v15, %v3100_v15  ;;  %v3122_v9 = vmul.f32 %v3100_v15, %v8287_v54  ;;  %v3129_v13 = vmul.f32 %v3100_v15, %v8290_v57 }
0x2eab   :  { %v3090_v23 = vrot.slane %v3076_v19, %v8172_v8  ;;  %v3091_v59 = vcombine.high %v3083_v30, %v3083_v30  ;;  %v3118_v44 = vmul.f32 %v3083_v30, %v8287_v54  ;;  %v3133_v6 = vmul.f32 %v3083_v30, %v8290_v57 }
0x2eac   :  { %v3109_v51 = vcombine.high %v3107_v21, %v3107_v21  ;;  %v3123_v27 = vmul.f32 %v3108_v22, %v8287_v54  ;;  %v3124_v1 = vmul.f32 %v3107_v21, %v8287_v54  ;;  %v3127_v63 = vmul.f32 %v3107_v21, %v8290_v57 }
0x2ead   :  { %v3128_v0 = vmul.f32 %v3108_v22, %v8290_v57  ;;  %v3092_v31 = vcombine.high %v3090_v23, %v3090_v23  ;;  %v3119_v42 = vmul.f32 %v3091_v59, %v8287_v54  ;;  %v3120_v32 = vmul.f32 %v3090_v23, %v8287_v54 }
0x2eae   :  { %v3125_v8 = vmul.f32 %v3109_v51, %v8287_v54  ;;  %v3126_v37 = vmul.f32 %v3109_v51, %v8290_v57  ;;  %v3131_v38 = vmul.f32 %v3090_v23, %v8290_v57  ;;  %v3132_v61 = vmul.f32 %v3091_v59, %v8290_v57 }
0x2eaf   :  { %v3121_v39 = vmul.f32 %v3092_v31, %v8287_v54  ;;  %v3130_v40 = vmul.f32 %v3092_v31, %v8290_v57  ;;  %v3135_v45 = vadd.f32 %v3127_v63, %v3119_v42  ;;  %v3136_v35 = vadd.f32 %v3128_v0, %v3120_v32 }
0x2eb0   :  { %v3134_v47 = vadd.f32 %v3126_v37, %v3118_v44  ;;  %v3139_v50 = vadd.f32 %v3131_v38, %v3123_v27  ;;  %v3140_v11 = vadd.f32 %v3132_v61, %v3124_v1  ;;  %v3141_v53 = vadd.f32 %v3133_v6, %v3125_v8 }
0x2eb1   :  { %v3137_v60 = vadd.f32 %v3129_v13, %v3121_v39  ;;  %v3138_v56 = vadd.f32 %v3130_v40, %v3122_v9  ;;  %3143 = vst [vmem:[#allocation2 + $0x2] sm:$0x3] %v3135_v45  ;;  %3144 = vst [vmem:[#allocation2 + $0x4] sm:$0x3] %v3136_v35  ;;  %v8864_v54 = vrot.slane %v8775_v29, %v603_v2 }
0x2eb2   :  { %3142 = vst [vmem:[#allocation2] sm:$0x3] %v3134_v47  ;;  %3147 = vst [vmem:[#allocation2 + $0xa] sm:$0x3] %v3139_v50  ;;  %v3315_v57 = vmul.f32 %v8840_v28, %v3310_v17  ;;  %v3442_v51 = vrot.slane %v8775_v29, %v726_v36  ;;  %v3451_v42 = vrot.slane %v8775_v29, %v735_v48 }
0x2eb3   :  { %3148 = vst [vmem:[#allocation2 + $0xc] sm:$0x3] %v3140_v11  ;;  %3149 = vst [vmem:[#allocation2 + $0xe] sm:$0x3] %v3141_v53 }
0x2eb4   :  { %3145 = vst [vmem:[#allocation2 + $0x6] sm:$0x3] %v3137_v60  ;;  %3146 = vst [vmem:[#allocation2 + $0x8] sm:$0x3] %v3138_v56  ;;  %v3320_v62 = vadd.f32 %v8864_v54, %v3315_v57 }
0x2eb9   :  { %v3321_v7 = vld [vmem:[#allocation2] sm:$0x3] }
0x2eba   :  { %v3322_v18 = vadd.f32 %v3321_v7, %v3320_v62 }
0x2ebc   :  { %7851 = vtanh.f32 %v3322_v18  ;;  %v5567_v12 = vmul.f32 -1.442695, %v3322_v18 }
0x2ebe   :  { %7853 = vpow2.f32 %v5567_v12 }
0x2ec6   :  { %v7852_v24 = vpop.eup %7851 }
0x2ec7   :  { %3332 = vrot.lane.b32.xlu0 %v7852_v24, %s8075_s3 }
0x2ec8   :  { %v7854_v14 = vpop.eup %7853 }
0x2ec9   :  { %v3326_v5 = vadd.f32 1.0, %v7854_v14 }
0x2ecb   :  { %7855 = vrcp.f32 %v3326_v5 }
0x2ed5   :  { %v7856_v15 = vpop.eup %7855 }
0x2ed6   :  { %v3330_v2 = vmul.f32 0.0, %v7856_v15 }
0x2f39   :  { %v3333_v19 = vpop.permute.xlu0 %3332 }
0x2f3a   :  { %v3335_v30 = vmul.f32 %v7856_v15, %v3333_v19 }
0x2f3c   :  { %3337 = vrot.lane.b32.xlu1 %v3335_v30, %s8067_s1 }
0x2fae   :  { %v3338_v17 = vpop.permute.xlu1 %3337 }
0x2faf   :  { %v8870_v21 = vadd.f32 %v3338_v17, %v3330_v2  ;;  %v3630_v2 = vld [vmem:[#allocation2 + $0x2] sm:$0x3] }
0x2fb1   :  { %v3341_v22 = vmul.f32 %v8870_v21, %v8870_v21 }
0x2fb3   :  { %v3343_v9 = vrot.slane %v3341_v22, 6 }
0x2fb5   :  { %v3345_v13 = vsel %vm512_vm2, %v8870_v21, %v3343_v9 }
0x2fb6   :  { %3347 = vrot.lane.b32.xlu0 %v3345_v13, %s8076_s25 }
0x3028   :  { %v3348_v23 = vpop.permute.xlu0 %3347 }
0x3029   :  { %6677 = vmatmul.mubr.msk.f32.vlgmr.msra.gmra.mrb[32].mxu1 %vm434_vm3, %v3348_v23 }
0x302a   :  { %7480 = vmatpush3.bf16.msra.mxu1 %v8745_v4  ;;  %6687 = vmatprep.mubr.msk.f32.mxu1 %vm8073_vm1, %v8074_v43 }
0x302b   :  { %7481 = vmatprep.subr.bf16.mxu1 %v8072_v26 }
0x302e   :  { %7483 = vmatpush3.bf16.msra.mxu1 %v8748_v10 }
0x302f   :  { %7484 = vmatprep.subr.bf16.mxu1 %v8072_v26 }
0x30fc   :  { %v3417_v59 = vpop.f32.mrb[32].mxu1 }
0x30fd   :  { %v3421_v44 = vmul.f32 %v3417_v59, %v3417_v59  ;;  %3429 = vrot.lane.b32.xlu1 %v3417_v59, %s8067_s1  ;;  %v6678_v6 = vpop.f32.mrb[33].mxu1 }
0x30ff   :  { %v3423_v27 = vrot.slane %v3421_v44, 6 }
0x3101   :  { %v3425_v1 = vsub.f32 %v3417_v59, %v3423_v27  ;;  %3444 = vrot.lane.b32.xlu1 %v3442_v51, %s8067_s1 }
0x3103   :  { %v3426_v63 = vadd.f32 1e-05, %v3425_v1 }
0x3105   :  { %7857 = vrsqrt.f32 %v3426_v63 }
0x310f   :  { %v7858_v0 = vpop.eup %7857 }
0x3110   :  { %v3434_v31 = vrot.slane %v7858_v0, 2 }
0x3112   :  { %3435 = vrot.lane.b32.xlu0 %v3434_v31, %s8067_s1 }
0x3116   :  { %3453 = vrot.lane.b32.xlu0 %v3451_v42, %s8067_s1 }
0x316f   :  { %v3430_v32 = vpop.permute.xlu1 %3429 }
0x3170   :  { %v3432_v8 = vsub.f32 %v8870_v21, %v3430_v32 }
0x3173   :  { %v8895_v37 = vpop.permute.xlu1 %3444 }
0x3184   :  { %v3436_v36 = vpop.permute.xlu0 %3435 }
0x3185   :  { %v3438_v38 = vmul.f32 %v3436_v36, %v3432_v8 }
0x3187   :  { %v3447_v61 = vmul.f32 %v8895_v37, %v3438_v38 }
0x3188   :  { %v8898_v39 = vpop.permute.xlu0 %3453 }
0x3189   :  { %v3456_v40 = vadd.f32 %v8898_v39, %v3447_v61 }
0x318b   :  { %7859 = vtanh.f32 %v3456_v40 }
0x3195   :  { %v7860_v45 = vpop.eup %7859 }
0x3196   :  { %3459 = vrot.lane.b32.xlu1 %v7860_v45, %s8075_s3 }
0x3208   :  { %v3460_v3 = vpop.permute.xlu1 %3459 }
0x3209   :  { %v3462_v48 = vmul.f32 %v7856_v15, %v3460_v3 }
0x320b   :  { %3464 = vrot.lane.b32.xlu0 %v3462_v48, %s8067_s1 }
0x327d   :  { %v3465_v29 = vpop.permute.xlu0 %3464 }
0x327e   :  { %3467 = vst.msk [vmem:[#allocation3] sm:$0x3] %vm752_vm4, %v3465_v29  ;;  %6688 = vmatmul.mubr.msk.f32.vlgmr.msra.gmra.mrb[34].mxu1 %vm434_vm3, %v3465_v29 }
0x327f   :  { %3468 = vst.msk [vmem:[#allocation3 + $0xe] sm:$0x3] %vm755_vm5, %v3465_v29  ;;  %7486 = vmatpush3.bf16.msra.mxu1 %v8179_v33  ;;  %6722 = vmatprep.mubr.msk.f32.mxu1 %vm8073_vm1, %v8074_v43 }
0x3280   :  { %7487 = vmatprep.subr.bf16.mxu1 %v8072_v26 }
0x3283   :  { %7489 = vmatpush3.bf16.msra.mxu1 %v8181_v34 }
0x3284   :  { %7490 = vmatprep.subr.bf16.mxu1 %v8072_v26 }
0x3287   :  { %7492 = vmatpush3.bf16.msra.mxu1 %v8190_v41 }
0x3288   :  { %7493 = vmatprep.subr.bf16.mxu1 %v8072_v26 }
0x328b   :  { %7495 = vmatpush3.bf16.msra.mxu1 %v8200_v46 }
0x328c   :  { %7496 = vmatprep.subr.bf16.mxu1 %v8072_v26 }
0x328f   :  { %7498 = vmatpush3.bf16.msra.mxu1 %v8207_v49 }
0x3290   :  { %7499 = vmatprep.subr.bf16.mxu1 %v8072_v26 }
0x3293   :  { %7501 = vmatpush3.bf16.msra.mxu1 %v8215_v52 }
0x3294   :  { %7502 = vmatprep.subr.bf16.mxu1 %v8072_v26 }
0x3297   :  { %7504 = vmatpush3.bf16.msra.mxu1 %v8221_v55 }
0x3298   :  { %7505 = vmatprep.subr.bf16.mxu1 %v8072_v26 }
0x329b   :  { %7507 = vmatpush3.bf16.msra.mxu1 %v8236_v58 }
0x329c   :  { %7544 = vmatprep.subr.bf16.mxu1 %v8072_v26 }
0x3351   :  { %v3537_v35 = vpop.f32.mrb[34].mxu1 }
0x3352   :  { %v3538_v47 = vadd.f32 %v3537_v35, %v8780_v25  ;;  %v6689_v50 = vpop.f32.mrb[35].mxu1 }
0x3354   :  { %v3541_v11 = vmul.f32 %v3538_v47, %v3538_v47 }
0x3356   :  { %v3543_v53 = vrot.slane %v3541_v11, 6 }
0x3358   :  { %v3545_v60 = vsel %vm512_vm2, %v3538_v47, %v3543_v53 }
0x3359   :  { %6723 = vmatmul.mubr.f32.vlgmr.msra.gmra.mrb[36].mxu1 %v3545_v60 }
0x335a   :  { %7546 = vmatpush3.bf16.msra.mxu1 %v8328_v16  ;;  %6790 = vmatprep.mubr.msk.f32.mxu1 %vm8073_vm1, %v8074_v43 }
0x335b   :  { %7547 = vmatprep.subr.bf16.mxu1 %v8072_v26 }
0x335e   :  { %7549 = vmatpush3.bf16.msra.mxu1 %v8333_v20 }
0x335f   :  { %7550 = vmatprep.subr.bf16.mxu1 %v8072_v26 }
0x342c   :  { %v3612_v56 = vpop.f32.mrb[36].mxu1 }
0x342d   :  { %v3616_v57 = vmul.f32 %v3612_v56, %v3612_v56  ;;  %v6724_v62 = vpop.f32.mrb[37].mxu1  ;;  %v3623_v14 = vsub.f32 %v3538_v47, %v3612_v56 }
0x342f   :  { %v3618_v7 = vrot.slane %v3616_v57, 6 }
0x3431   :  { %v3620_v18 = vsub.f32 %v3612_v56, %v3618_v7 }
0x3433   :  { %v3621_v24 = vadd.f32 1e-05, %v3620_v18 }
0x3435   :  { %7861 = vrsqrt.f32 %v3621_v24 }
0x343f   :  { %v7862_v12 = vpop.eup %7861 }
0x3440   :  { %v3625_v5 = vrot.slane %v7862_v12, 2 }
0x3442   :  { %v3627_v15 = vmul.f32 %v3625_v5, %v3623_v14 }
0x3444   :  { %v3628_v19 = vmul.f32 %v3627_v15, %v8840_v28 }
0x3446   :  { %v3629_v30 = vadd.f32 %v3628_v19, %v8864_v54 }
0x3448   :  { %v3631_v17 = vadd.f32 %v3630_v2, %v3629_v30 }
0x344a   :  { %7863 = vtanh.f32 %v3631_v17  ;;  %v5570_v9 = vmul.f32 -1.442695, %v3631_v17 }
0x344c   :  { %7865 = vpow2.f32 %v5570_v9 }
0x3454   :  { %v7864_v22 = vpop.eup %7863 }
0x3455   :  { %3641 = vrot.lane.b32.xlu1 %v7864_v22, %s8075_s3 }
0x3456   :  { %v7866_v13 = vpop.eup %7865 }
0x3457   :  { %v3635_v23 = vadd.f32 1.0, %v7866_v13 }
0x3459   :  { %7867 = vrcp.f32 %v3635_v23 }
0x3463   :  { %v7868_v59 = vpop.eup %7867 }
0x3464   :  { %v3639_v51 = vmul.f32 %v7868_v59, %v8870_v21 }
0x34c7   :  { %v3642_v44 = vpop.permute.xlu1 %3641 }
0x34c8   :  { %v3644_v6 = vmul.f32 %v7868_v59, %v3642_v44  ;;  %v3923_v44 = vld [vmem:[#allocation2 + $0x4] sm:$0x3] }
0x34ca   :  { %3646 = vrot.lane.b32.xlu0 %v3644_v6, %s8067_s1 }
0x353c   :  { %v3647_v27 = vpop.permute.xlu0 %3646 }
0x353d   :  { %v8937_v1 = vadd.f32 %v3647_v27, %v3639_v51 }
0x353f   :  { %v3650_v63 = vmul.f32 %v8937_v1, %v8937_v1 }
0x3541   :  { %v3652_v0 = vrot.slane %v3650_v63, 6 }
0x3543   :  { %v3654_v31 = vsel %vm512_vm2, %v8937_v1, %v3652_v0 }
0x3544   :  { %3656 = vrot.lane.b32.xlu1 %v3654_v31, %s8076_s25 }
0x35b6   :  { %v3657_v42 = vpop.permute.xlu1 %3656 }
0x35b7   :  { %6734 = vmatmul.mubr.msk.f32.vlgmr.msra.gmra.mrb[32].mxu0 %vm434_vm3, %v3657_v42 }
0x35b8   :  { %7516 = vmatpush3.bf16.msra.mxu0 %v8745_v4  ;;  %6744 = vmatprep.mubr.msk.f32.mxu0 %vm8073_vm1, %v8074_v43 }
0x35b9   :  { %7517 = vmatprep.subr.bf16.mxu0 %v8072_v26 }
0x35bc   :  { %7519 = vmatpush3.bf16.msra.mxu0 %v8748_v10 }
0x35bd   :  { %7520 = vmatprep.subr.bf16.mxu0 %v8072_v26 }
0x368a   :  { %v3726_v21 = vpop.f32.mrb[32].mxu0 }
0x368b   :  { %v3730_v32 = vmul.f32 %v3726_v21, %v3726_v21  ;;  %3738 = vrot.lane.b32.xlu0 %v3726_v21, %s8067_s1  ;;  %v6735_v8 = vpop.f32.mrb[33].mxu0 }
0x368d   :  { %v3732_v36 = vrot.slane %v3730_v32, 6 }
0x368f   :  { %v3734_v38 = vsub.f32 %v3726_v21, %v3732_v36 }
0x3691   :  { %v3735_v61 = vadd.f32 1e-05, %v3734_v38 }
0x3693   :  { %7869 = vrsqrt.f32 %v3735_v61 }
0x369d   :  { %v7870_v40 = vpop.eup %7869 }
0x369e   :  { %v3743_v45 = vrot.slane %v7870_v40, 2 }
0x36a0   :  { %3744 = vrot.lane.b32.xlu1 %v3743_v45, %s8067_s1 }
0x36fd   :  { %v3739_v3 = vpop.permute.xlu0 %3738 }
0x36fe   :  { %v3741_v48 = vsub.f32 %v8937_v1, %v3739_v3 }
0x3712   :  { %v3745_v29 = vpop.permute.xlu1 %3744 }
0x3713   :  { %v3747_v35 = vmul.f32 %v3745_v29, %v3741_v48 }
0x3715   :  { %v3748_v47 = vmul.f32 %v3747_v35, %v8895_v37 }
0x3717   :  { %v3749_v50 = vadd.f32 %v3748_v47, %v8898_v39 }
0x3719   :  { %7871 = vtanh.f32 %v3749_v50 }
0x3723   :  { %v7872_v11 = vpop.eup %7871 }
0x3724   :  { %3752 = vrot.lane.b32.xlu0 %v7872_v11, %s8075_s3 }
0x3796   :  { %v3753_v53 = vpop.permute.xlu0 %3752 }
0x3797   :  { %v3755_v60 = vmul.f32 %v7868_v59, %v3753_v53 }
0x3799   :  { %3757 = vrot.lane.b32.xlu1 %v3755_v60, %s8067_s1 }
0x380b   :  { %v3758_v56 = vpop.permute.xlu1 %3757 }
0x380c   :  { %3760 = vst.msk [vmem:[#allocation3 + $0x2] sm:$0x3] %vm752_vm4, %v3758_v56  ;;  %6745 = vmatmul.mubr.msk.f32.vlgmr.msra.gmra.mrb[34].mxu0 %vm434_vm3, %v3758_v56 }
0x380d   :  { %3761 = vst.msk [vmem:[#allocation3 + $0xc] sm:$0x3] %vm755_vm5, %v3758_v56  ;;  %7522 = vmatpush3.bf16.msra.mxu0 %v8179_v33  ;;  %6779 = vmatprep.mubr.msk.f32.mxu0 %vm8073_vm1, %v8074_v43 }
0x380e   :  { %7523 = vmatprep.subr.bf16.mxu0 %v8072_v26 }
0x3811   :  { %7525 = vmatpush3.bf16.msra.mxu0 %v8181_v34 }
0x3812   :  { %7526 = vmatprep.subr.bf16.mxu0 %v8072_v26 }
0x3815   :  { %7528 = vmatpush3.bf16.msra.mxu0 %v8190_v41 }
0x3816   :  { %7529 = vmatprep.subr.bf16.mxu0 %v8072_v26 }
0x3819   :  { %7531 = vmatpush3.bf16.msra.mxu0 %v8200_v46 }
0x381a   :  { %7532 = vmatprep.subr.bf16.mxu0 %v8072_v26 }
0x381d   :  { %7534 = vmatpush3.bf16.msra.mxu0 %v8207_v49 }
0x381e   :  { %7535 = vmatprep.subr.bf16.mxu0 %v8072_v26 }
0x3821   :  { %7537 = vmatpush3.bf16.msra.mxu0 %v8215_v52 }
0x3822   :  { %7538 = vmatprep.subr.bf16.mxu0 %v8072_v26 }
0x3825   :  { %7540 = vmatpush3.bf16.msra.mxu0 %v8221_v55 }
0x3826   :  { %7541 = vmatprep.subr.bf16.mxu0 %v8072_v26 }
0x3829   :  { %7543 = vmatpush3.bf16.msra.mxu0 %v8236_v58 }
0x382a   :  { %7580 = vmatprep.subr.bf16.mxu0 %v8072_v26 }
0x38df   :  { %v3830_v57 = vpop.f32.mrb[34].mxu0 }
0x38e0   :  { %v3831_v62 = vadd.f32 %v3830_v57, %v8780_v25  ;;  %v6746_v7 = vpop.f32.mrb[35].mxu0 }
0x38e2   :  { %v3834_v18 = vmul.f32 %v3831_v62, %v3831_v62 }
0x38e4   :  { %v3836_v24 = vrot.slane %v3834_v18, 6 }
0x38e6   :  { %v3838_v12 = vsel %vm512_vm2, %v3831_v62, %v3836_v24 }
0x38e7   :  { %6780 = vmatmul.mubr.f32.vlgmr.msra.gmra.mrb[36].mxu0 %v3838_v12 }
0x38e8   :  { %7582 = vmatpush3.bf16.msra.mxu0 %v8328_v16  ;;  %6847 = vmatprep.mubr.msk.f32.mxu0 %vm8073_vm1, %v8074_v43 }
0x38e9   :  { %7583 = vmatprep.subr.bf16.mxu0 %v8072_v26 }
0x38ec   :  { %7585 = vmatpush3.bf16.msra.mxu0 %v8333_v20 }
0x38ed   :  { %7586 = vmatprep.subr.bf16.mxu0 %v8072_v26 }
0x39ba   :  { %v3905_v14 = vpop.f32.mrb[36].mxu0 }
0x39bb   :  { %v3909_v5 = vmul.f32 %v3905_v14, %v3905_v14  ;;  %v6781_v15 = vpop.f32.mrb[37].mxu0  ;;  %v3916_v22 = vsub.f32 %v3831_v62, %v3905_v14 }
0x39bd   :  { %v3911_v19 = vrot.slane %v3909_v5, 6 }
0x39bf   :  { %v3913_v30 = vsub.f32 %v3905_v14, %v3911_v19 }
0x39c1   :  { %v3914_v2 = vadd.f32 1e-05, %v3913_v30 }
0x39c3   :  { %7873 = vrsqrt.f32 %v3914_v2 }
0x39cd   :  { %v7874_v17 = vpop.eup %7873 }
0x39ce   :  { %v3918_v9 = vrot.slane %v7874_v17, 2 }
0x39d0   :  { %v3920_v13 = vmul.f32 %v3918_v9, %v3916_v22 }
0x39d2   :  { %v3921_v23 = vmul.f32 %v3920_v13, %v8840_v28 }
0x39d4   :  { %v3922_v59 = vadd.f32 %v3921_v23, %v8864_v54 }
0x39d6   :  { %v3924_v6 = vadd.f32 %v3923_v44, %v3922_v59 }
0x39d8   :  { %7875 = vtanh.f32 %v3924_v6  ;;  %v5573_v27 = vmul.f32 -1.442695, %v3924_v6 }
0x39da   :  { %7877 = vpow2.f32 %v5573_v27 }
0x39e2   :  { %v7876_v51 = vpop.eup %7875 }
0x39e3   :  { %3934 = vrot.lane.b32.xlu0 %v7876_v51, %s8075_s3 }
0x39e4   :  { %v7878_v63 = vpop.eup %7877 }
0x39e5   :  { %v3928_v0 = vadd.f32 1.0, %v7878_v63 }
0x39e7   :  { %7879 = vrcp.f32 %v3928_v0 }
0x39f1   :  { %v7880_v31 = vpop.eup %7879 }
0x39f2   :  { %v3932_v32 = vmul.f32 %v7880_v31, %v8937_v1 }
0x3a55   :  { %v3935_v42 = vpop.permute.xlu0 %3934 }
0x3a56   :  { %v3937_v21 = vmul.f32 %v7880_v31, %v3935_v42  ;;  %v4216_v42 = vld [vmem:[#allocation2 + $0x6] sm:$0x3] }
0x3a58   :  { %3939 = vrot.lane.b32.xlu1 %v3937_v21, %s8067_s1 }
0x3aca   :  { %v3940_v8 = vpop.permute.xlu1 %3939 }
0x3acb   :  { %v8992_v36 = vadd.f32 %v3940_v8, %v3932_v32 }
0x3acd   :  { %v3943_v38 = vmul.f32 %v8992_v36, %v8992_v36 }
0x3acf   :  { %v3945_v61 = vrot.slane %v3943_v38, 6 }
0x3ad1   :  { %v3947_v40 = vsel %vm512_vm2, %v8992_v36, %v3945_v61 }
0x3ad2   :  { %3949 = vrot.lane.b32.xlu0 %v3947_v40, %s8076_s25 }
0x3b44   :  { %v3950_v45 = vpop.permute.xlu0 %3949 }
0x3b45   :  { %6791 = vmatmul.mubr.msk.f32.vlgmr.msra.gmra.mrb[38].mxu1 %vm434_vm3, %v3950_v45 }
0x3b46   :  { %7552 = vmatpush3.bf16.msra.mxu1 %v8745_v4  ;;  %6801 = vmatprep.mubr.msk.f32.mxu1 %vm8073_vm1, %v8074_v43 }
0x3b47   :  { %7553 = vmatprep.subr.bf16.mxu1 %v8072_v26 }
0x3b4a   :  { %7555 = vmatpush3.bf16.msra.mxu1 %v8748_v10 }
0x3b4b   :  { %7556 = vmatprep.subr.bf16.mxu1 %v8072_v26 }
0x3c18   :  { %v4019_v1 = vpop.f32.mrb[38].mxu1 }
0x3c19   :  { %v4023_v3 = vmul.f32 %v4019_v1, %v4019_v1  ;;  %4031 = vrot.lane.b32.xlu1 %v4019_v1, %s8067_s1  ;;  %v6792_v48 = vpop.f32.mrb[39].mxu1 }
0x3c1b   :  { %v4025_v29 = vrot.slane %v4023_v3, 6 }
0x3c1d   :  { %v4027_v35 = vsub.f32 %v4019_v1, %v4025_v29 }
0x3c1f   :  { %v4028_v47 = vadd.f32 1e-05, %v4027_v35 }
0x3c21   :  { %7881 = vrsqrt.f32 %v4028_v47 }
0x3c2b   :  { %v7882_v50 = vpop.eup %7881 }
0x3c2c   :  { %v4036_v11 = vrot.slane %v7882_v50, 2 }
0x3c2e   :  { %4037 = vrot.lane.b32.xlu0 %v4036_v11, %s8067_s1 }
0x3c8b   :  { %v4032_v53 = vpop.permute.xlu1 %4031 }
0x3c8c   :  { %v4034_v60 = vsub.f32 %v8992_v36, %v4032_v53 }
0x3ca0   :  { %v4038_v56 = vpop.permute.xlu0 %4037 }
0x3ca1   :  { %v4040_v57 = vmul.f32 %v4038_v56, %v4034_v60 }
0x3ca3   :  { %v4041_v62 = vmul.f32 %v4040_v57, %v8895_v37 }
0x3ca5   :  { %v4042_v7 = vadd.f32 %v4041_v62, %v8898_v39 }
0x3ca7   :  { %7883 = vtanh.f32 %v4042_v7 }
0x3cb1   :  { %v7884_v18 = vpop.eup %7883 }
0x3cb2   :  { %4045 = vrot.lane.b32.xlu1 %v7884_v18, %s8075_s3 }
0x3d24   :  { %v4046_v24 = vpop.permute.xlu1 %4045 }
0x3d25   :  { %v4048_v12 = vmul.f32 %v7880_v31, %v4046_v24 }
0x3d27   :  { %4050 = vrot.lane.b32.xlu0 %v4048_v12, %s8067_s1 }
0x3d99   :  { %v4051_v14 = vpop.permute.xlu0 %4050 }
0x3d9a   :  { %4053 = vst.msk [vmem:[#allocation3 + $0x4] sm:$0x3] %vm752_vm4, %v4051_v14  ;;  %6802 = vmatmul.mubr.msk.f32.vlgmr.msra.gmra.mrb[40].mxu1 %vm434_vm3, %v4051_v14 }
0x3d9b   :  { %4054 = vst.msk [vmem:[#allocation3 + $0xa] sm:$0x3] %vm755_vm5, %v4051_v14  ;;  %7558 = vmatpush3.bf16.msra.mxu1 %v8179_v33  ;;  %6836 = vmatprep.mubr.msk.f32.mxu1 %vm8073_vm1, %v8074_v43 }
0x3d9c   :  { %7559 = vmatprep.subr.bf16.mxu1 %v8072_v26 }
0x3d9f   :  { %7561 = vmatpush3.bf16.msra.mxu1 %v8181_v34 }
0x3da0   :  { %7562 = vmatprep.subr.bf16.mxu1 %v8072_v26 }
0x3da3   :  { %7564 = vmatpush3.bf16.msra.mxu1 %v8190_v41 }
0x3da4   :  { %7565 = vmatprep.subr.bf16.mxu1 %v8072_v26 }
0x3da7   :  { %7567 = vmatpush3.bf16.msra.mxu1 %v8200_v46 }
0x3da8   :  { %7568 = vmatprep.subr.bf16.mxu1 %v8072_v26 }
0x3dab   :  { %7570 = vmatpush3.bf16.msra.mxu1 %v8207_v49 }
0x3dac   :  { %7571 = vmatprep.subr.bf16.mxu1 %v8072_v26 }
0x3daf   :  { %7573 = vmatpush3.bf16.msra.mxu1 %v8215_v52 }
0x3db0   :  { %7574 = vmatprep.subr.bf16.mxu1 %v8072_v26 }
0x3db3   :  { %7576 = vmatpush3.bf16.msra.mxu1 %v8221_v55 }
0x3db4   :  { %7577 = vmatprep.subr.bf16.mxu1 %v8072_v26 }
0x3db7   :  { %7579 = vmatpush3.bf16.msra.mxu1 %v8236_v58 }
0x3db8   :  { %7616 = vmatprep.subr.bf16.mxu1 %v8072_v26 }
0x3e6d   :  { %v4123_v5 = vpop.f32.mrb[40].mxu1 }
0x3e6e   :  { %v4124_v15 = vadd.f32 %v4123_v5, %v8780_v25  ;;  %v6803_v19 = vpop.f32.mrb[41].mxu1 }
0x3e70   :  { %v4127_v30 = vmul.f32 %v4124_v15, %v4124_v15 }
0x3e72   :  { %v4129_v2 = vrot.slane %v4127_v30, 6 }
0x3e74   :  { %v4131_v17 = vsel %vm512_vm2, %v4124_v15, %v4129_v2 }
0x3e75   :  { %6837 = vmatmul.mubr.f32.vlgmr.msra.gmra.mrb[42].mxu1 %v4131_v17 }
0x3e76   :  { %7618 = vmatpush3.bf16.msra.mxu1 %v8328_v16  ;;  %6904 = vmatprep.mubr.msk.f32.mxu1 %vm8073_vm1, %v8074_v43 }
0x3e77   :  { %7619 = vmatprep.subr.bf16.mxu1 %v8072_v26 }
0x3e7a   :  { %7621 = vmatpush3.bf16.msra.mxu1 %v8333_v20 }
0x3e7b   :  { %7622 = vmatprep.subr.bf16.mxu1 %v8072_v26 }
0x3f48   :  { %v4198_v22 = vpop.f32.mrb[42].mxu1 }
0x3f49   :  { %v4202_v9 = vmul.f32 %v4198_v22, %v4198_v22  ;;  %v6838_v13 = vpop.f32.mrb[43].mxu1  ;;  %v4209_v51 = vsub.f32 %v4124_v15, %v4198_v22 }
0x3f4b   :  { %v4204_v23 = vrot.slane %v4202_v9, 6 }
0x3f4d   :  { %v4206_v59 = vsub.f32 %v4198_v22, %v4204_v23 }
0x3f4f   :  { %v4207_v44 = vadd.f32 1e-05, %v4206_v59 }
0x3f51   :  { %7885 = vrsqrt.f32 %v4207_v44 }
0x3f5b   :  { %v7886_v6 = vpop.eup %7885 }
0x3f5c   :  { %v4211_v27 = vrot.slane %v7886_v6, 2 }
0x3f5e   :  { %v4213_v63 = vmul.f32 %v4211_v27, %v4209_v51 }
0x3f60   :  { %v4214_v0 = vmul.f32 %v4213_v63, %v8840_v28 }
0x3f62   :  { %v4215_v31 = vadd.f32 %v4214_v0, %v8864_v54 }
0x3f64   :  { %v4217_v21 = vadd.f32 %v4216_v42, %v4215_v31 }
0x3f66   :  { %7887 = vtanh.f32 %v4217_v21  ;;  %v5576_v8 = vmul.f32 -1.442695, %v4217_v21 }
0x3f68   :  { %7889 = vpow2.f32 %v5576_v8 }
0x3f70   :  { %v7888_v32 = vpop.eup %7887 }
0x3f71   :  { %4227 = vrot.lane.b32.xlu1 %v7888_v32, %s8075_s3 }
0x3f72   :  { %v7890_v38 = vpop.eup %7889 }
0x3f73   :  { %v4221_v61 = vadd.f32 1.0, %v7890_v38 }
0x3f75   :  { %7891 = vrcp.f32 %v4221_v61 }
0x3f7f   :  { %v7892_v40 = vpop.eup %7891 }
0x3f80   :  { %v4225_v3 = vmul.f32 %v7892_v40, %v8992_v36 }
0x3fe3   :  { %v4228_v45 = vpop.permute.xlu1 %4227 }
0x3fe4   :  { %v4230_v1 = vmul.f32 %v7892_v40, %v4228_v45  ;;  %v4509_v45 = vld [vmem:[#allocation2 + $0x8] sm:$0x3] }
0x3fe6   :  { %4232 = vrot.lane.b32.xlu0 %v4230_v1, %s8067_s1 }
0x4058   :  { %v4233_v48 = vpop.permute.xlu0 %4232 }
0x4059   :  { %v9047_v29 = vadd.f32 %v4233_v48, %v4225_v3 }
0x405b   :  { %v4236_v35 = vmul.f32 %v9047_v29, %v9047_v29 }
0x405d   :  { %v4238_v47 = vrot.slane %v4236_v35, 6 }
0x405f   :  { %v4240_v50 = vsel %vm512_vm2, %v9047_v29, %v4238_v47 }
0x4060   :  { %4242 = vrot.lane.b32.xlu1 %v4240_v50, %s8076_s25 }
0x40d2   :  { %v4243_v11 = vpop.permute.xlu1 %4242 }
0x40d3   :  { %6848 = vmatmul.mubr.msk.f32.vlgmr.msra.gmra.mrb[38].mxu0 %vm434_vm3, %v4243_v11 }
0x40d4   :  { %7588 = vmatpush3.bf16.msra.mxu0 %v8745_v4  ;;  %6858 = vmatprep.mubr.msk.f32.mxu0 %vm8073_vm1, %v8074_v43 }
0x40d5   :  { %7589 = vmatprep.subr.bf16.mxu0 %v8072_v26 }
0x40d8   :  { %7591 = vmatpush3.bf16.msra.mxu0 %v8748_v10 }
0x40d9   :  { %7592 = vmatprep.subr.bf16.mxu0 %v8072_v26 }
0x41a6   :  { %v4312_v36 = vpop.f32.mrb[38].mxu0 }
0x41a7   :  { %v4316_v53 = vmul.f32 %v4312_v36, %v4312_v36  ;;  %4324 = vrot.lane.b32.xlu0 %v4312_v36, %s8067_s1  ;;  %v6849_v60 = vpop.f32.mrb[39].mxu0 }
0x41a9   :  { %v4318_v56 = vrot.slane %v4316_v53, 6 }
0x41ab   :  { %v4320_v57 = vsub.f32 %v4312_v36, %v4318_v56 }
0x41ad   :  { %v4321_v62 = vadd.f32 1e-05, %v4320_v57 }
0x41af   :  { %7893 = vrsqrt.f32 %v4321_v62 }
0x41b9   :  { %v7894_v7 = vpop.eup %7893 }
0x41ba   :  { %v4329_v18 = vrot.slane %v7894_v7, 2 }
0x41bc   :  { %4330 = vrot.lane.b32.xlu1 %v4329_v18, %s8067_s1 }
0x4219   :  { %v4325_v24 = vpop.permute.xlu0 %4324 }
0x421a   :  { %v4327_v12 = vsub.f32 %v9047_v29, %v4325_v24 }
0x422e   :  { %v4331_v14 = vpop.permute.xlu1 %4330 }
0x422f   :  { %v4333_v5 = vmul.f32 %v4331_v14, %v4327_v12 }
0x4231   :  { %v4334_v15 = vmul.f32 %v4333_v5, %v8895_v37 }
0x4233   :  { %v4335_v19 = vadd.f32 %v4334_v15, %v8898_v39 }
0x4235   :  { %7895 = vtanh.f32 %v4335_v19 }
0x423f   :  { %v7896_v30 = vpop.eup %7895 }
0x4240   :  { %4338 = vrot.lane.b32.xlu0 %v7896_v30, %s8075_s3 }
0x42b2   :  { %v4339_v2 = vpop.permute.xlu0 %4338 }
0x42b3   :  { %v4341_v17 = vmul.f32 %v7892_v40, %v4339_v2 }
0x42b5   :  { %4343 = vrot.lane.b32.xlu1 %v4341_v17, %s8067_s1 }
0x4327   :  { %v4344_v22 = vpop.permute.xlu1 %4343 }
0x4328   :  { %4346 = vst.msk [vmem:[#allocation3 + $0x6] sm:$0x3] %vm752_vm4, %v4344_v22  ;;  %6859 = vmatmul.mubr.msk.f32.vlgmr.msra.gmra.mrb[40].mxu0 %vm434_vm3, %v4344_v22 }
0x4329   :  { %4347 = vst.msk [vmem:[#allocation3 + $0x8] sm:$0x3] %vm755_vm5, %v4344_v22  ;;  %7594 = vmatpush3.bf16.msra.mxu0 %v8179_v33  ;;  %6893 = vmatprep.mubr.msk.f32.mxu0 %vm8073_vm1, %v8074_v43 }
0x432a   :  { %7595 = vmatprep.subr.bf16.mxu0 %v8072_v26 }
0x432d   :  { %7597 = vmatpush3.bf16.msra.mxu0 %v8181_v34 }
0x432e   :  { %7598 = vmatprep.subr.bf16.mxu0 %v8072_v26 }
0x4331   :  { %7600 = vmatpush3.bf16.msra.mxu0 %v8190_v41 }
0x4332   :  { %7601 = vmatprep.subr.bf16.mxu0 %v8072_v26 }
0x4335   :  { %7603 = vmatpush3.bf16.msra.mxu0 %v8200_v46 }
0x4336   :  { %7604 = vmatprep.subr.bf16.mxu0 %v8072_v26 }
0x4339   :  { %7606 = vmatpush3.bf16.msra.mxu0 %v8207_v49 }
0x433a   :  { %7607 = vmatprep.subr.bf16.mxu0 %v8072_v26 }
0x433d   :  { %7609 = vmatpush3.bf16.msra.mxu0 %v8215_v52 }
0x433e   :  { %7610 = vmatprep.subr.bf16.mxu0 %v8072_v26 }
0x4341   :  { %7612 = vmatpush3.bf16.msra.mxu0 %v8221_v55 }
0x4342   :  { %7613 = vmatprep.subr.bf16.mxu0 %v8072_v26 }
0x4345   :  { %7615 = vmatpush3.bf16.msra.mxu0 %v8236_v58 }
0x4346   :  { %7652 = vmatprep.subr.bf16.mxu0 %v8072_v26 }
0x43fb   :  { %v4416_v9 = vpop.f32.mrb[40].mxu0 }
0x43fc   :  { %v4417_v13 = vadd.f32 %v4416_v9, %v8780_v25  ;;  %v6860_v23 = vpop.f32.mrb[41].mxu0 }
0x43fe   :  { %v4420_v59 = vmul.f32 %v4417_v13, %v4417_v13 }
0x4400   :  { %v4422_v44 = vrot.slane %v4420_v59, 6 }
0x4402   :  { %v4424_v6 = vsel %vm512_vm2, %v4417_v13, %v4422_v44 }
0x4403   :  { %6894 = vmatmul.mubr.f32.vlgmr.msra.gmra.mrb[42].mxu0 %v4424_v6 }
0x4404   :  { %7654 = vmatpush3.bf16.msra.mxu0 %v8328_v16  ;;  %6961 = vmatprep.mubr.msk.f32.mxu0 %vm8073_vm1, %v8074_v43 }
0x4405   :  { %7655 = vmatprep.subr.bf16.mxu0 %v8072_v26 }
0x4408   :  { %7657 = vmatpush3.bf16.msra.mxu0 %v8333_v20 }
0x4409   :  { %7658 = vmatprep.subr.bf16.mxu0 %v8072_v26 }
0x44d6   :  { %v4491_v51 = vpop.f32.mrb[42].mxu0 }
0x44d7   :  { %v4495_v27 = vmul.f32 %v4491_v51, %v4491_v51  ;;  %v6895_v63 = vpop.f32.mrb[43].mxu0  ;;  %v4502_v32 = vsub.f32 %v4417_v13, %v4491_v51 }
0x44d9   :  { %v4497_v0 = vrot.slane %v4495_v27, 6 }
0x44db   :  { %v4499_v31 = vsub.f32 %v4491_v51, %v4497_v0 }
0x44dd   :  { %v4500_v42 = vadd.f32 1e-05, %v4499_v31 }
0x44df   :  { %7897 = vrsqrt.f32 %v4500_v42 }
0x44e9   :  { %v7898_v21 = vpop.eup %7897 }
0x44ea   :  { %v4504_v8 = vrot.slane %v7898_v21, 2 }
0x44ec   :  { %v4506_v38 = vmul.f32 %v4504_v8, %v4502_v32 }
0x44ee   :  { %v4507_v61 = vmul.f32 %v4506_v38, %v8840_v28 }
0x44f0   :  { %v4508_v40 = vadd.f32 %v4507_v61, %v8864_v54 }
0x44f2   :  { %v4510_v1 = vadd.f32 %v4509_v45, %v4508_v40 }
0x44f4   :  { %7899 = vtanh.f32 %v4510_v1  ;;  %v5579_v48 = vmul.f32 -1.442695, %v4510_v1 }
0x44f6   :  { %7901 = vpow2.f32 %v5579_v48 }
0x44fe   :  { %v7900_v3 = vpop.eup %7899 }
0x44ff   :  { %4520 = vrot.lane.b32.xlu0 %v7900_v3, %s8075_s3 }
0x4500   :  { %v7902_v35 = vpop.eup %7901 }
0x4501   :  { %v4514_v47 = vadd.f32 1.0, %v7902_v35 }
0x4503   :  { %7903 = vrcp.f32 %v4514_v47 }
0x450d   :  { %v7904_v50 = vpop.eup %7903 }
0x450e   :  { %v4518_v53 = vmul.f32 %v7904_v50, %v9047_v29 }
0x4571   :  { %v4521_v11 = vpop.permute.xlu0 %4520 }
0x4572   :  { %v4523_v36 = vmul.f32 %v7904_v50, %v4521_v11  ;;  %v4802_v11 = vld [vmem:[#allocation2 + $0xa] sm:$0x3] }
0x4574   :  { %4525 = vrot.lane.b32.xlu1 %v4523_v36, %s8067_s1 }
0x45e6   :  { %v4526_v60 = vpop.permute.xlu1 %4525 }
0x45e7   :  { %v9102_v56 = vadd.f32 %v4526_v60, %v4518_v53 }
0x45e9   :  { %v4529_v57 = vmul.f32 %v9102_v56, %v9102_v56 }
0x45eb   :  { %v4531_v62 = vrot.slane %v4529_v57, 6 }
0x45ed   :  { %v4533_v7 = vsel %vm512_vm2, %v9102_v56, %v4531_v62 }
0x45ee   :  { %4535 = vrot.lane.b32.xlu0 %v4533_v7, %s8076_s25 }
0x4660   :  { %v4536_v18 = vpop.permute.xlu0 %4535 }
0x4661   :  { %6905 = vmatmul.mubr.msk.f32.vlgmr.msra.gmra.mrb[44].mxu1 %vm434_vm3, %v4536_v18 }
0x4662   :  { %7624 = vmatpush3.bf16.msra.mxu1 %v8745_v4  ;;  %6915 = vmatprep.mubr.msk.f32.mxu1 %vm8073_vm1, %v8074_v43 }
0x4663   :  { %7625 = vmatprep.subr.bf16.mxu1 %v8072_v26 }
0x4666   :  { %7627 = vmatpush3.bf16.msra.mxu1 %v8748_v10 }
0x4667   :  { %7628 = vmatprep.subr.bf16.mxu1 %v8072_v26 }
0x4734   :  { %v4605_v29 = vpop.f32.mrb[44].mxu1 }
0x4735   :  { %v4609_v24 = vmul.f32 %v4605_v29, %v4605_v29  ;;  %4617 = vrot.lane.b32.xlu1 %v4605_v29, %s8067_s1  ;;  %v6906_v12 = vpop.f32.mrb[45].mxu1 }
0x4737   :  { %v4611_v14 = vrot.slane %v4609_v24, 6 }
0x4739   :  { %v4613_v5 = vsub.f32 %v4605_v29, %v4611_v14 }
0x473b   :  { %v4614_v15 = vadd.f32 1e-05, %v4613_v5 }
0x473d   :  { %7905 = vrsqrt.f32 %v4614_v15 }
0x4747   :  { %v7906_v19 = vpop.eup %7905 }
0x4748   :  { %v4622_v30 = vrot.slane %v7906_v19, 2 }
0x474a   :  { %4623 = vrot.lane.b32.xlu0 %v4622_v30, %s8067_s1 }
0x47a7   :  { %v4618_v2 = vpop.permute.xlu1 %4617 }
0x47a8   :  { %v4620_v17 = vsub.f32 %v9102_v56, %v4618_v2 }
0x47bc   :  { %v4624_v22 = vpop.permute.xlu0 %4623 }
0x47bd   :  { %v4626_v9 = vmul.f32 %v4624_v22, %v4620_v17 }
0x47bf   :  { %v4627_v13 = vmul.f32 %v4626_v9, %v8895_v37 }
0x47c1   :  { %v4628_v23 = vadd.f32 %v4627_v13, %v8898_v39 }
0x47c3   :  { %7907 = vtanh.f32 %v4628_v23 }
0x47cd   :  { %v7908_v59 = vpop.eup %7907 }
0x47ce   :  { %4631 = vrot.lane.b32.xlu1 %v7908_v59, %s8075_s3 }
0x4840   :  { %v4632_v44 = vpop.permute.xlu1 %4631 }
0x4841   :  { %v4634_v6 = vmul.f32 %v7904_v50, %v4632_v44 }
0x4843   :  { %4636 = vrot.lane.b32.xlu0 %v4634_v6, %s8067_s1 }
0x48b5   :  { %v4637_v51 = vpop.permute.xlu0 %4636 }
0x48b6   :  { %4639 = vst.msk [vmem:[#allocation3 + $0x8] sm:$0x3] %vm752_vm4, %v4637_v51  ;;  %6916 = vmatmul.mubr.msk.f32.vlgmr.msra.gmra.mrb[46].mxu1 %vm434_vm3, %v4637_v51 }
0x48b7   :  { %4640 = vst.msk [vmem:[#allocation3 + $0x6] sm:$0x3] %vm755_vm5, %v4637_v51  ;;  %7630 = vmatpush3.bf16.msra.mxu1 %v8179_v33  ;;  %6950 = vmatprep.mubr.msk.f32.mxu1 %vm8073_vm1, %v8074_v43 }
0x48b8   :  { %7631 = vmatprep.subr.bf16.mxu1 %v8072_v26 }
0x48bb   :  { %7633 = vmatpush3.bf16.msra.mxu1 %v8181_v34 }
0x48bc   :  { %7634 = vmatprep.subr.bf16.mxu1 %v8072_v26 }
0x48bf   :  { %7636 = vmatpush3.bf16.msra.mxu1 %v8190_v41 }
0x48c0   :  { %7637 = vmatprep.subr.bf16.mxu1 %v8072_v26 }
0x48c3   :  { %7639 = vmatpush3.bf16.msra.mxu1 %v8200_v46 }
0x48c4   :  { %7640 = vmatprep.subr.bf16.mxu1 %v8072_v26 }
0x48c7   :  { %7642 = vmatpush3.bf16.msra.mxu1 %v8207_v49 }
0x48c8   :  { %7643 = vmatprep.subr.bf16.mxu1 %v8072_v26 }
0x48cb   :  { %7645 = vmatpush3.bf16.msra.mxu1 %v8215_v52 }
0x48cc   :  { %7646 = vmatprep.subr.bf16.mxu1 %v8072_v26 }
0x48cf   :  { %7648 = vmatpush3.bf16.msra.mxu1 %v8221_v55 }
0x48d0   :  { %7649 = vmatprep.subr.bf16.mxu1 %v8072_v26 }
0x48d3   :  { %7651 = vmatpush3.bf16.msra.mxu1 %v8236_v58 }
0x48d4   :  { %7688 = vmatprep.subr.bf16.mxu1 %v8072_v26 }
0x4989   :  { %v4709_v27 = vpop.f32.mrb[46].mxu1 }
0x498a   :  { %v4710_v63 = vadd.f32 %v4709_v27, %v8780_v25  ;;  %v6917_v0 = vpop.f32.mrb[47].mxu1 }
0x498c   :  { %v4713_v31 = vmul.f32 %v4710_v63, %v4710_v63 }
0x498e   :  { %v4715_v42 = vrot.slane %v4713_v31, 6 }
0x4990   :  { %v4717_v21 = vsel %vm512_vm2, %v4710_v63, %v4715_v42 }
0x4991   :  { %6951 = vmatmul.mubr.f32.vlgmr.msra.gmra.mrb[48].mxu1 %v4717_v21 }
0x4992   :  { %7690 = vmatpush3.bf16.msra.mxu1 %v8328_v16  ;;  %7018 = vmatprep.mubr.msk.f32.mxu1 %vm8073_vm1, %v8074_v43 }
0x4993   :  { %7691 = vmatprep.subr.bf16.mxu1 %v8072_v26 }
0x4996   :  { %7693 = vmatpush3.bf16.msra.mxu1 %v8333_v20 }
0x4997   :  { %7694 = vmatprep.subr.bf16.mxu1 %v8072_v26 }
0x4a64   :  { %v4784_v32 = vpop.f32.mrb[48].mxu1 }
0x4a65   :  { %v4788_v8 = vmul.f32 %v4784_v32, %v4784_v32  ;;  %v6952_v38 = vpop.f32.mrb[49].mxu1  ;;  %v4795_v3 = vsub.f32 %v4710_v63, %v4784_v32 }
0x4a67   :  { %v4790_v61 = vrot.slane %v4788_v8, 6 }
0x4a69   :  { %v4792_v40 = vsub.f32 %v4784_v32, %v4790_v61 }
0x4a6b   :  { %v4793_v45 = vadd.f32 1e-05, %v4792_v40 }
0x4a6d   :  { %7909 = vrsqrt.f32 %v4793_v45 }
0x4a77   :  { %v7910_v1 = vpop.eup %7909 }
0x4a78   :  { %v4797_v48 = vrot.slane %v7910_v1, 2 }
0x4a7a   :  { %v4799_v35 = vmul.f32 %v4797_v48, %v4795_v3 }
0x4a7c   :  { %v4800_v47 = vmul.f32 %v4799_v35, %v8840_v28 }
0x4a7e   :  { %v4801_v50 = vadd.f32 %v4800_v47, %v8864_v54 }
0x4a80   :  { %v4803_v36 = vadd.f32 %v4802_v11, %v4801_v50 }
0x4a82   :  { %7911 = vtanh.f32 %v4803_v36  ;;  %v5582_v60 = vmul.f32 -1.442695, %v4803_v36 }
0x4a84   :  { %7913 = vpow2.f32 %v5582_v60 }
0x4a8c   :  { %v7912_v53 = vpop.eup %7911 }
0x4a8d   :  { %4813 = vrot.lane.b32.xlu1 %v7912_v53, %s8075_s3 }
0x4a8e   :  { %v7914_v57 = vpop.eup %7913 }
0x4a8f   :  { %v4807_v62 = vadd.f32 1.0, %v7914_v57 }
0x4a91   :  { %7915 = vrcp.f32 %v4807_v62 }
0x4a9b   :  { %v7916_v7 = vpop.eup %7915 }
0x4a9c   :  { %v4811_v24 = vmul.f32 %v7916_v7, %v9102_v56 }
0x4aff   :  { %v4814_v18 = vpop.permute.xlu1 %4813 }
0x4b00   :  { %v4816_v29 = vmul.f32 %v7916_v7, %v4814_v18 }
0x4b02   :  { %4818 = vrot.lane.b32.xlu0 %v4816_v29, %s8067_s1 }
0x4b74   :  { %v4819_v12 = vpop.permute.xlu0 %4818 }
0x4b75   :  { %v9157_v14 = vadd.f32 %v4819_v12, %v4811_v24 }
0x4b77   :  { %v4822_v5 = vmul.f32 %v9157_v14, %v9157_v14 }
0x4b79   :  { %v4824_v15 = vrot.slane %v4822_v5, 6 }
0x4b7b   :  { %v4826_v19 = vsel %vm512_vm2, %v9157_v14, %v4824_v15 }
0x4b7c   :  { %4828 = vrot.lane.b32.xlu1 %v4826_v19, %s8076_s25 }
0x4bee   :  { %v4829_v30 = vpop.permute.xlu1 %4828 }
0x4bef   :  { %6962 = vmatmul.mubr.msk.f32.vlgmr.msra.gmra.mrb[44].mxu0 %vm434_vm3, %v4829_v30 }
0x4bf0   :  { %7660 = vmatpush3.bf16.msra.mxu0 %v8745_v4  ;;  %6972 = vmatprep.mubr.msk.f32.mxu0 %vm8073_vm1, %v8074_v43 }
0x4bf1   :  { %7661 = vmatprep.subr.bf16.mxu0 %v8072_v26 }
0x4bf4   :  { %7663 = vmatpush3.bf16.msra.mxu0 %v8748_v10 }
0x4bf5   :  { %7664 = vmatprep.subr.bf16.mxu0 %v8072_v26 }
0x4cc2   :  { %v4898_v56 = vpop.f32.mrb[44].mxu0 }
0x4cc3   :  { %v4902_v2 = vmul.f32 %v4898_v56, %v4898_v56  ;;  %4910 = vrot.lane.b32.xlu0 %v4898_v56, %s8067_s1  ;;  %v6963_v17 = vpop.f32.mrb[45].mxu0 }
0x4cc5   :  { %v4904_v22 = vrot.slane %v4902_v2, 6 }
0x4cc7   :  { %v4906_v9 = vsub.f32 %v4898_v56, %v4904_v22 }
0x4cc9   :  { %v4907_v13 = vadd.f32 1e-05, %v4906_v9 }
0x4ccb   :  { %7917 = vrsqrt.f32 %v4907_v13 }
0x4cd5   :  { %v7918_v23 = vpop.eup %7917 }
0x4cd6   :  { %v4915_v59 = vrot.slane %v7918_v23, 2 }
0x4cd8   :  { %4916 = vrot.lane.b32.xlu1 %v4915_v59, %s8067_s1 }
0x4d35   :  { %v4911_v44 = vpop.permute.xlu0 %4910 }
0x4d36   :  { %v4913_v6 = vsub.f32 %v9157_v14, %v4911_v44 }
0x4d4a   :  { %v4917_v51 = vpop.permute.xlu1 %4916 }
0x4d4b   :  { %v4919_v27 = vmul.f32 %v4917_v51, %v4913_v6 }
0x4d4d   :  { %v4920_v63 = vmul.f32 %v4919_v27, %v8895_v37 }
0x4d4f   :  { %v4921_v0 = vadd.f32 %v4920_v63, %v8898_v39 }
0x4d51   :  { %7919 = vtanh.f32 %v4921_v0 }
0x4d5b   :  { %v7920_v31 = vpop.eup %7919 }
0x4d5c   :  { %4924 = vrot.lane.b32.xlu0 %v7920_v31, %s8075_s3 }
0x4dce   :  { %v4925_v42 = vpop.permute.xlu0 %4924 }
0x4dcf   :  { %v4927_v21 = vmul.f32 %v7916_v7, %v4925_v42  ;;  %v5095_v7 = vld [vmem:[#allocation2 + $0xc] sm:$0x3] }
0x4dd1   :  { %4929 = vrot.lane.b32.xlu1 %v4927_v21, %s8067_s1 }
0x4e43   :  { %v4930_v32 = vpop.permute.xlu1 %4929 }
0x4e44   :  { %4932 = vst.msk [vmem:[#allocation3 + $0xa] sm:$0x3] %vm752_vm4, %v4930_v32  ;;  %6973 = vmatmul.mubr.msk.f32.vlgmr.msra.gmra.mrb[46].mxu0 %vm434_vm3, %v4930_v32 }
0x4e45   :  { %4933 = vst.msk [vmem:[#allocation3 + $0x4] sm:$0x3] %vm755_vm5, %v4930_v32  ;;  %7666 = vmatpush3.bf16.msra.mxu0 %v8179_v33  ;;  %7007 = vmatprep.mubr.msk.f32.mxu0 %vm8073_vm1, %v8074_v43 }
0x4e46   :  { %7667 = vmatprep.subr.bf16.mxu0 %v8072_v26 }
0x4e49   :  { %7669 = vmatpush3.bf16.msra.mxu0 %v8181_v34 }
0x4e4a   :  { %7670 = vmatprep.subr.bf16.mxu0 %v8072_v26 }
0x4e4d   :  { %7672 = vmatpush3.bf16.msra.mxu0 %v8190_v41 }
0x4e4e   :  { %7673 = vmatprep.subr.bf16.mxu0 %v8072_v26 }
0x4e51   :  { %7675 = vmatpush3.bf16.msra.mxu0 %v8200_v46 }
0x4e52   :  { %7676 = vmatprep.subr.bf16.mxu0 %v8072_v26 }
0x4e55   :  { %7678 = vmatpush3.bf16.msra.mxu0 %v8207_v49 }
0x4e56   :  { %7679 = vmatprep.subr.bf16.mxu0 %v8072_v26 }
0x4e59   :  { %7681 = vmatpush3.bf16.msra.mxu0 %v8215_v52 }
0x4e5a   :  { %7682 = vmatprep.subr.bf16.mxu0 %v8072_v26 }
0x4e5d   :  { %7684 = vmatpush3.bf16.msra.mxu0 %v8221_v55 }
0x4e5e   :  { %7685 = vmatprep.subr.bf16.mxu0 %v8072_v26 }
0x4e61   :  { %7687 = vmatpush3.bf16.msra.mxu0 %v8236_v58 }
0x4e62   :  { %7724 = vmatprep.subr.bf16.mxu0 %v8072_v26 }
0x4f17   :  { %v5002_v8 = vpop.f32.mrb[46].mxu0 }
0x4f18   :  { %v5003_v38 = vadd.f32 %v5002_v8, %v8780_v25  ;;  %v6974_v61 = vpop.f32.mrb[47].mxu0 }
0x4f1a   :  { %v5006_v40 = vmul.f32 %v5003_v38, %v5003_v38 }
0x4f1c   :  { %v5008_v45 = vrot.slane %v5006_v40, 6 }
0x4f1e   :  { %v5010_v1 = vsel %vm512_vm2, %v5003_v38, %v5008_v45 }
0x4f1f   :  { %7008 = vmatmul.mubr.f32.vlgmr.msra.gmra.mrb[48].mxu0 %v5010_v1 }
0x4f20   :  { %7726 = vmatpush3.bf16.msra.mxu0 %v8328_v16  ;;  %7075 = vmatprep.mubr.msk.f32.mxu0 %vm8073_vm1, %v8074_v43 }
0x4f21   :  { %7727 = vmatprep.subr.bf16.mxu0 %v8072_v26 }
0x4f24   :  { %7729 = vmatpush3.bf16.msra.mxu0 %v8333_v20 }
0x4ff2   :  { %v5077_v3 = vpop.f32.mrb[48].mxu0 }
0x4ff3   :  { %v5081_v48 = vmul.f32 %v5077_v3, %v5077_v3  ;;  %v7009_v35 = vpop.f32.mrb[49].mxu0  ;;  %v5088_v53 = vsub.f32 %v5003_v38, %v5077_v3 }
0x4ff5   :  { %v5083_v47 = vrot.slane %v5081_v48, 6 }
0x4ff7   :  { %v5085_v50 = vsub.f32 %v5077_v3, %v5083_v47 }
0x4ff9   :  { %v5086_v11 = vadd.f32 1e-05, %v5085_v50  ;;  %v5388_v50 = vld [vmem:[#allocation2 + $0xe] sm:$0x3] }
0x4ffb   :  { %7921 = vrsqrt.f32 %v5086_v11 }
0x5005   :  { %v7922_v36 = vpop.eup %7921 }
0x5006   :  { %v5090_v60 = vrot.slane %v7922_v36, 2 }
0x5008   :  { %v5092_v57 = vmul.f32 %v5090_v60, %v5088_v53 }
0x500a   :  { %v5093_v16 = vmul.f32 %v5092_v57, %v8840_v28 }
0x500c   :  { %v5094_v62 = vadd.f32 %v5093_v16, %v8864_v54 }
0x500e   :  { %v5096_v18 = vadd.f32 %v5095_v7, %v5094_v62 }
0x5010   :  { %7923 = vtanh.f32 %v5096_v18  ;;  %v5585_v20 = vmul.f32 -1.442695, %v5096_v18 }
0x5012   :  { %7925 = vpow2.f32 %v5585_v20 }
0x501a   :  { %v7924_v29 = vpop.eup %7923 }
0x501b   :  { %5106 = vrot.lane.b32.xlu0 %v7924_v29, %s8075_s3 }
0x501c   :  { %v7926_v24 = vpop.eup %7925 }
0x501d   :  { %v5100_v12 = vadd.f32 1.0, %v7926_v24 }
0x501f   :  { %7927 = vrcp.f32 %v5100_v12 }
0x5029   :  { %v7928_v5 = vpop.eup %7927 }
0x502a   :  { %v5104_v30 = vmul.f32 %v7928_v5, %v9157_v14 }
0x508d   :  { %v5107_v15 = vpop.permute.xlu0 %5106 }
0x508e   :  { %v5109_v19 = vmul.f32 %v7928_v5, %v5107_v15 }
0x5090   :  { %5111 = vrot.lane.b32.xlu1 %v5109_v19, %s8067_s1 }
0x5102   :  { %v5112_v56 = vpop.permute.xlu1 %5111 }
0x5103   :  { %v9211_v2 = vadd.f32 %v5112_v56, %v5104_v30 }
0x5105   :  { %v5115_v17 = vmul.f32 %v9211_v2, %v9211_v2 }
0x5107   :  { %v5117_v22 = vrot.slane %v5115_v17, 6 }
0x5109   :  { %v5119_v9 = vsel %vm512_vm2, %v9211_v2, %v5117_v22 }
0x510a   :  { %5121 = vrot.lane.b32.xlu0 %v5119_v9, %s8076_s25 }
0x517c   :  { %v5122_v13 = vpop.permute.xlu0 %5121 }
0x517d   :  { %7019 = vmatmul.mubr.msk.f32.vlgmr.msra.gmra.mrb[50].mxu1 %vm434_vm3, %v5122_v13 }
0x517e   :  { %7696 = vmatpush3.bf16.msra.mxu1 %v8745_v4  ;;  %7029 = vmatprep.mubr.msk.f32.mxu1 %vm8073_vm1, %v8074_v43 }
0x517f   :  { %7697 = vmatprep.subr.bf16.mxu1 %v8072_v26 }
0x5182   :  { %7699 = vmatpush3.bf16.msra.mxu1 %v8748_v10 }
0x5183   :  { %7700 = vmatprep.subr.bf16.mxu1 %v8072_v26 }
0x5250   :  { %v5191_v14 = vpop.f32.mrb[50].mxu1 }
0x5251   :  { %v5195_v23 = vmul.f32 %v5191_v14, %v5191_v14  ;;  %5203 = vrot.lane.b32.xlu1 %v5191_v14, %s8067_s1  ;;  %v7020_v59 = vpop.f32.mrb[51].mxu1 }
0x5253   :  { %v5197_v44 = vrot.slane %v5195_v23, 6 }
0x5255   :  { %v5199_v6 = vsub.f32 %v5191_v14, %v5197_v44 }
0x5257   :  { %v5200_v51 = vadd.f32 1e-05, %v5199_v6 }
0x5259   :  { %7929 = vrsqrt.f32 %v5200_v51 }
0x5263   :  { %v7930_v27 = vpop.eup %7929 }
0x5264   :  { %v5208_v4 = vrot.slane %v7930_v27, 2 }
0x5266   :  { %5209 = vrot.lane.b32.xlu0 %v5208_v4, %s8067_s1 }
0x52c3   :  { %v5204_v63 = vpop.permute.xlu1 %5203 }
0x52c4   :  { %v5206_v0 = vsub.f32 %v9211_v2, %v5204_v63 }
0x52d8   :  { %v5210_v31 = vpop.permute.xlu0 %5209 }
0x52d9   :  { %v5212_v10 = vmul.f32 %v5210_v31, %v5206_v0 }
0x52db   :  { %v5213_v42 = vmul.f32 %v5212_v10, %v8895_v37 }
0x52dd   :  { %v5214_v21 = vadd.f32 %v5213_v42, %v8898_v39 }
0x52df   :  { %7931 = vtanh.f32 %v5214_v21 }
0x52e9   :  { %v7932_v32 = vpop.eup %7931 }
0x52ea   :  { %5217 = vrot.lane.b32.xlu1 %v7932_v32, %s8075_s3 }
0x535c   :  { %v5218_v8 = vpop.permute.xlu1 %5217 }
0x535d   :  { %v5220_v38 = vmul.f32 %v7928_v5, %v5218_v8 }
0x535f   :  { %5222 = vrot.lane.b32.xlu0 %v5220_v38, %s8067_s1 }
0x53d1   :  { %v5223_v61 = vpop.permute.xlu0 %5222 }
0x53d2   :  { %5225 = vst.msk [vmem:[#allocation3 + $0xc] sm:$0x3] %vm752_vm4, %v5223_v61  ;;  %7030 = vmatmul.mubr.msk.f32.vlgmr.msra.gmra.mrb[52].mxu1 %vm434_vm3, %v5223_v61 }
0x53d3   :  { %5226 = vst.msk [vmem:[#allocation3 + $0x2] sm:$0x3] %vm755_vm5, %v5223_v61  ;;  %7702 = vmatpush3.bf16.msra.mxu1 %v8179_v33  ;;  %7064 = vmatprep.mubr.msk.f32.mxu1 %vm8073_vm1, %v8074_v43 }
0x53d4   :  { %7703 = vmatprep.subr.bf16.mxu1 %v8072_v26 }
0x53d7   :  { %7705 = vmatpush3.bf16.msra.mxu1 %v8181_v34 }
0x53d8   :  { %7706 = vmatprep.subr.bf16.mxu1 %v8072_v26 }
0x53db   :  { %7708 = vmatpush3.bf16.msra.mxu1 %v8190_v41 }
0x53dc   :  { %7709 = vmatprep.subr.bf16.mxu1 %v8072_v26 }
0x53df   :  { %7711 = vmatpush3.bf16.msra.mxu1 %v8200_v46 }
0x53e0   :  { %7712 = vmatprep.subr.bf16.mxu1 %v8072_v26 }
0x53e3   :  { %7714 = vmatpush3.bf16.msra.mxu1 %v8207_v49 }
0x53e4   :  { %7715 = vmatprep.subr.bf16.mxu1 %v8072_v26 }
0x53e7   :  { %7717 = vmatpush3.bf16.msra.mxu1 %v8215_v52 }
0x53e8   :  { %7718 = vmatprep.subr.bf16.mxu1 %v8072_v26 }
0x53eb   :  { %7720 = vmatpush3.bf16.msra.mxu1 %v8221_v55 }
0x53ec   :  { %7721 = vmatprep.subr.bf16.mxu1 %v8072_v26 }
0x53ef   :  { %7723 = vmatpush3.bf16.msra.mxu1 %v8236_v58 }
0x54a5   :  { %v5295_v33 = vpop.f32.mrb[52].mxu1 }
0x54a6   :  { %v5296_v34 = vadd.f32 %v5295_v33, %v8780_v25  ;;  %v7031_v41 = vpop.f32.mrb[53].mxu1 }
0x54a8   :  { %v5299_v43 = vmul.f32 %v5296_v34, %v5296_v34 }
0x54aa   :  { %v5301_v46 = vrot.slane %v5299_v43, 6 }
0x54ac   :  { %v5303_v49 = vsel %vm512_vm2, %v5296_v34, %v5301_v46 }
0x54ad   :  { %7065 = vmatmul.mubr.f32.vlgmr.msra.gmra.mrb[54].mxu1 %v5303_v49 }
0x5580   :  { %v5370_v40 = vpop.f32.mrb[54].mxu1 }
0x5581   :  { %v5374_v45 = vmul.f32 %v5370_v40, %v5370_v40  ;;  %v7066_v52 = vpop.f32.mrb[55].mxu1  ;;  %v5381_v26 = vsub.f32 %v5296_v34, %v5370_v40 }
0x5583   :  { %v5376_v1 = vrot.slane %v5374_v45, 6 }
0x5585   :  { %v5378_v3 = vsub.f32 %v5370_v40, %v5376_v1 }
0x5587   :  { %v5379_v48 = vadd.f32 1e-05, %v5378_v3 }
0x5589   :  { %7933 = vrsqrt.f32 %v5379_v48 }
0x5593   :  { %v7934_v55 = vpop.eup %7933 }
0x5594   :  { %v5383_v35 = vrot.slane %v7934_v55, 2 }
0x5596   :  { %v5385_v58 = vmul.f32 %v5383_v35, %v5381_v26 }
0x5598   :  { %v5386_v47 = vmul.f32 %v5385_v58, %v8840_v28 }
0x559a   :  { %v5387_v25 = vadd.f32 %v5386_v47, %v8864_v54 }
0x559c   :  { %v5389_v11 = vadd.f32 %v5388_v50, %v5387_v25 }
0x559e   :  { %7935 = vtanh.f32 %v5389_v11  ;;  %v5588_v53 = vmul.f32 -1.442695, %v5389_v11 }
0x55a0   :  { %7937 = vpow2.f32 %v5588_v53 }
0x55a8   :  { %v7936_v36 = vpop.eup %7935 }
0x55a9   :  { %5399 = vrot.lane.b32.xlu1 %v7936_v36, %s8075_s3 }
0x55aa   :  { %v7938_v60 = vpop.eup %7937 }
0x55ab   :  { %v5393_v57 = vadd.f32 1.0, %v7938_v60 }
0x55ad   :  { %7939 = vrcp.f32 %v5393_v57 }
0x55b7   :  { %v7940_v16 = vpop.eup %7939 }
0x55b8   :  { %v5397_v28 = vmul.f32 %v7940_v16, %v9211_v2 }
0x561b   :  { %v5400_v62 = vpop.permute.xlu1 %5399 }
0x561c   :  { %v5402_v7 = vmul.f32 %v7940_v16, %v5400_v62 }
0x561e   :  { %5404 = vrot.lane.b32.xlu0 %v5402_v7, %s8067_s1 }
0x5690   :  { %v5405_v18 = vpop.permute.xlu0 %5404 }
0x5691   :  { %v5407_v54 = vadd.f32 %v5405_v18, %v5397_v28 }
0x5693   :  { %v5408_v29 = vmul.f32 %v5407_v54, %v5407_v54 }
0x5695   :  { %v5410_v20 = vrot.slane %v5408_v29, 6 }
0x5697   :  { %v5412_v24 = vsel %vm512_vm2, %v5407_v54, %v5410_v20 }
0x5698   :  { %5414 = vrot.lane.b32.xlu1 %v5412_v24, %s8076_s25 }
0x570a   :  { %v5415_v12 = vpop.permute.xlu1 %5414 }
0x570b   :  { %7076 = vmatmul.mubr.msk.f32.vlgmr.msra.gmra.mrb[50].mxu0 %vm434_vm3, %v5415_v12 }
0x57de   :  { %v5484_v5 = vpop.f32.mrb[50].mxu0 }
0x57df   :  { %v5488_v15 = vmul.f32 %v5484_v5, %v5484_v5  ;;  %5496 = vrot.lane.b32.xlu0 %v5484_v5, %s8067_s1  ;;  %v7077_v19 = vpop.f32.mrb[51].mxu0 }
0x57e1   :  { %v5490_v30 = vrot.slane %v5488_v15, 6 }
0x57e3   :  { %v5492_v56 = vsub.f32 %v5484_v5, %v5490_v30 }
0x57e5   :  { %v5493_v17 = vadd.f32 1e-05, %v5492_v56 }
0x57e7   :  { %7941 = vrsqrt.f32 %v5493_v17 }
0x57f1   :  { %v7942_v2 = vpop.eup %7941 }
0x57f2   :  { %v5501_v22 = vrot.slane %v7942_v2, 2 }
0x57f4   :  { %5502 = vrot.lane.b32.xlu1 %v5501_v22, %s8067_s1 }
0x5851   :  { %v5497_v9 = vpop.permute.xlu0 %5496 }
0x5852   :  { %v5499_v13 = vsub.f32 %v5407_v54, %v5497_v9 }
0x5866   :  { %v5503_v14 = vpop.permute.xlu1 %5502 }
0x5867   :  { %v5505_v23 = vmul.f32 %v5503_v14, %v5499_v13 }
0x5869   :  { %v5506_v59 = vmul.f32 %v5505_v23, %v8895_v37 }
0x586b   :  { %v5507_v44 = vadd.f32 %v5506_v59, %v8898_v39 }
0x586d   :  { %7943 = vtanh.f32 %v5507_v44 }
0x5877   :  { %v7944_v6 = vpop.eup %7943 }
0x5878   :  { %5510 = vrot.lane.b32.xlu0 %v7944_v6, %s8075_s3 }
0x58ea   :  { %v5511_v51 = vpop.permute.xlu0 %5510 }
0x58eb   :  { %v5513_v27 = vmul.f32 %v7940_v16, %v5511_v51 }
0x58ed   :  { %5515 = vrot.lane.b32.xlu1 %v5513_v27, %s8067_s1 }
0x595f   :  { %v5516_v4 = vpop.permute.xlu1 %5515 }
0x5960   :  { %5518 = vst.msk [vmem:[#allocation3 + $0xe] sm:$0x3] %vm752_vm4, %v5516_v4 }
0x5961   :  { %5519 = vst.msk [vmem:[#allocation3] sm:$0x3] %vm755_vm5, %v5516_v4 }
0x5967   :  { %v5520_v37 = vld [vmem:[#allocation3 + $0xe] sm:$0x3] }
0x5968   :  { %5522 = vst.msk [vmem:[#allocation12] sm:$0x3] %vm5521_vm6, %v5520_v37 }
0x5969   :  { %8044 = shalt.err (!%p8041_p8)
}
0x596a   :  { %s8045_s17 = scalar_lea.hbm %s9286_s4, 32 }
0x596b   :  { %p8046_p9 = scmp.ne.s32.totalorder %s9286_s4, %s8045_s17  ;;  %p8049_p10 = scmp.lt.u32.totalorder %s8045_s17, %s9286_s4 }
0x596d   :  { %p8051_p11 = pnand %p8049_p10, %p8046_p9 }
0x596f   :  { %8054 = shalt.err (!%p8051_p11)
}
0x5970   :  { %5532 = dma.vmem_to_hbm [thread:$0]  %s5530_s14, 32, %s9286_s4, [#allocation6]  }
0x5971   :  { %8061 = dma.done.wait [#allocation6], 32  }
0x5972   :  { %8062 = vsyncadd [#allocation6], 4294967264 }
0x5973   :  { %5536 = vsyncpa [#allocation5], 1 }
0x5974   :  { %5537 = vsyncpa [#allocation8], 1 }
0x5975   :  { %5538 = vsyncpa [#allocation11], 1 }
0x5976   :  { %5539 = vsyncpa [#allocation6], 1 }

</bundles_post_ra>
